<compile_context>
chip_gen: v5e
topology: v5e:2x2
jax: 0.10.0
libtpu: 0.0.40
codegen_flags: <defaults>
</compile_context>

<pallas_src>
import jax
import jax.numpy as jnp
from jax import lax
from jax.experimental import pallas as pl
from jax.experimental.pallas import tpu as pltpu

# Small synthetic sizes consistent with the module's forward.
BS, SEQ, I_DIM, H_DIM = 2, 8, 16, 32
NUM_LAYERS = 2
LN_EPS = 1e-5


def _layer_norm(x, gamma, beta):
    mean = jnp.mean(x, axis=-1, keepdims=True)
    var = jnp.mean((x - mean) ** 2, axis=-1, keepdims=True)
    return (x - mean) * lax.rsqrt(var + LN_EPS) * gamma + beta


def enhanced_lstm_kernel(
    x_ref,                                   # (SEQ*BS, I)  time-major rows t*BS+b
    wxp_ref, bxp_ref,                        # (I, 6H), (1, 6H) packed x-facing proj
    wg0h_ref,                                # (H, 4H)  layer-0 recurrent weight
    wg1_ref, bg1_ref,                        # (2H, 4H), (1, 4H) layer-1 gates
    ln0_ref, ln1_ref,                        # (4, 1, H) layernorm gammas/betas
    wa1_ref, ba1_ref, wa2_ref, ba2_ref,      # attention MLP
    g_ref, gt_ref,                           # (BS, SEQ*BS), (SEQ*BS, BS) one-hots
    hseq_ref,                                # out (SEQ*BS, H)
    attended_ref,                            # out (BS, H)
    attnw_ref,                               # out (SEQ*BS, 1)
    xproj_ref,                               # scratch (SEQ*BS, 6H)
    h01_ref,                                 # scratch (BS, 2H) layer-1 concat buf
):
    H = H_DIM

    # ---- hoisted, batched x-projection for the whole sequence (one matmul) ----
    xproj_ref[...] = (
        jnp.dot(x_ref[...], wxp_ref[...], preferred_element_type=jnp.float32)
        + bxp_ref[...])

    # ---- loop-invariant weights / params hoisted above the recurrence ----
    wg0h = wg0h_ref[...]
    wg1 = wg1_ref[...]
    bg1 = bg1_ref[...]
    ln0 = ln0_ref[...]
    ln1 = ln1_ref[...]

    def cell(gates, c_prev, ln):
        i_t = jax.nn.sigmoid(gates[:, 0 * H:1 * H])
        f_t = jax.nn.sigmoid(gates[:, 1 * H:2 * H])
        g_t = jnp.tanh(gates[:, 2 * H:3 * H])
        o_t = jax.nn.sigmoid(gates[:, 3 * H:4 * H])
        c_new = _layer_norm(f_t * c_prev + i_t * g_t, ln[0], ln[1])
        h_new = _layer_norm(o_t * jnp.tanh(c_new), ln[2], ln[3])
        return h_new, c_new

    def step(t, carry):
        h0p, c0p, h1p, c1p = carry
        xp = xproj_ref[pl.ds(t * BS, BS), :]              # (BS, 6H)

        # layer 0: x-part (incl. bias) precomputed; only h @ w_h is serial.
        gates0 = xp[:, :4 * H] + jnp.dot(
            h0p, wg0h, preferred_element_type=jnp.float32)
        h0, c0 = cell(gates0, c0p, ln0)
        h0 = h0 + xp[:, 4 * H:5 * H]     # residual_proj(x) + skip0(x) (folded)

        # layer 1: single concatenated K=2H matmul (concat via lane slices).
        h01_ref[:, 0:H] = h0
        h01_ref[:, H:2 * H] = h1p
        gates1 = jnp.dot(h01_ref[...], wg1,
                         preferred_element_type=jnp.float32) + bg1
        h1, c1 = cell(gates1, c1p, ln1)
        h1 = h1 + xp[:, 5 * H:6 * H]     # skip1(x)

        hseq_ref[pl.ds(t * BS, BS), :] = (h0 + h1) * (1.0 / NUM_LAYERS)
        return (h0, c0, h1, c1)

    z = jnp.zeros((BS, H), jnp.float32)
    lax.fori_loop(0, SEQ, step, (z, z, z, z), unroll=True)

    # ---- attention pooling: batched, post-loop ----
    hs = hseq_ref[...]                                    # (SEQ*BS, H)
    e = jnp.tanh(jnp.dot(hs, wa1_ref[...],
                         preferred_element_type=jnp.float32) + ba1_ref[...])
    logits = jnp.sum(e * wa2_ref[...], axis=-1, keepdims=True) + ba2_ref[...]

    # Softmax over time, independently per batch (rows t*BS+b share batch b).
    # A single global max shift is valid (softmax is shift-invariant per
    # group); the per-group sum / re-broadcast is done with constant one-hot
    # grouping matrices on the MXU, keeping the finalize purely 2D.
    logits = logits - jnp.max(logits, axis=0, keepdims=True)
    ex = jnp.exp(logits)                                  # (SEQ*BS, 1)
    denom = jnp.dot(g_ref[...], ex,
                    preferred_element_type=jnp.float32)   # (BS, 1)
    denom_rows = jnp.dot(gt_ref[...], denom,
                         preferred_element_type=jnp.float32)  # (SEQ*BS, 1)
    w = ex / denom_rows                                   # attention weights
    attnw_ref[...] = w
    attended_ref[...] = jnp.dot(g_ref[...], w * hs,
                                preferred_element_type=jnp.float32)  # (BS, H)


def enhanced_lstm_forward(x, p):
    """x: (BS, SEQ, I) -> (attended (BS,H), hidden_seq (BS,SEQ,H),
    attention_weights (BS,SEQ,1))."""
    x_tm = jnp.transpose(x, (1, 0, 2)).astype(jnp.float32)   # (SEQ, BS, I)
    x2d = x_tm.reshape(SEQ * BS, I_DIM)                      # row = t*BS + b

    # Packed x-facing weights: [wg0_x | residual_proj + skip0 | skip1].
    wxp = jnp.concatenate(
        [p["wg0"][:I_DIM, :], p["wr"] + p["wskip"][0], p["wskip"][1]], axis=1)
    bxp = jnp.concatenate(
        [p["bg0"], p["br"] + p["bskip"][0], p["bskip"][1]], axis=1)
    wg0h = p["wg0"][I_DIM:, :]

    # One-hot grouping matrices: flat row r belongs to batch r % BS.
    r = jnp.arange(SEQ * BS)
    g = (r[None, :] % BS == jnp.arange(BS)[:, None]).astype(jnp.float32)
    gt = jnp.transpose(g)

    inputs = (x2d, wxp, bxp, wg0h, p["wg1"], p["bg1"], p["ln0"], p["ln1"],
              p["wa1"], p["ba1"], p["wa2"], p["ba2"], g, gt)

    vmem = pltpu.MemorySpace.VMEM
    out_shape = (
        jax.ShapeDtypeStruct((SEQ * BS, H_DIM), jnp.float32),   # hidden_seq
        jax.ShapeDtypeStruct((BS, H_DIM), jnp.float32),         # attended
        jax.ShapeDtypeStruct((SEQ * BS, 1), jnp.float32),       # attn weights
    )
    hseq2d, attended, attnw = pl.pallas_call(
        enhanced_lstm_kernel,
        out_shape=out_shape,
        in_specs=[pl.BlockSpec(memory_space=vmem)] * len(inputs),
        out_specs=tuple(pl.BlockSpec(memory_space=vmem) for _ in out_shape),
        scratch_shapes=[
            pltpu.VMEM((SEQ * BS, 6 * H_DIM), jnp.float32),   # x-projection
            pltpu.VMEM((BS, 2 * H_DIM), jnp.float32),          # layer-1 concat
        ],
    )(*inputs)

    hidden_seq = jnp.transpose(hseq2d.reshape(SEQ, BS, H_DIM), (1, 0, 2))
    attn_w = jnp.transpose(attnw.reshape(SEQ, BS), (1, 0))[:, :, None]
    return attended, hidden_seq, attn_w


# ----------------------------- pure-JAX reference ---------------------------

def _lstm_cell_ref(x_t, h, c, w_x, w_h, b, ln):
    gates = x_t @ w_x + h @ w_h + b
    i_t = jax.nn.sigmoid(gates[:, :H_DIM])
    f_t = jax.nn.sigmoid(gates[:, H_DIM:2 * H_DIM])
    g_t = jnp.tanh(gates[:, 2 * H_DIM:3 * H_DIM])
    o_t = jax.nn.sigmoid(gates[:, 3 * H_DIM:])
    c_new = _layer_norm(f_t * c + i_t * g_t, ln[0], ln[1])
    h_new = _layer_norm(o_t * jnp.tanh(c_new), ln[2], ln[3])
    return h_new, c_new


def reference_forward(x, p):
    """Mirrors the PyTorch forward (eval mode)."""
    bs, seq, _ = x.shape
    h = [jnp.zeros((bs, H_DIM), jnp.float32) for _ in range(NUM_LAYERS)]
    c = [jnp.zeros((bs, H_DIM), jnp.float32) for _ in range(NUM_LAYERS)]
    rows = []
    for t in range(seq):
        x_t = x[:, t, :]
        h0, c0 = _lstm_cell_ref(x_t, h[0], c[0],
                                p["wg0"][:I_DIM], p["wg0"][I_DIM:],
                                p["bg0"], p["ln0"])
        h0 = h0 + x_t @ p["wr"] + p["br"]
        h0 = h0 + x_t @ p["wskip"][0] + p["bskip"][0]
        h[0], c[0] = h0, c0
        h1, c1 = _lstm_cell_ref(h0, h[1], c[1],
                                p["wg1"][:H_DIM], p["wg1"][H_DIM:],
                                p["bg1"], p["ln1"])
        h1 = h1 + x_t @ p["wskip"][1] + p["bskip"][1]
        h[1], c[1] = h1, c1
        rows.append((h0 + h1) / NUM_LAYERS)
    hidden_seq = jnp.stack(rows, axis=1)                  # (bs, seq, H)
    e = jnp.tanh(hidden_seq @ p["wa1"] + p["ba1"])
    scores = jnp.sum(e * p["wa2"], axis=-1, keepdims=True) + p["ba2"][0, 0]
    attn_w = jax.nn.softmax(scores, axis=1)
    attended = jnp.sum(attn_w * hidden_seq, axis=1)
    return attended, hidden_seq, attn_w


def init_params(key):
    ks = jax.random.split(key, 12)

    def xavier(k, shape):
        fan_in, fan_out = shape[-2], shape[-1]
        lim = (6.0 / (fan_in + fan_out)) ** 0.5
        return jax.random.uniform(k, shape, jnp.float32, -lim, lim)

    def ln_params():
        # [ln1_gamma, ln1_beta, ln2_gamma, ln2_beta], each (1, H)
        return jnp.stack([jnp.ones((1, H_DIM), jnp.float32),
                          jnp.zeros((1, H_DIM), jnp.float32),
                          jnp.ones((1, H_DIM), jnp.float32),
                          jnp.zeros((1, H_DIM), jnp.float32)], axis=0)

    return {
        "wg0": xavier(ks[0], (I_DIM + H_DIM, 4 * H_DIM)),
        "bg0": 0.01 * jax.random.normal(ks[1], (1, 4 * H_DIM), jnp.float32),
        "ln0": ln_params(),
        "wr": xavier(ks[2], (I_DIM, H_DIM)),
        "br": 0.01 * jax.random.normal(ks[3], (1, H_DIM), jnp.float32),
        "wg1": xavier(ks[4], (2 * H_DIM, 4 * H_DIM)),
        "bg1": 0.01 * jax.random.normal(ks[5], (1, 4 * H_DIM), jnp.float32),
        "ln1": ln_params(),
        "wskip": xavier(ks[6], (NUM_LAYERS, I_DIM, H_DIM)),
        "bskip": 0.01 * jax.random.normal(ks[7], (NUM_LAYERS, 1, H_DIM),
                                          jnp.float32),
        "wa1": xavier(ks[8], (H_DIM, H_DIM)),
        "ba1": 0.01 * jax.random.normal(ks[9], (1, H_DIM), jnp.float32),
        "wa2": xavier(ks[10], (1, H_DIM)),   # Linear(H, 1) weight (row vec)
        "ba2": 0.01 * jax.random.normal(ks[11], (1, 1), jnp.float32),
    }


if __name__ == "__main__":
    key = jax.random.PRNGKey(0)
    k_x, k_p = jax.random.split(key)
    x = jax.random.normal(k_x, (BS, SEQ, I_DIM), jnp.float32)
    params = init_params(k_p)

    attended, hidden_seq, attn_w = jax.block_until_ready(
        jax.jit(enhanced_lstm_forward)(x, params))

    assert attended.shape == (BS, H_DIM)
    assert hidden_seq.shape == (BS, SEQ, H_DIM)
    assert attn_w.shape == (BS, SEQ, 1)

    ref_att, ref_hs, ref_w = reference_forward(x, params)
    err = max(
        float(jnp.max(jnp.abs(attended - ref_att))),
        float(jnp.max(jnp.abs(hidden_seq - ref_hs))),
        float(jnp.max(jnp.abs(attn_w - ref_w))),
    )
    assert err < 1e-2, f"kernel/reference mismatch: max abs err = {err}"
    print("KERNEL_OK")
</pallas_src>

<mosaic_0001>
module attributes {stable_mosaic.version = 11 : i64} {
  func.func @enhanced_lstm_kernel(%arg0: memref<16x16xf32, #tpu.memory_space<vmem>>, %arg1: memref<16x192xf32, #tpu.memory_space<vmem>>, %arg2: memref<1x192xf32, #tpu.memory_space<vmem>>, %arg3: memref<32x128xf32, #tpu.memory_space<vmem>>, %arg4: memref<64x128xf32, #tpu.memory_space<vmem>>, %arg5: memref<1x128xf32, #tpu.memory_space<vmem>>, %arg6: memref<4x1x32xf32, #tpu.memory_space<vmem>>, %arg7: memref<4x1x32xf32, #tpu.memory_space<vmem>>, %arg8: memref<32x32xf32, #tpu.memory_space<vmem>>, %arg9: memref<1x32xf32, #tpu.memory_space<vmem>>, %arg10: memref<1x32xf32, #tpu.memory_space<vmem>>, %arg11: memref<1x1xf32, #tpu.memory_space<vmem>>, %arg12: memref<2x16xf32, #tpu.memory_space<vmem>>, %arg13: memref<16x2xf32, #tpu.memory_space<vmem>>, %arg14: memref<16x32xf32, #tpu.memory_space<vmem>>, %arg15: memref<2x32xf32, #tpu.memory_space<vmem>>, %arg16: memref<16x1xf32, #tpu.memory_space<vmem>>, %arg17: memref<16x192xf32, #tpu.memory_space<vmem>>, %arg18: memref<2x64xf32, #tpu.memory_space<vmem>>) attributes {dimension_semantics = [], scalar_prefetch = 0 : i64, scratch_operands = 2 : i64, tpu.core_type = #tpu.core_type<tc>} {
    %c0 = arith.constant 0 : index
    %c0_0 = arith.constant 0 : index
    %0 = vector.load %arg0[%c0, %c0_0] : memref<16x16xf32, #tpu.memory_space<vmem>>, vector<16x16xf32>
    %c0_1 = arith.constant 0 : index
    %c0_2 = arith.constant 0 : index
    %1 = vector.load %arg1[%c0_1, %c0_2] : memref<16x192xf32, #tpu.memory_space<vmem>>, vector<16x192xf32>
    %cst = arith.constant dense<0.000000e+00> : vector<16x192xf32>
    %2 = tpu.matmul %0, %1, %cst {dimension_numbers = #tpu.dot_dimension_numbers<[1], [0], [0], [1], [0, 0, 1, 1], [], []>} : vector<16x16xf32>, vector<16x192xf32>, vector<16x192xf32> -> vector<16x192xf32>
    %c0_3 = arith.constant 0 : index
    %c0_4 = arith.constant 0 : index
    %3 = vector.load %arg2[%c0_3, %c0_4] : memref<1x192xf32, #tpu.memory_space<vmem>>, vector<1x192xf32>
    %4 = vector.broadcast %3 : vector<1x192xf32> to vector<16x192xf32>
    %5 = arith.addf %2, %4 : vector<16x192xf32>
    %c0_5 = arith.constant 0 : index
    %c0_6 = arith.constant 0 : index
    %6 = vector.load %arg17[%c0_5, %c0_6] : memref<16x192xf32, #tpu.memory_space<vmem>>, vector<16x192xf32>
    tpu.vector_store %arg17[%c0_5, %c0_6], %5 {strides = array<i32>} : memref<16x192xf32, #tpu.memory_space<vmem>>, vector<16x192xf32>,
    %c0_7 = arith.constant 0 : index
    %c0_8 = arith.constant 0 : index
    %7 = vector.load %arg3[%c0_7, %c0_8] : memref<32x128xf32, #tpu.memory_space<vmem>>, vector<32x128xf32>
    %c0_9 = arith.constant 0 : index
    %c0_10 = arith.constant 0 : index
    %8 = vector.load %arg4[%c0_9, %c0_10] : memref<64x128xf32, #tpu.memory_space<vmem>>, vector<64x128xf32>
    %c0_11 = arith.constant 0 : index
    %c0_12 = arith.constant 0 : index
    %9 = vector.load %arg5[%c0_11, %c0_12] : memref<1x128xf32, #tpu.memory_space<vmem>>, vector<1x128xf32>
    %c0_13 = arith.constant 0 : index
    %c0_14 = arith.constant 0 : index
    %c0_15 = arith.constant 0 : index
    %10 = vector.load %arg6[%c0_13, %c0_14, %c0_15] : memref<4x1x32xf32, #tpu.memory_space<vmem>>, vector<4x1x32xf32>
    %c0_16 = arith.constant 0 : index
    %c0_17 = arith.constant 0 : index
    %c0_18 = arith.constant 0 : index
    %11 = vector.load %arg7[%c0_16, %c0_17, %c0_18] : memref<4x1x32xf32, #tpu.memory_space<vmem>>, vector<4x1x32xf32>
    %cst_19 = arith.constant 0.000000e+00 : f32
    %12 = vector.broadcast %cst_19 : f32 to vector<2x32xf32>
    %c0_i32 = arith.constant 0 : i32
    %c2_i32 = arith.constant 2 : i32
    %13 = arith.muli %c0_i32, %c2_i32 : i32
    %14 = arith.index_cast %13 : i32 to index
    %c0_20 = arith.constant 0 : index
    %15 = vector.load %arg17[%14, %c0_20] : memref<16x192xf32, #tpu.memory_space<vmem>>, vector<2x192xf32>
    %16 = vector.extract_strided_slice %15 {offsets = [0, 0], sizes = [2, 128], strides = [1, 1]} : vector<2x192xf32> to vector<2x128xf32>
    %cst_21 = arith.constant dense<0.000000e+00> : vector<2x128xf32>
    %17 = tpu.matmul %12, %7, %cst_21 {dimension_numbers = #tpu.dot_dimension_numbers<[1], [0], [0], [1], [0, 0, 1, 1], [], []>} : vector<2x32xf32>, vector<32x128xf32>, vector<2x128xf32> -> vector<2x128xf32>
    %18 = arith.addf %16, %17 : vector<2x128xf32>
    %19 = vector.extract_strided_slice %18 {offsets = [0, 0], sizes = [2, 32], strides = [1, 1]} : vector<2x128xf32> to vector<2x32xf32>
    %20 = arith.negf %19 : vector<2x32xf32>
    %21 = math.exp %20 : vector<2x32xf32>
    %cst_22 = arith.constant 1.000000e+00 : f32
    %22 = vector.broadcast %cst_22 : f32 to vector<2x32xf32>
    %23 = arith.addf %22, %21 : vector<2x32xf32>
    %24 = arith.divf %22, %23 : vector<2x32xf32>
    %25 = vector.extract_strided_slice %18 {offsets = [0, 32], sizes = [2, 32], strides = [1, 1]} : vector<2x128xf32> to vector<2x32xf32>
    %26 = arith.negf %25 : vector<2x32xf32>
    %27 = math.exp %26 : vector<2x32xf32>
    %cst_23 = arith.constant 1.000000e+00 : f32
    %28 = vector.broadcast %cst_23 : f32 to vector<2x32xf32>
    %29 = arith.addf %28, %27 : vector<2x32xf32>
    %30 = arith.divf %28, %29 : vector<2x32xf32>
    %31 = vector.extract_strided_slice %18 {offsets = [0, 64], sizes = [2, 32], strides = [1, 1]} : vector<2x128xf32> to vector<2x32xf32>
    %32 = math.tanh %31 : vector<2x32xf32>
    %33 = vector.extract_strided_slice %18 {offsets = [0, 96], sizes = [2, 32], strides = [1, 1]} : vector<2x128xf32> to vector<2x32xf32>
    %34 = arith.negf %33 : vector<2x32xf32>
    %35 = math.exp %34 : vector<2x32xf32>
    %cst_24 = arith.constant 1.000000e+00 : f32
    %36 = vector.broadcast %cst_24 : f32 to vector<2x32xf32>
    %37 = arith.addf %36, %35 : vector<2x32xf32>
    %38 = arith.divf %36, %37 : vector<2x32xf32>
    %39 = arith.mulf %30, %12 : vector<2x32xf32>
    %40 = arith.mulf %24, %32 : vector<2x32xf32>
    %41 = arith.addf %39, %40 : vector<2x32xf32>
    %42 = vector.extract_strided_slice %10 {offsets = [0, 0, 0], sizes = [1, 1, 32], strides = [1, 1, 1]} : vector<4x1x32xf32> to vector<1x1x32xf32>
    %43 = vector.shape_cast %42 : vector<1x1x32xf32> to vector<1x32xf32>
    %44 = vector.extract_strided_slice %10 {offsets = [1, 0, 0], sizes = [1, 1, 32], strides = [1, 1, 1]} : vector<4x1x32xf32> to vector<1x1x32xf32>
    %45 = vector.shape_cast %44 : vector<1x1x32xf32> to vector<1x32xf32>
    %cst_25 = arith.constant dense<0.000000e+00> : vector<2xf32>
    %46 = vector.multi_reduction <add>, %41, %cst_25 [1] : vector<2x32xf32> to vector<2xf32>
    %47 = vector.shape_cast %46 : vector<2xf32> to vector<2x1xf32>
    %cst_26 = arith.constant 3.200000e+01 : f32
    %48 = vector.broadcast %cst_26 : f32 to vector<2x1xf32>
    %49 = arith.divf %47, %48 : vector<2x1xf32>
    %50 = vector.broadcast %49 : vector<2x1xf32> to vector<2x32xf32>
    %51 = arith.subf %41, %50 : vector<2x32xf32>
    %52 = arith.mulf %51, %51 : vector<2x32xf32>
    %cst_27 = arith.constant dense<0.000000e+00> : vector<2xf32>
    %53 = vector.multi_reduction <add>, %52, %cst_27 [1] : vector<2x32xf32> to vector<2xf32>
    %54 = vector.shape_cast %53 : vector<2xf32> to vector<2x1xf32>
    %cst_28 = arith.constant 3.200000e+01 : f32
    %55 = vector.broadcast %cst_28 : f32 to vector<2x1xf32>
    %56 = arith.divf %54, %55 : vector<2x1xf32>
    %57 = vector.broadcast %49 : vector<2x1xf32> to vector<2x32xf32>
    %58 = arith.subf %41, %57 : vector<2x32xf32>
    %cst_29 = arith.constant 9.99999974E-6 : f32
    %59 = vector.broadcast %cst_29 : f32 to vector<2x1xf32>
    %60 = arith.addf %56, %59 : vector<2x1xf32>
    %61 = math.rsqrt %60 : vector<2x1xf32>
    %62 = vector.broadcast %61 : vector<2x1xf32> to vector<2x32xf32>
    %63 = arith.mulf %58, %62 : vector<2x32xf32>
    %64 = vector.broadcast %43 : vector<1x32xf32> to vector<2x32xf32>
    %65 = arith.mulf %63, %64 : vector<2x32xf32>
    %66 = vector.broadcast %45 : vector<1x32xf32> to vector<2x32xf32>
    %67 = arith.addf %65, %66 : vector<2x32xf32>
    %68 = math.tanh %67 : vector<2x32xf32>
    %69 = arith.mulf %38, %68 : vector<2x32xf32>
    %70 = vector.extract_strided_slice %10 {offsets = [2, 0, 0], sizes = [1, 1, 32], strides = [1, 1, 1]} : vector<4x1x32xf32> to vector<1x1x32xf32>
    %71 = vector.shape_cast %70 : vector<1x1x32xf32> to vector<1x32xf32>
    %72 = vector.extract_strided_slice %10 {offsets = [3, 0, 0], sizes = [1, 1, 32], strides = [1, 1, 1]} : vector<4x1x32xf32> to vector<1x1x32xf32>
    %73 = vector.shape_cast %72 : vector<1x1x32xf32> to vector<1x32xf32>
    %cst_30 = arith.constant dense<0.000000e+00> : vector<2xf32>
    %74 = vector.multi_reduction <add>, %69, %cst_30 [1] : vector<2x32xf32> to vector<2xf32>
    %75 = vector.shape_cast %74 : vector<2xf32> to vector<2x1xf32>
    %cst_31 = arith.constant 3.200000e+01 : f32
    %76 = vector.broadcast %cst_31 : f32 to vector<2x1xf32>
    %77 = arith.divf %75, %76 : vector<2x1xf32>
    %78 = vector.broadcast %77 : vector<2x1xf32> to vector<2x32xf32>
    %79 = arith.subf %69, %78 : vector<2x32xf32>
    %80 = arith.mulf %79, %79 : vector<2x32xf32>
    %cst_32 = arith.constant dense<0.000000e+00> : vector<2xf32>
    %81 = vector.multi_reduction <add>, %80, %cst_32 [1] : vector<2x32xf32> to vector<2xf32>
    %82 = vector.shape_cast %81 : vector<2xf32> to vector<2x1xf32>
    %cst_33 = arith.constant 3.200000e+01 : f32
    %83 = vector.broadcast %cst_33 : f32 to vector<2x1xf32>
    %84 = arith.divf %82, %83 : vector<2x1xf32>
    %85 = vector.broadcast %77 : vector<2x1xf32> to vector<2x32xf32>
    %86 = arith.subf %69, %85 : vector<2x32xf32>
    %cst_34 = arith.constant 9.99999974E-6 : f32
    %87 = vector.broadcast %cst_34 : f32 to vector<2x1xf32>
    %88 = arith.addf %84, %87 : vector<2x1xf32>
    %89 = math.rsqrt %88 : vector<2x1xf32>
    %90 = vector.broadcast %89 : vector<2x1xf32> to vector<2x32xf32>
    %91 = arith.mulf %86, %90 : vector<2x32xf32>
    %92 = vector.broadcast %71 : vector<1x32xf32> to vector<2x32xf32>
    %93 = arith.mulf %91, %92 : vector<2x32xf32>
    %94 = vector.broadcast %73 : vector<1x32xf32> to vector<2x32xf32>
    %95 = arith.addf %93, %94 : vector<2x32xf32>
    %96 = vector.extract_strided_slice %15 {offsets = [0, 128], sizes = [2, 32], strides = [1, 1]} : vector<2x192xf32> to vector<2x32xf32>
    %97 = arith.addf %95, %96 : vector<2x32xf32>
    %c0_35 = arith.constant 0 : index
    %c0_36 = arith.constant 0 : index
    %98 = vector.load %arg18[%c0_35, %c0_36] : memref<2x64xf32, #tpu.memory_space<vmem>>, vector<2x32xf32>
    tpu.vector_store %arg18[%c0_35, %c0_36], %97 {strides = array<i32>} : memref<2x64xf32, #tpu.memory_space<vmem>>, vector<2x32xf32>,
    %c0_37 = arith.constant 0 : index
    %c32 = arith.constant 32 : index
    %99 = vector.load %arg18[%c0_37, %c32] : memref<2x64xf32, #tpu.memory_space<vmem>>, vector<2x32xf32>
    tpu.vector_store %arg18[%c0_37, %c32], %12 {strides = array<i32>} : memref<2x64xf32, #tpu.memory_space<vmem>>, vector<2x32xf32>,
    %c0_38 = arith.constant 0 : index
    %c0_39 = arith.constant 0 : index
    %100 = vector.load %arg18[%c0_38, %c0_39] : memref<2x64xf32, #tpu.memory_space<vmem>>, vector<2x64xf32>
    %cst_40 = arith.constant dense<0.000000e+00> : vector<2x128xf32>
    %101 = tpu.matmul %100, %8, %cst_40 {dimension_numbers = #tpu.dot_dimension_numbers<[1], [0], [0], [1], [0, 0, 1, 1], [], []>} : vector<2x64xf32>, vector<64x128xf32>, vector<2x128xf32> -> vector<2x128xf32>
    %102 = vector.broadcast %9 : vector<1x128xf32> to vector<2x128xf32>
    %103 = arith.addf %101, %102 : vector<2x128xf32>
    %104 = vector.extract_strided_slice %103 {offsets = [0, 0], sizes = [2, 32], strides = [1, 1]} : vector<2x128xf32> to vector<2x32xf32>
    %105 = arith.negf %104 : vector<2x32xf32>
    %106 = math.exp %105 : vector<2x32xf32>
    %cst_41 = arith.constant 1.000000e+00 : f32
    %107 = vector.broadcast %cst_41 : f32 to vector<2x32xf32>
    %108 = arith.addf %107, %106 : vector<2x32xf32>
    %109 = arith.divf %107, %108 : vector<2x32xf32>
    %110 = vector.extract_strided_slice %103 {offsets = [0, 32], sizes = [2, 32], strides = [1, 1]} : vector<2x128xf32> to vector<2x32xf32>
    %111 = arith.negf %110 : vector<2x32xf32>
    %112 = math.exp %111 : vector<2x32xf32>
    %cst_42 = arith.constant 1.000000e+00 : f32
    %113 = vector.broadcast %cst_42 : f32 to vector<2x32xf32>
    %114 = arith.addf %113, %112 : vector<2x32xf32>
    %115 = arith.divf %113, %114 : vector<2x32xf32>
    %116 = vector.extract_strided_slice %103 {offsets = [0, 64], sizes = [2, 32], strides = [1, 1]} : vector<2x128xf32> to vector<2x32xf32>
    %117 = math.tanh %116 : vector<2x32xf32>
    %118 = vector.extract_strided_slice %103 {offsets = [0, 96], sizes = [2, 32], strides = [1, 1]} : vector<2x128xf32> to vector<2x32xf32>
    %119 = arith.negf %118 : vector<2x32xf32>
    %120 = math.exp %119 : vector<2x32xf32>
    %cst_43 = arith.constant 1.000000e+00 : f32
    %121 = vector.broadcast %cst_43 : f32 to vector<2x32xf32>
    %122 = arith.addf %121, %120 : vector<2x32xf32>
    %123 = arith.divf %121, %122 : vector<2x32xf32>
    %124 = arith.mulf %115, %12 : vector<2x32xf32>
    %125 = arith.mulf %109, %117 : vector<2x32xf32>
    %126 = arith.addf %124, %125 : vector<2x32xf32>
    %127 = vector.extract_strided_slice %11 {offsets = [0, 0, 0], sizes = [1, 1, 32], strides = [1, 1, 1]} : vector<4x1x32xf32> to vector<1x1x32xf32>
    %128 = vector.shape_cast %127 : vector<1x1x32xf32> to vector<1x32xf32>
    %129 = vector.extract_strided_slice %11 {offsets = [1, 0, 0], sizes = [1, 1, 32], strides = [1, 1, 1]} : vector<4x1x32xf32> to vector<1x1x32xf32>
    %130 = vector.shape_cast %129 : vector<1x1x32xf32> to vector<1x32xf32>
    %cst_44 = arith.constant dense<0.000000e+00> : vector<2xf32>
    %131 = vector.multi_reduction <add>, %126, %cst_44 [1] : vector<2x32xf32> to vector<2xf32>
    %132 = vector.shape_cast %131 : vector<2xf32> to vector<2x1xf32>
    %cst_45 = arith.constant 3.200000e+01 : f32
    %133 = vector.broadcast %cst_45 : f32 to vector<2x1xf32>
    %134 = arith.divf %132, %133 : vector<2x1xf32>
    %135 = vector.broadcast %134 : vector<2x1xf32> to vector<2x32xf32>
    %136 = arith.subf %126, %135 : vector<2x32xf32>
    %137 = arith.mulf %136, %136 : vector<2x32xf32>
    %cst_46 = arith.constant dense<0.000000e+00> : vector<2xf32>
    %138 = vector.multi_reduction <add>, %137, %cst_46 [1] : vector<2x32xf32> to vector<2xf32>
    %139 = vector.shape_cast %138 : vector<2xf32> to vector<2x1xf32>
    %cst_47 = arith.constant 3.200000e+01 : f32
    %140 = vector.broadcast %cst_47 : f32 to vector<2x1xf32>
    %141 = arith.divf %139, %140 : vector<2x1xf32>
    %142 = vector.broadcast %134 : vector<2x1xf32> to vector<2x32xf32>
    %143 = arith.subf %126, %142 : vector<2x32xf32>
    %cst_48 = arith.constant 9.99999974E-6 : f32
    %144 = vector.broadcast %cst_48 : f32 to vector<2x1xf32>
    %145 = arith.addf %141, %144 : vector<2x1xf32>
    %146 = math.rsqrt %145 : vector<2x1xf32>
    %147 = vector.broadcast %146 : vector<2x1xf32> to vector<2x32xf32>
    %148 = arith.mulf %143, %147 : vector<2x32xf32>
    %149 = vector.broadcast %128 : vector<1x32xf32> to vector<2x32xf32>
    %150 = arith.mulf %148, %149 : vector<2x32xf32>
    %151 = vector.broadcast %130 : vector<1x32xf32> to vector<2x32xf32>
    %152 = arith.addf %150, %151 : vector<2x32xf32>
    %153 = math.tanh %152 : vector<2x32xf32>
    %154 = arith.mulf %123, %153 : vector<2x32xf32>
    %155 = vector.extract_strided_slice %11 {offsets = [2, 0, 0], sizes = [1, 1, 32], strides = [1, 1, 1]} : vector<4x1x32xf32> to vector<1x1x32xf32>
    %156 = vector.shape_cast %155 : vector<1x1x32xf32> to vector<1x32xf32>
    %157 = vector.extract_strided_slice %11 {offsets = [3, 0, 0], sizes = [1, 1, 32], strides = [1, 1, 1]} : vector<4x1x32xf32> to vector<1x1x32xf32>
    %158 = vector.shape_cast %157 : vector<1x1x32xf32> to vector<1x32xf32>
    %cst_49 = arith.constant dense<0.000000e+00> : vector<2xf32>
    %159 = vector.multi_reduction <add>, %154, %cst_49 [1] : vector<2x32xf32> to vector<2xf32>
    %160 = vector.shape_cast %159 : vector<2xf32> to vector<2x1xf32>
    %cst_50 = arith.constant 3.200000e+01 : f32
    %161 = vector.broadcast %cst_50 : f32 to vector<2x1xf32>
    %162 = arith.divf %160, %161 : vector<2x1xf32>
    %163 = vector.broadcast %162 : vector<2x1xf32> to vector<2x32xf32>
    %164 = arith.subf %154, %163 : vector<2x32xf32>
    %165 = arith.mulf %164, %164 : vector<2x32xf32>
    %cst_51 = arith.constant dense<0.000000e+00> : vector<2xf32>
    %166 = vector.multi_reduction <add>, %165, %cst_51 [1] : vector<2x32xf32> to vector<2xf32>
    %167 = vector.shape_cast %166 : vector<2xf32> to vector<2x1xf32>
    %cst_52 = arith.constant 3.200000e+01 : f32
    %168 = vector.broadcast %cst_52 : f32 to vector<2x1xf32>
    %169 = arith.divf %167, %168 : vector<2x1xf32>
    %170 = vector.broadcast %162 : vector<2x1xf32> to vector<2x32xf32>
    %171 = arith.subf %154, %170 : vector<2x32xf32>
    %cst_53 = arith.constant 9.99999974E-6 : f32
    %172 = vector.broadcast %cst_53 : f32 to vector<2x1xf32>
    %173 = arith.addf %169, %172 : vector<2x1xf32>
    %174 = math.rsqrt %173 : vector<2x1xf32>
    %175 = vector.broadcast %174 : vector<2x1xf32> to vector<2x32xf32>
    %176 = arith.mulf %171, %175 : vector<2x32xf32>
    %177 = vector.broadcast %156 : vector<1x32xf32> to vector<2x32xf32>
    %178 = arith.mulf %176, %177 : vector<2x32xf32>
    %179 = vector.broadcast %158 : vector<1x32xf32> to vector<2x32xf32>
    %180 = arith.addf %178, %179 : vector<2x32xf32>
    %181 = vector.extract_strided_slice %15 {offsets = [0, 160], sizes = [2, 32], strides = [1, 1]} : vector<2x192xf32> to vector<2x32xf32>
    %182 = arith.addf %180, %181 : vector<2x32xf32>
    %183 = arith.addf %97, %182 : vector<2x32xf32>
    %cst_54 = arith.constant 5.000000e-01 : f32
    %184 = vector.broadcast %cst_54 : f32 to vector<2x32xf32>
    %185 = arith.mulf %183, %184 : vector<2x32xf32>
    %c2_i32_55 = arith.constant 2 : i32
    %186 = arith.muli %c0_i32, %c2_i32_55 : i32
    %187 = arith.index_cast %186 : i32 to index
    %c0_56 = arith.constant 0 : index
    %188 = vector.load %arg14[%187, %c0_56] : memref<16x32xf32, #tpu.memory_space<vmem>>, vector<2x32xf32>
    tpu.vector_store %arg14[%187, %c0_56], %185 {strides = array<i32>} : memref<16x32xf32, #tpu.memory_space<vmem>>, vector<2x32xf32>,
    %c1_i32 = arith.constant 1 : i32
    %c2_i32_57 = arith.constant 2 : i32
    %189 = arith.muli %c1_i32, %c2_i32_57 : i32
    %190 = arith.index_cast %189 : i32 to index
    %c0_58 = arith.constant 0 : index
    %191 = vector.load %arg17[%190, %c0_58] : memref<16x192xf32, #tpu.memory_space<vmem>>, vector<2x192xf32>
    %192 = vector.extract_strided_slice %191 {offsets = [0, 0], sizes = [2, 128], strides = [1, 1]} : vector<2x192xf32> to vector<2x128xf32>
    %cst_59 = arith.constant dense<0.000000e+00> : vector<2x128xf32>
    %193 = tpu.matmul %97, %7, %cst_59 {dimension_numbers = #tpu.dot_dimension_numbers<[1], [0], [0], [1], [0, 0, 1, 1], [], []>} : vector<2x32xf32>, vector<32x128xf32>, vector<2x128xf32> -> vector<2x128xf32>
    %194 = arith.addf %192, %193 : vector<2x128xf32>
    %195 = vector.extract_strided_slice %194 {offsets = [0, 0], sizes = [2, 32], strides = [1, 1]} : vector<2x128xf32> to vector<2x32xf32>
    %196 = arith.negf %195 : vector<2x32xf32>
    %197 = math.exp %196 : vector<2x32xf32>
    %cst_60 = arith.constant 1.000000e+00 : f32
    %198 = vector.broadcast %cst_60 : f32 to vector<2x32xf32>
    %199 = arith.addf %198, %197 : vector<2x32xf32>
    %200 = arith.divf %198, %199 : vector<2x32xf32>
    %201 = vector.extract_strided_slice %194 {offsets = [0, 32], sizes = [2, 32], strides = [1, 1]} : vector<2x128xf32> to vector<2x32xf32>
    %202 = arith.negf %201 : vector<2x32xf32>
    %203 = math.exp %202 : vector<2x32xf32>
    %cst_61 = arith.constant 1.000000e+00 : f32
    %204 = vector.broadcast %cst_61 : f32 to vector<2x32xf32>
    %205 = arith.addf %204, %203 : vector<2x32xf32>
    %206 = arith.divf %204, %205 : vector<2x32xf32>
    %207 = vector.extract_strided_slice %194 {offsets = [0, 64], sizes = [2, 32], strides = [1, 1]} : vector<2x128xf32> to vector<2x32xf32>
    %208 = math.tanh %207 : vector<2x32xf32>
    %209 = vector.extract_strided_slice %194 {offsets = [0, 96], sizes = [2, 32], strides = [1, 1]} : vector<2x128xf32> to vector<2x32xf32>
    %210 = arith.negf %209 : vector<2x32xf32>
    %211 = math.exp %210 : vector<2x32xf32>
    %cst_62 = arith.constant 1.000000e+00 : f32
    %212 = vector.broadcast %cst_62 : f32 to vector<2x32xf32>
    %213 = arith.addf %212, %211 : vector<2x32xf32>
    %214 = arith.divf %212, %213 : vector<2x32xf32>
    %215 = arith.mulf %206, %67 : vector<2x32xf32>
    %216 = arith.mulf %200, %208 : vector<2x32xf32>
    %217 = arith.addf %215, %216 : vector<2x32xf32>
    %218 = vector.extract_strided_slice %10 {offsets = [0, 0, 0], sizes = [1, 1, 32], strides = [1, 1, 1]} : vector<4x1x32xf32> to vector<1x1x32xf32>
    %219 = vector.shape_cast %218 : vector<1x1x32xf32> to vector<1x32xf32>
    %220 = vector.extract_strided_slice %10 {offsets = [1, 0, 0], sizes = [1, 1, 32], strides = [1, 1, 1]} : vector<4x1x32xf32> to vector<1x1x32xf32>
    %221 = vector.shape_cast %220 : vector<1x1x32xf32> to vector<1x32xf32>
    %cst_63 = arith.constant dense<0.000000e+00> : vector<2xf32>
    %222 = vector.multi_reduction <add>, %217, %cst_63 [1] : vector<2x32xf32> to vector<2xf32>
    %223 = vector.shape_cast %222 : vector<2xf32> to vector<2x1xf32>
    %cst_64 = arith.constant 3.200000e+01 : f32
    %224 = vector.broadcast %cst_64 : f32 to vector<2x1xf32>
    %225 = arith.divf %223, %224 : vector<2x1xf32>
    %226 = vector.broadcast %225 : vector<2x1xf32> to vector<2x32xf32>
    %227 = arith.subf %217, %226 : vector<2x32xf32>
    %228 = arith.mulf %227, %227 : vector<2x32xf32>
    %cst_65 = arith.constant dense<0.000000e+00> : vector<2xf32>
    %229 = vector.multi_reduction <add>, %228, %cst_65 [1] : vector<2x32xf32> to vector<2xf32>
    %230 = vector.shape_cast %229 : vector<2xf32> to vector<2x1xf32>
    %cst_66 = arith.constant 3.200000e+01 : f32
    %231 = vector.broadcast %cst_66 : f32 to vector<2x1xf32>
    %232 = arith.divf %230, %231 : vector<2x1xf32>
    %233 = vector.broadcast %225 : vector<2x1xf32> to vector<2x32xf32>
    %234 = arith.subf %217, %233 : vector<2x32xf32>
    %cst_67 = arith.constant 9.99999974E-6 : f32
    %235 = vector.broadcast %cst_67 : f32 to vector<2x1xf32>
    %236 = arith.addf %232, %235 : vector<2x1xf32>
    %237 = math.rsqrt %236 : vector<2x1xf32>
    %238 = vector.broadcast %237 : vector<2x1xf32> to vector<2x32xf32>
    %239 = arith.mulf %234, %238 : vector<2x32xf32>
    %240 = vector.broadcast %219 : vector<1x32xf32> to vector<2x32xf32>
    %241 = arith.mulf %239, %240 : vector<2x32xf32>
    %242 = vector.broadcast %221 : vector<1x32xf32> to vector<2x32xf32>
    %243 = arith.addf %241, %242 : vector<2x32xf32>
    %244 = math.tanh %243 : vector<2x32xf32>
    %245 = arith.mulf %214, %244 : vector<2x32xf32>
    %246 = vector.extract_strided_slice %10 {offsets = [2, 0, 0], sizes = [1, 1, 32], strides = [1, 1, 1]} : vector<4x1x32xf32> to vector<1x1x32xf32>
    %247 = vector.shape_cast %246 : vector<1x1x32xf32> to vector<1x32xf32>
    %248 = vector.extract_strided_slice %10 {offsets = [3, 0, 0], sizes = [1, 1, 32], strides = [1, 1, 1]} : vector<4x1x32xf32> to vector<1x1x32xf32>
    %249 = vector.shape_cast %248 : vector<1x1x32xf32> to vector<1x32xf32>
    %cst_68 = arith.constant dense<0.000000e+00> : vector<2xf32>
    %250 = vector.multi_reduction <add>, %245, %cst_68 [1] : vector<2x32xf32> to vector<2xf32>
    %251 = vector.shape_cast %250 : vector<2xf32> to vector<2x1xf32>
    %cst_69 = arith.constant 3.200000e+01 : f32
    %252 = vector.broadcast %cst_69 : f32 to vector<2x1xf32>
    %253 = arith.divf %251, %252 : vector<2x1xf32>
    %254 = vector.broadcast %253 : vector<2x1xf32> to vector<2x32xf32>
    %255 = arith.subf %245, %254 : vector<2x32xf32>
    %256 = arith.mulf %255, %255 : vector<2x32xf32>
    %cst_70 = arith.constant dense<0.000000e+00> : vector<2xf32>
    %257 = vector.multi_reduction <add>, %256, %cst_70 [1] : vector<2x32xf32> to vector<2xf32>
    %258 = vector.shape_cast %257 : vector<2xf32> to vector<2x1xf32>
    %cst_71 = arith.constant 3.200000e+01 : f32
    %259 = vector.broadcast %cst_71 : f32 to vector<2x1xf32>
    %260 = arith.divf %258, %259 : vector<2x1xf32>
    %261 = vector.broadcast %253 : vector<2x1xf32> to vector<2x32xf32>
    %262 = arith.subf %245, %261 : vector<2x32xf32>
    %cst_72 = arith.constant 9.99999974E-6 : f32
    %263 = vector.broadcast %cst_72 : f32 to vector<2x1xf32>
    %264 = arith.addf %260, %263 : vector<2x1xf32>
    %265 = math.rsqrt %264 : vector<2x1xf32>
    %266 = vector.broadcast %265 : vector<2x1xf32> to vector<2x32xf32>
    %267 = arith.mulf %262, %266 : vector<2x32xf32>
    %268 = vector.broadcast %247 : vector<1x32xf32> to vector<2x32xf32>
    %269 = arith.mulf %267, %268 : vector<2x32xf32>
    %270 = vector.broadcast %249 : vector<1x32xf32> to vector<2x32xf32>
    %271 = arith.addf %269, %270 : vector<2x32xf32>
    %272 = vector.extract_strided_slice %191 {offsets = [0, 128], sizes = [2, 32], strides = [1, 1]} : vector<2x192xf32> to vector<2x32xf32>
    %273 = arith.addf %271, %272 : vector<2x32xf32>
    %c0_73 = arith.constant 0 : index
    %c0_74 = arith.constant 0 : index
    %274 = vector.load %arg18[%c0_73, %c0_74] : memref<2x64xf32, #tpu.memory_space<vmem>>, vector<2x32xf32>
    tpu.vector_store %arg18[%c0_73, %c0_74], %273 {strides = array<i32>} : memref<2x64xf32, #tpu.memory_space<vmem>>, vector<2x32xf32>,
    %c0_75 = arith.constant 0 : index
    %c32_76 = arith.constant 32 : index
    %275 = vector.load %arg18[%c0_75, %c32_76] : memref<2x64xf32, #tpu.memory_space<vmem>>, vector<2x32xf32>
    tpu.vector_store %arg18[%c0_75, %c32_76], %182 {strides = array<i32>} : memref<2x64xf32, #tpu.memory_space<vmem>>, vector<2x32xf32>,
    %c0_77 = arith.constant 0 : index
    %c0_78 = arith.constant 0 : index
    %276 = vector.load %arg18[%c0_77, %c0_78] : memref<2x64xf32, #tpu.memory_space<vmem>>, vector<2x64xf32>
    %cst_79 = arith.constant dense<0.000000e+00> : vector<2x128xf32>
    %277 = tpu.matmul %276, %8, %cst_79 {dimension_numbers = #tpu.dot_dimension_numbers<[1], [0], [0], [1], [0, 0, 1, 1], [], []>} : vector<2x64xf32>, vector<64x128xf32>, vector<2x128xf32> -> vector<2x128xf32>
    %278 = vector.broadcast %9 : vector<1x128xf32> to vector<2x128xf32>
    %279 = arith.addf %277, %278 : vector<2x128xf32>
    %280 = vector.extract_strided_slice %279 {offsets = [0, 0], sizes = [2, 32], strides = [1, 1]} : vector<2x128xf32> to vector<2x32xf32>
    %281 = arith.negf %280 : vector<2x32xf32>
    %282 = math.exp %281 : vector<2x32xf32>
    %cst_80 = arith.constant 1.000000e+00 : f32
    %283 = vector.broadcast %cst_80 : f32 to vector<2x32xf32>
    %284 = arith.addf %283, %282 : vector<2x32xf32>
    %285 = arith.divf %283, %284 : vector<2x32xf32>
    %286 = vector.extract_strided_slice %279 {offsets = [0, 32], sizes = [2, 32], strides = [1, 1]} : vector<2x128xf32> to vector<2x32xf32>
    %287 = arith.negf %286 : vector<2x32xf32>
    %288 = math.exp %287 : vector<2x32xf32>
    %cst_81 = arith.constant 1.000000e+00 : f32
    %289 = vector.broadcast %cst_81 : f32 to vector<2x32xf32>
    %290 = arith.addf %289, %288 : vector<2x32xf32>
    %291 = arith.divf %289, %290 : vector<2x32xf32>
    %292 = vector.extract_strided_slice %279 {offsets = [0, 64], sizes = [2, 32], strides = [1, 1]} : vector<2x128xf32> to vector<2x32xf32>
    %293 = math.tanh %292 : vector<2x32xf32>
    %294 = vector.extract_strided_slice %279 {offsets = [0, 96], sizes = [2, 32], strides = [1, 1]} : vector<2x128xf32> to vector<2x32xf32>
    %295 = arith.negf %294 : vector<2x32xf32>
    %296 = math.exp %295 : vector<2x32xf32>
    %cst_82 = arith.constant 1.000000e+00 : f32
    %297 = vector.broadcast %cst_82 : f32 to vector<2x32xf32>
    %298 = arith.addf %297, %296 : vector<2x32xf32>
    %299 = arith.divf %297, %298 : vector<2x32xf32>
    %300 = arith.mulf %291, %152 : vector<2x32xf32>
    %301 = arith.mulf %285, %293 : vector<2x32xf32>
    %302 = arith.addf %300, %301 : vector<2x32xf32>
    %303 = vector.extract_strided_slice %11 {offsets = [0, 0, 0], sizes = [1, 1, 32], strides = [1, 1, 1]} : vector<4x1x32xf32> to vector<1x1x32xf32>
    %304 = vector.shape_cast %303 : vector<1x1x32xf32> to vector<1x32xf32>
    %305 = vector.extract_strided_slice %11 {offsets = [1, 0, 0], sizes = [1, 1, 32], strides = [1, 1, 1]} : vector<4x1x32xf32> to vector<1x1x32xf32>
    %306 = vector.shape_cast %305 : vector<1x1x32xf32> to vector<1x32xf32>
    %cst_83 = arith.constant dense<0.000000e+00> : vector<2xf32>
    %307 = vector.multi_reduction <add>, %302, %cst_83 [1] : vector<2x32xf32> to vector<2xf32>
    %308 = vector.shape_cast %307 : vector<2xf32> to vector<2x1xf32>
    %cst_84 = arith.constant 3.200000e+01 : f32
    %309 = vector.broadcast %cst_84 : f32 to vector<2x1xf32>
    %310 = arith.divf %308, %309 : vector<2x1xf32>
    %311 = vector.broadcast %310 : vector<2x1xf32> to vector<2x32xf32>
    %312 = arith.subf %302, %311 : vector<2x32xf32>
    %313 = arith.mulf %312, %312 : vector<2x32xf32>
    %cst_85 = arith.constant dense<0.000000e+00> : vector<2xf32>
    %314 = vector.multi_reduction <add>, %313, %cst_85 [1] : vector<2x32xf32> to vector<2xf32>
    %315 = vector.shape_cast %314 : vector<2xf32> to vector<2x1xf32>
    %cst_86 = arith.constant 3.200000e+01 : f32
    %316 = vector.broadcast %cst_86 : f32 to vector<2x1xf32>
    %317 = arith.divf %315, %316 : vector<2x1xf32>
    %318 = vector.broadcast %310 : vector<2x1xf32> to vector<2x32xf32>
    %319 = arith.subf %302, %318 : vector<2x32xf32>
    %cst_87 = arith.constant 9.99999974E-6 : f32
    %320 = vector.broadcast %cst_87 : f32 to vector<2x1xf32>
    %321 = arith.addf %317, %320 : vector<2x1xf32>
    %322 = math.rsqrt %321 : vector<2x1xf32>
    %323 = vector.broadcast %322 : vector<2x1xf32> to vector<2x32xf32>
    %324 = arith.mulf %319, %323 : vector<2x32xf32>
    %325 = vector.broadcast %304 : vector<1x32xf32> to vector<2x32xf32>
    %326 = arith.mulf %324, %325 : vector<2x32xf32>
    %327 = vector.broadcast %306 : vector<1x32xf32> to vector<2x32xf32>
    %328 = arith.addf %326, %327 : vector<2x32xf32>
    %329 = math.tanh %328 : vector<2x32xf32>
    %330 = arith.mulf %299, %329 : vector<2x32xf32>
    %331 = vector.extract_strided_slice %11 {offsets = [2, 0, 0], sizes = [1, 1, 32], strides = [1, 1, 1]} : vector<4x1x32xf32> to vector<1x1x32xf32>
    %332 = vector.shape_cast %331 : vector<1x1x32xf32> to vector<1x32xf32>
    %333 = vector.extract_strided_slice %11 {offsets = [3, 0, 0], sizes = [1, 1, 32], strides = [1, 1, 1]} : vector<4x1x32xf32> to vector<1x1x32xf32>
    %334 = vector.shape_cast %333 : vector<1x1x32xf32> to vector<1x32xf32>
    %cst_88 = arith.constant dense<0.000000e+00> : vector<2xf32>
    %335 = vector.multi_reduction <add>, %330, %cst_88 [1] : vector<2x32xf32> to vector<2xf32>
    %336 = vector.shape_cast %335 : vector<2xf32> to vector<2x1xf32>
    %cst_89 = arith.constant 3.200000e+01 : f32
    %337 = vector.broadcast %cst_89 : f32 to vector<2x1xf32>
    %338 = arith.divf %336, %337 : vector<2x1xf32>
    %339 = vector.broadcast %338 : vector<2x1xf32> to vector<2x32xf32>
    %340 = arith.subf %330, %339 : vector<2x32xf32>
    %341 = arith.mulf %340, %340 : vector<2x32xf32>
    %cst_90 = arith.constant dense<0.000000e+00> : vector<2xf32>
    %342 = vector.multi_reduction <add>, %341, %cst_90 [1] : vector<2x32xf32> to vector<2xf32>
    %343 = vector.shape_cast %342 : vector<2xf32> to vector<2x1xf32>
    %cst_91 = arith.constant 3.200000e+01 : f32
    %344 = vector.broadcast %cst_91 : f32 to vector<2x1xf32>
    %345 = arith.divf %343, %344 : vector<2x1xf32>
    %346 = vector.broadcast %338 : vector<2x1xf32> to vector<2x32xf32>
    %347 = arith.subf %330, %346 : vector<2x32xf32>
    %cst_92 = arith.constant 9.99999974E-6 : f32
    %348 = vector.broadcast %cst_92 : f32 to vector<2x1xf32>
    %349 = arith.addf %345, %348 : vector<2x1xf32>
    %350 = math.rsqrt %349 : vector<2x1xf32>
    %351 = vector.broadcast %350 : vector<2x1xf32> to vector<2x32xf32>
    %352 = arith.mulf %347, %351 : vector<2x32xf32>
    %353 = vector.broadcast %332 : vector<1x32xf32> to vector<2x32xf32>
    %354 = arith.mulf %352, %353 : vector<2x32xf32>
    %355 = vector.broadcast %334 : vector<1x32xf32> to vector<2x32xf32>
    %356 = arith.addf %354, %355 : vector<2x32xf32>
    %357 = vector.extract_strided_slice %191 {offsets = [0, 160], sizes = [2, 32], strides = [1, 1]} : vector<2x192xf32> to vector<2x32xf32>
    %358 = arith.addf %356, %357 : vector<2x32xf32>
    %359 = arith.addf %273, %358 : vector<2x32xf32>
    %cst_93 = arith.constant 5.000000e-01 : f32
    %360 = vector.broadcast %cst_93 : f32 to vector<2x32xf32>
    %361 = arith.mulf %359, %360 : vector<2x32xf32>
    %c2_i32_94 = arith.constant 2 : i32
    %362 = arith.muli %c1_i32, %c2_i32_94 : i32
    %363 = arith.index_cast %362 : i32 to index
    %c0_95 = arith.constant 0 : index
    %364 = vector.load %arg14[%363, %c0_95] : memref<16x32xf32, #tpu.memory_space<vmem>>, vector<2x32xf32>
    tpu.vector_store %arg14[%363, %c0_95], %361 {strides = array<i32>} : memref<16x32xf32, #tpu.memory_space<vmem>>, vector<2x32xf32>,
    %c2_i32_96 = arith.constant 2 : i32
    %c2_i32_97 = arith.constant 2 : i32
    %365 = arith.muli %c2_i32_96, %c2_i32_97 : i32
    %366 = arith.index_cast %365 : i32 to index
    %c0_98 = arith.constant 0 : index
    %367 = vector.load %arg17[%366, %c0_98] : memref<16x192xf32, #tpu.memory_space<vmem>>, vector<2x192xf32>
    %368 = vector.extract_strided_slice %367 {offsets = [0, 0], sizes = [2, 128], strides = [1, 1]} : vector<2x192xf32> to vector<2x128xf32>
    %cst_99 = arith.constant dense<0.000000e+00> : vector<2x128xf32>
    %369 = tpu.matmul %273, %7, %cst_99 {dimension_numbers = #tpu.dot_dimension_numbers<[1], [0], [0], [1], [0, 0, 1, 1], [], []>} : vector<2x32xf32>, vector<32x128xf32>, vector<2x128xf32> -> vector<2x128xf32>
    %370 = arith.addf %368, %369 : vector<2x128xf32>
    %371 = vector.extract_strided_slice %370 {offsets = [0, 0], sizes = [2, 32], strides = [1, 1]} : vector<2x128xf32> to vector<2x32xf32>
    %372 = arith.negf %371 : vector<2x32xf32>
    %373 = math.exp %372 : vector<2x32xf32>
    %cst_100 = arith.constant 1.000000e+00 : f32
    %374 = vector.broadcast %cst_100 : f32 to vector<2x32xf32>
    %375 = arith.addf %374, %373 : vector<2x32xf32>
    %376 = arith.divf %374, %375 : vector<2x32xf32>
    %377 = vector.extract_strided_slice %370 {offsets = [0, 32], sizes = [2, 32], strides = [1, 1]} : vector<2x128xf32> to vector<2x32xf32>
    %378 = arith.negf %377 : vector<2x32xf32>
    %379 = math.exp %378 : vector<2x32xf32>
    %cst_101 = arith.constant 1.000000e+00 : f32
    %380 = vector.broadcast %cst_101 : f32 to vector<2x32xf32>
    %381 = arith.addf %380, %379 : vector<2x32xf32>
    %382 = arith.divf %380, %381 : vector<2x32xf32>
    %383 = vector.extract_strided_slice %370 {offsets = [0, 64], sizes = [2, 32], strides = [1, 1]} : vector<2x128xf32> to vector<2x32xf32>
    %384 = math.tanh %383 : vector<2x32xf32>
    %385 = vector.extract_strided_slice %370 {offsets = [0, 96], sizes = [2, 32], strides = [1, 1]} : vector<2x128xf32> to vector<2x32xf32>
    %386 = arith.negf %385 : vector<2x32xf32>
    %387 = math.exp %386 : vector<2x32xf32>
    %cst_102 = arith.constant 1.000000e+00 : f32
    %388 = vector.broadcast %cst_102 : f32 to vector<2x32xf32>
    %389 = arith.addf %388, %387 : vector<2x32xf32>
    %390 = arith.divf %388, %389 : vector<2x32xf32>
    %391 = arith.mulf %382, %243 : vector<2x32xf32>
    %392 = arith.mulf %376, %384 : vector<2x32xf32>
    %393 = arith.addf %391, %392 : vector<2x32xf32>
    %394 = vector.extract_strided_slice %10 {offsets = [0, 0, 0], sizes = [1, 1, 32], strides = [1, 1, 1]} : vector<4x1x32xf32> to vector<1x1x32xf32>
    %395 = vector.shape_cast %394 : vector<1x1x32xf32> to vector<1x32xf32>
    %396 = vector.extract_strided_slice %10 {offsets = [1, 0, 0], sizes = [1, 1, 32], strides = [1, 1, 1]} : vector<4x1x32xf32> to vector<1x1x32xf32>
    %397 = vector.shape_cast %396 : vector<1x1x32xf32> to vector<1x32xf32>
    %cst_103 = arith.constant dense<0.000000e+00> : vector<2xf32>
    %398 = vector.multi_reduction <add>, %393, %cst_103 [1] : vector<2x32xf32> to vector<2xf32>
    %399 = vector.shape_cast %398 : vector<2xf32> to vector<2x1xf32>
    %cst_104 = arith.constant 3.200000e+01 : f32
    %400 = vector.broadcast %cst_104 : f32 to vector<2x1xf32>
    %401 = arith.divf %399, %400 : vector<2x1xf32>
    %402 = vector.broadcast %401 : vector<2x1xf32> to vector<2x32xf32>
    %403 = arith.subf %393, %402 : vector<2x32xf32>
    %404 = arith.mulf %403, %403 : vector<2x32xf32>
    %cst_105 = arith.constant dense<0.000000e+00> : vector<2xf32>
    %405 = vector.multi_reduction <add>, %404, %cst_105 [1] : vector<2x32xf32> to vector<2xf32>
    %406 = vector.shape_cast %405 : vector<2xf32> to vector<2x1xf32>
    %cst_106 = arith.constant 3.200000e+01 : f32
    %407 = vector.broadcast %cst_106 : f32 to vector<2x1xf32>
    %408 = arith.divf %406, %407 : vector<2x1xf32>
    %409 = vector.broadcast %401 : vector<2x1xf32> to vector<2x32xf32>
    %410 = arith.subf %393, %409 : vector<2x32xf32>
    %cst_107 = arith.constant 9.99999974E-6 : f32
    %411 = vector.broadcast %cst_107 : f32 to vector<2x1xf32>
    %412 = arith.addf %408, %411 : vector<2x1xf32>
    %413 = math.rsqrt %412 : vector<2x1xf32>
    %414 = vector.broadcast %413 : vector<2x1xf32> to vector<2x32xf32>
    %415 = arith.mulf %410, %414 : vector<2x32xf32>
    %416 = vector.broadcast %395 : vector<1x32xf32> to vector<2x32xf32>
    %417 = arith.mulf %415, %416 : vector<2x32xf32>
    %418 = vector.broadcast %397 : vector<1x32xf32> to vector<2x32xf32>
    %419 = arith.addf %417, %418 : vector<2x32xf32>
    %420 = math.tanh %419 : vector<2x32xf32>
    %421 = arith.mulf %390, %420 : vector<2x32xf32>
    %422 = vector.extract_strided_slice %10 {offsets = [2, 0, 0], sizes = [1, 1, 32], strides = [1, 1, 1]} : vector<4x1x32xf32> to vector<1x1x32xf32>
    %423 = vector.shape_cast %422 : vector<1x1x32xf32> to vector<1x32xf32>
    %424 = vector.extract_strided_slice %10 {offsets = [3, 0, 0], sizes = [1, 1, 32], strides = [1, 1, 1]} : vector<4x1x32xf32> to vector<1x1x32xf32>
    %425 = vector.shape_cast %424 : vector<1x1x32xf32> to vector<1x32xf32>
    %cst_108 = arith.constant dense<0.000000e+00> : vector<2xf32>
    %426 = vector.multi_reduction <add>, %421, %cst_108 [1] : vector<2x32xf32> to vector<2xf32>
    %427 = vector.shape_cast %426 : vector<2xf32> to vector<2x1xf32>
    %cst_109 = arith.constant 3.200000e+01 : f32
    %428 = vector.broadcast %cst_109 : f32 to vector<2x1xf32>
    %429 = arith.divf %427, %428 : vector<2x1xf32>
    %430 = vector.broadcast %429 : vector<2x1xf32> to vector<2x32xf32>
    %431 = arith.subf %421, %430 : vector<2x32xf32>
    %432 = arith.mulf %431, %431 : vector<2x32xf32>
    %cst_110 = arith.constant dense<0.000000e+00> : vector<2xf32>
    %433 = vector.multi_reduction <add>, %432, %cst_110 [1] : vector<2x32xf32> to vector<2xf32>
    %434 = vector.shape_cast %433 : vector<2xf32> to vector<2x1xf32>
    %cst_111 = arith.constant 3.200000e+01 : f32
    %435 = vector.broadcast %cst_111 : f32 to vector<2x1xf32>
    %436 = arith.divf %434, %435 : vector<2x1xf32>
    %437 = vector.broadcast %429 : vector<2x1xf32> to vector<2x32xf32>
    %438 = arith.subf %421, %437 : vector<2x32xf32>
    %cst_112 = arith.constant 9.99999974E-6 : f32
    %439 = vector.broadcast %cst_112 : f32 to vector<2x1xf32>
    %440 = arith.addf %436, %439 : vector<2x1xf32>
    %441 = math.rsqrt %440 : vector<2x1xf32>
    %442 = vector.broadcast %441 : vector<2x1xf32> to vector<2x32xf32>
    %443 = arith.mulf %438, %442 : vector<2x32xf32>
    %444 = vector.broadcast %423 : vector<1x32xf32> to vector<2x32xf32>
    %445 = arith.mulf %443, %444 : vector<2x32xf32>
    %446 = vector.broadcast %425 : vector<1x32xf32> to vector<2x32xf32>
    %447 = arith.addf %445, %446 : vector<2x32xf32>
    %448 = vector.extract_strided_slice %367 {offsets = [0, 128], sizes = [2, 32], strides = [1, 1]} : vector<2x192xf32> to vector<2x32xf32>
    %449 = arith.addf %447, %448 : vector<2x32xf32>
    %c0_113 = arith.constant 0 : index
    %c0_114 = arith.constant 0 : index
    %450 = vector.load %arg18[%c0_113, %c0_114] : memref<2x64xf32, #tpu.memory_space<vmem>>, vector<2x32xf32>
    tpu.vector_store %arg18[%c0_113, %c0_114], %449 {strides = array<i32>} : memref<2x64xf32, #tpu.memory_space<vmem>>, vector<2x32xf32>,
    %c0_115 = arith.constant 0 : index
    %c32_116 = arith.constant 32 : index
    %451 = vector.load %arg18[%c0_115, %c32_116] : memref<2x64xf32, #tpu.memory_space<vmem>>, vector<2x32xf32>
    tpu.vector_store %arg18[%c0_115, %c32_116], %358 {strides = array<i32>} : memref<2x64xf32, #tpu.memory_space<vmem>>, vector<2x32xf32>,
    %c0_117 = arith.constant 0 : index
    %c0_118 = arith.constant 0 : index
    %452 = vector.load %arg18[%c0_117, %c0_118] : memref<2x64xf32, #tpu.memory_space<vmem>>, vector<2x64xf32>
    %cst_119 = arith.constant dense<0.000000e+00> : vector<2x128xf32>
    %453 = tpu.matmul %452, %8, %cst_119 {dimension_numbers = #tpu.dot_dimension_numbers<[1], [0], [0], [1], [0, 0, 1, 1], [], []>} : vector<2x64xf32>, vector<64x128xf32>, vector<2x128xf32> -> vector<2x128xf32>
    %454 = vector.broadcast %9 : vector<1x128xf32> to vector<2x128xf32>
    %455 = arith.addf %453, %454 : vector<2x128xf32>
    %456 = vector.extract_strided_slice %455 {offsets = [0, 0], sizes = [2, 32], strides = [1, 1]} : vector<2x128xf32> to vector<2x32xf32>
    %457 = arith.negf %456 : vector<2x32xf32>
    %458 = math.exp %457 : vector<2x32xf32>
    %cst_120 = arith.constant 1.000000e+00 : f32
    %459 = vector.broadcast %cst_120 : f32 to vector<2x32xf32>
    %460 = arith.addf %459, %458 : vector<2x32xf32>
    %461 = arith.divf %459, %460 : vector<2x32xf32>
    %462 = vector.extract_strided_slice %455 {offsets = [0, 32], sizes = [2, 32], strides = [1, 1]} : vector<2x128xf32> to vector<2x32xf32>
    %463 = arith.negf %462 : vector<2x32xf32>
    %464 = math.exp %463 : vector<2x32xf32>
    %cst_121 = arith.constant 1.000000e+00 : f32
    %465 = vector.broadcast %cst_121 : f32 to vector<2x32xf32>
    %466 = arith.addf %465, %464 : vector<2x32xf32>
    %467 = arith.divf %465, %466 : vector<2x32xf32>
    %468 = vector.extract_strided_slice %455 {offsets = [0, 64], sizes = [2, 32], strides = [1, 1]} : vector<2x128xf32> to vector<2x32xf32>
    %469 = math.tanh %468 : vector<2x32xf32>
    %470 = vector.extract_strided_slice %455 {offsets = [0, 96], sizes = [2, 32], strides = [1, 1]} : vector<2x128xf32> to vector<2x32xf32>
    %471 = arith.negf %470 : vector<2x32xf32>
    %472 = math.exp %471 : vector<2x32xf32>
    %cst_122 = arith.constant 1.000000e+00 : f32
    %473 = vector.broadcast %cst_122 : f32 to vector<2x32xf32>
    %474 = arith.addf %473, %472 : vector<2x32xf32>
    %475 = arith.divf %473, %474 : vector<2x32xf32>
    %476 = arith.mulf %467, %328 : vector<2x32xf32>
    %477 = arith.mulf %461, %469 : vector<2x32xf32>
    %478 = arith.addf %476, %477 : vector<2x32xf32>
    %479 = vector.extract_strided_slice %11 {offsets = [0, 0, 0], sizes = [1, 1, 32], strides = [1, 1, 1]} : vector<4x1x32xf32> to vector<1x1x32xf32>
    %480 = vector.shape_cast %479 : vector<1x1x32xf32> to vector<1x32xf32>
    %481 = vector.extract_strided_slice %11 {offsets = [1, 0, 0], sizes = [1, 1, 32], strides = [1, 1, 1]} : vector<4x1x32xf32> to vector<1x1x32xf32>
    %482 = vector.shape_cast %481 : vector<1x1x32xf32> to vector<1x32xf32>
    %cst_123 = arith.constant dense<0.000000e+00> : vector<2xf32>
    %483 = vector.multi_reduction <add>, %478, %cst_123 [1] : vector<2x32xf32> to vector<2xf32>
    %484 = vector.shape_cast %483 : vector<2xf32> to vector<2x1xf32>
    %cst_124 = arith.constant 3.200000e+01 : f32
    %485 = vector.broadcast %cst_124 : f32 to vector<2x1xf32>
    %486 = arith.divf %484, %485 : vector<2x1xf32>
    %487 = vector.broadcast %486 : vector<2x1xf32> to vector<2x32xf32>
    %488 = arith.subf %478, %487 : vector<2x32xf32>
    %489 = arith.mulf %488, %488 : vector<2x32xf32>
    %cst_125 = arith.constant dense<0.000000e+00> : vector<2xf32>
    %490 = vector.multi_reduction <add>, %489, %cst_125 [1] : vector<2x32xf32> to vector<2xf32>
    %491 = vector.shape_cast %490 : vector<2xf32> to vector<2x1xf32>
    %cst_126 = arith.constant 3.200000e+01 : f32
    %492 = vector.broadcast %cst_126 : f32 to vector<2x1xf32>
    %493 = arith.divf %491, %492 : vector<2x1xf32>
    %494 = vector.broadcast %486 : vector<2x1xf32> to vector<2x32xf32>
    %495 = arith.subf %478, %494 : vector<2x32xf32>
    %cst_127 = arith.constant 9.99999974E-6 : f32
    %496 = vector.broadcast %cst_127 : f32 to vector<2x1xf32>
    %497 = arith.addf %493, %496 : vector<2x1xf32>
    %498 = math.rsqrt %497 : vector<2x1xf32>
    %499 = vector.broadcast %498 : vector<2x1xf32> to vector<2x32xf32>
    %500 = arith.mulf %495, %499 : vector<2x32xf32>
    %501 = vector.broadcast %480 : vector<1x32xf32> to vector<2x32xf32>
    %502 = arith.mulf %500, %501 : vector<2x32xf32>
    %503 = vector.broadcast %482 : vector<1x32xf32> to vector<2x32xf32>
    %504 = arith.addf %502, %503 : vector<2x32xf32>
    %505 = math.tanh %504 : vector<2x32xf32>
    %506 = arith.mulf %475, %505 : vector<2x32xf32>
    %507 = vector.extract_strided_slice %11 {offsets = [2, 0, 0], sizes = [1, 1, 32], strides = [1, 1, 1]} : vector<4x1x32xf32> to vector<1x1x32xf32>
    %508 = vector.shape_cast %507 : vector<1x1x32xf32> to vector<1x32xf32>
    %509 = vector.extract_strided_slice %11 {offsets = [3, 0, 0], sizes = [1, 1, 32], strides = [1, 1, 1]} : vector<4x1x32xf32> to vector<1x1x32xf32>
    %510 = vector.shape_cast %509 : vector<1x1x32xf32> to vector<1x32xf32>
    %cst_128 = arith.constant dense<0.000000e+00> : vector<2xf32>
    %511 = vector.multi_reduction <add>, %506, %cst_128 [1] : vector<2x32xf32> to vector<2xf32>
    %512 = vector.shape_cast %511 : vector<2xf32> to vector<2x1xf32>
    %cst_129 = arith.constant 3.200000e+01 : f32
    %513 = vector.broadcast %cst_129 : f32 to vector<2x1xf32>
    %514 = arith.divf %512, %513 : vector<2x1xf32>
    %515 = vector.broadcast %514 : vector<2x1xf32> to vector<2x32xf32>
    %516 = arith.subf %506, %515 : vector<2x32xf32>
    %517 = arith.mulf %516, %516 : vector<2x32xf32>
    %cst_130 = arith.constant dense<0.000000e+00> : vector<2xf32>
    %518 = vector.multi_reduction <add>, %517, %cst_130 [1] : vector<2x32xf32> to vector<2xf32>
    %519 = vector.shape_cast %518 : vector<2xf32> to vector<2x1xf32>
    %cst_131 = arith.constant 3.200000e+01 : f32
    %520 = vector.broadcast %cst_131 : f32 to vector<2x1xf32>
    %521 = arith.divf %519, %520 : vector<2x1xf32>
    %522 = vector.broadcast %514 : vector<2x1xf32> to vector<2x32xf32>
    %523 = arith.subf %506, %522 : vector<2x32xf32>
    %cst_132 = arith.constant 9.99999974E-6 : f32
    %524 = vector.broadcast %cst_132 : f32 to vector<2x1xf32>
    %525 = arith.addf %521, %524 : vector<2x1xf32>
    %526 = math.rsqrt %525 : vector<2x1xf32>
    %527 = vector.broadcast %526 : vector<2x1xf32> to vector<2x32xf32>
    %528 = arith.mulf %523, %527 : vector<2x32xf32>
    %529 = vector.broadcast %508 : vector<1x32xf32> to vector<2x32xf32>
    %530 = arith.mulf %528, %529 : vector<2x32xf32>
    %531 = vector.broadcast %510 : vector<1x32xf32> to vector<2x32xf32>
    %532 = arith.addf %530, %531 : vector<2x32xf32>
    %533 = vector.extract_strided_slice %367 {offsets = [0, 160], sizes = [2, 32], strides = [1, 1]} : vector<2x192xf32> to vector<2x32xf32>
    %534 = arith.addf %532, %533 : vector<2x32xf32>
    %535 = arith.addf %449, %534 : vector<2x32xf32>
    %cst_133 = arith.constant 5.000000e-01 : f32
    %536 = vector.broadcast %cst_133 : f32 to vector<2x32xf32>
    %537 = arith.mulf %535, %536 : vector<2x32xf32>
    %c2_i32_134 = arith.constant 2 : i32
    %538 = arith.muli %c2_i32_96, %c2_i32_134 : i32
    %539 = arith.index_cast %538 : i32 to index
    %c0_135 = arith.constant 0 : index
    %540 = vector.load %arg14[%539, %c0_135] : memref<16x32xf32, #tpu.memory_space<vmem>>, vector<2x32xf32>
    tpu.vector_store %arg14[%539, %c0_135], %537 {strides = array<i32>} : memref<16x32xf32, #tpu.memory_space<vmem>>, vector<2x32xf32>,
    %c3_i32 = arith.constant 3 : i32
    %c2_i32_136 = arith.constant 2 : i32
    %541 = arith.muli %c3_i32, %c2_i32_136 : i32
    %542 = arith.index_cast %541 : i32 to index
    %c0_137 = arith.constant 0 : index
    %543 = vector.load %arg17[%542, %c0_137] : memref<16x192xf32, #tpu.memory_space<vmem>>, vector<2x192xf32>
    %544 = vector.extract_strided_slice %543 {offsets = [0, 0], sizes = [2, 128], strides = [1, 1]} : vector<2x192xf32> to vector<2x128xf32>
    %cst_138 = arith.constant dense<0.000000e+00> : vector<2x128xf32>
    %545 = tpu.matmul %449, %7, %cst_138 {dimension_numbers = #tpu.dot_dimension_numbers<[1], [0], [0], [1], [0, 0, 1, 1], [], []>} : vector<2x32xf32>, vector<32x128xf32>, vector<2x128xf32> -> vector<2x128xf32>
    %546 = arith.addf %544, %545 : vector<2x128xf32>
    %547 = vector.extract_strided_slice %546 {offsets = [0, 0], sizes = [2, 32], strides = [1, 1]} : vector<2x128xf32> to vector<2x32xf32>
    %548 = arith.negf %547 : vector<2x32xf32>
    %549 = math.exp %548 : vector<2x32xf32>
    %cst_139 = arith.constant 1.000000e+00 : f32
    %550 = vector.broadcast %cst_139 : f32 to vector<2x32xf32>
    %551 = arith.addf %550, %549 : vector<2x32xf32>
    %552 = arith.divf %550, %551 : vector<2x32xf32>
    %553 = vector.extract_strided_slice %546 {offsets = [0, 32], sizes = [2, 32], strides = [1, 1]} : vector<2x128xf32> to vector<2x32xf32>
    %554 = arith.negf %553 : vector<2x32xf32>
    %555 = math.exp %554 : vector<2x32xf32>
    %cst_140 = arith.constant 1.000000e+00 : f32
    %556 = vector.broadcast %cst_140 : f32 to vector<2x32xf32>
    %557 = arith.addf %556, %555 : vector<2x32xf32>
    %558 = arith.divf %556, %557 : vector<2x32xf32>
    %559 = vector.extract_strided_slice %546 {offsets = [0, 64], sizes = [2, 32], strides = [1, 1]} : vector<2x128xf32> to vector<2x32xf32>
    %560 = math.tanh %559 : vector<2x32xf32>
    %561 = vector.extract_strided_slice %546 {offsets = [0, 96], sizes = [2, 32], strides = [1, 1]} : vector<2x128xf32> to vector<2x32xf32>
    %562 = arith.negf %561 : vector<2x32xf32>
    %563 = math.exp %562 : vector<2x32xf32>
    %cst_141 = arith.constant 1.000000e+00 : f32
    %564 = vector.broadcast %cst_141 : f32 to vector<2x32xf32>
    %565 = arith.addf %564, %563 : vector<2x32xf32>
    %566 = arith.divf %564, %565 : vector<2x32xf32>
    %567 = arith.mulf %558, %419 : vector<2x32xf32>
    %568 = arith.mulf %552, %560 : vector<2x32xf32>
    %569 = arith.addf %567, %568 : vector<2x32xf32>
    %570 = vector.extract_strided_slice %10 {offsets = [0, 0, 0], sizes = [1, 1, 32], strides = [1, 1, 1]} : vector<4x1x32xf32> to vector<1x1x32xf32>
    %571 = vector.shape_cast %570 : vector<1x1x32xf32> to vector<1x32xf32>
    %572 = vector.extract_strided_slice %10 {offsets = [1, 0, 0], sizes = [1, 1, 32], strides = [1, 1, 1]} : vector<4x1x32xf32> to vector<1x1x32xf32>
    %573 = vector.shape_cast %572 : vector<1x1x32xf32> to vector<1x32xf32>
    %cst_142 = arith.constant dense<0.000000e+00> : vector<2xf32>
    %574 = vector.multi_reduction <add>, %569, %cst_142 [1] : vector<2x32xf32> to vector<2xf32>
    %575 = vector.shape_cast %574 : vector<2xf32> to vector<2x1xf32>
    %cst_143 = arith.constant 3.200000e+01 : f32
    %576 = vector.broadcast %cst_143 : f32 to vector<2x1xf32>
    %577 = arith.divf %575, %576 : vector<2x1xf32>
    %578 = vector.broadcast %577 : vector<2x1xf32> to vector<2x32xf32>
    %579 = arith.subf %569, %578 : vector<2x32xf32>
    %580 = arith.mulf %579, %579 : vector<2x32xf32>
    %cst_144 = arith.constant dense<0.000000e+00> : vector<2xf32>
    %581 = vector.multi_reduction <add>, %580, %cst_144 [1] : vector<2x32xf32> to vector<2xf32>
    %582 = vector.shape_cast %581 : vector<2xf32> to vector<2x1xf32>
    %cst_145 = arith.constant 3.200000e+01 : f32
    %583 = vector.broadcast %cst_145 : f32 to vector<2x1xf32>
    %584 = arith.divf %582, %583 : vector<2x1xf32>
    %585 = vector.broadcast %577 : vector<2x1xf32> to vector<2x32xf32>
    %586 = arith.subf %569, %585 : vector<2x32xf32>
    %cst_146 = arith.constant 9.99999974E-6 : f32
    %587 = vector.broadcast %cst_146 : f32 to vector<2x1xf32>
    %588 = arith.addf %584, %587 : vector<2x1xf32>
    %589 = math.rsqrt %588 : vector<2x1xf32>
    %590 = vector.broadcast %589 : vector<2x1xf32> to vector<2x32xf32>
    %591 = arith.mulf %586, %590 : vector<2x32xf32>
    %592 = vector.broadcast %571 : vector<1x32xf32> to vector<2x32xf32>
    %593 = arith.mulf %591, %592 : vector<2x32xf32>
    %594 = vector.broadcast %573 : vector<1x32xf32> to vector<2x32xf32>
    %595 = arith.addf %593, %594 : vector<2x32xf32>
    %596 = math.tanh %595 : vector<2x32xf32>
    %597 = arith.mulf %566, %596 : vector<2x32xf32>
    %598 = vector.extract_strided_slice %10 {offsets = [2, 0, 0], sizes = [1, 1, 32], strides = [1, 1, 1]} : vector<4x1x32xf32> to vector<1x1x32xf32>
    %599 = vector.shape_cast %598 : vector<1x1x32xf32> to vector<1x32xf32>
    %600 = vector.extract_strided_slice %10 {offsets = [3, 0, 0], sizes = [1, 1, 32], strides = [1, 1, 1]} : vector<4x1x32xf32> to vector<1x1x32xf32>
    %601 = vector.shape_cast %600 : vector<1x1x32xf32> to vector<1x32xf32>
    %cst_147 = arith.constant dense<0.000000e+00> : vector<2xf32>
    %602 = vector.multi_reduction <add>, %597, %cst_147 [1] : vector<2x32xf32> to vector<2xf32>
    %603 = vector.shape_cast %602 : vector<2xf32> to vector<2x1xf32>
    %cst_148 = arith.constant 3.200000e+01 : f32
    %604 = vector.broadcast %cst_148 : f32 to vector<2x1xf32>
    %605 = arith.divf %603, %604 : vector<2x1xf32>
    %606 = vector.broadcast %605 : vector<2x1xf32> to vector<2x32xf32>
    %607 = arith.subf %597, %606 : vector<2x32xf32>
    %608 = arith.mulf %607, %607 : vector<2x32xf32>
    %cst_149 = arith.constant dense<0.000000e+00> : vector<2xf32>
    %609 = vector.multi_reduction <add>, %608, %cst_149 [1] : vector<2x32xf32> to vector<2xf32>
    %610 = vector.shape_cast %609 : vector<2xf32> to vector<2x1xf32>
    %cst_150 = arith.constant 3.200000e+01 : f32
    %611 = vector.broadcast %cst_150 : f32 to vector<2x1xf32>
    %612 = arith.divf %610, %611 : vector<2x1xf32>
    %613 = vector.broadcast %605 : vector<2x1xf32> to vector<2x32xf32>
    %614 = arith.subf %597, %613 : vector<2x32xf32>
    %cst_151 = arith.constant 9.99999974E-6 : f32
    %615 = vector.broadcast %cst_151 : f32 to vector<2x1xf32>
    %616 = arith.addf %612, %615 : vector<2x1xf32>
    %617 = math.rsqrt %616 : vector<2x1xf32>
    %618 = vector.broadcast %617 : vector<2x1xf32> to vector<2x32xf32>
    %619 = arith.mulf %614, %618 : vector<2x32xf32>
    %620 = vector.broadcast %599 : vector<1x32xf32> to vector<2x32xf32>
    %621 = arith.mulf %619, %620 : vector<2x32xf32>
    %622 = vector.broadcast %601 : vector<1x32xf32> to vector<2x32xf32>
    %623 = arith.addf %621, %622 : vector<2x32xf32>
    %624 = vector.extract_strided_slice %543 {offsets = [0, 128], sizes = [2, 32], strides = [1, 1]} : vector<2x192xf32> to vector<2x32xf32>
    %625 = arith.addf %623, %624 : vector<2x32xf32>
    %c0_152 = arith.constant 0 : index
    %c0_153 = arith.constant 0 : index
    %626 = vector.load %arg18[%c0_152, %c0_153] : memref<2x64xf32, #tpu.memory_space<vmem>>, vector<2x32xf32>
    tpu.vector_store %arg18[%c0_152, %c0_153], %625 {strides = array<i32>} : memref<2x64xf32, #tpu.memory_space<vmem>>, vector<2x32xf32>,
    %c0_154 = arith.constant 0 : index
    %c32_155 = arith.constant 32 : index
    %627 = vector.load %arg18[%c0_154, %c32_155] : memref<2x64xf32, #tpu.memory_space<vmem>>, vector<2x32xf32>
    tpu.vector_store %arg18[%c0_154, %c32_155], %534 {strides = array<i32>} : memref<2x64xf32, #tpu.memory_space<vmem>>, vector<2x32xf32>,
    %c0_156 = arith.constant 0 : index
    %c0_157 = arith.constant 0 : index
    %628 = vector.load %arg18[%c0_156, %c0_157] : memref<2x64xf32, #tpu.memory_space<vmem>>, vector<2x64xf32>
    %cst_158 = arith.constant dense<0.000000e+00> : vector<2x128xf32>
    %629 = tpu.matmul %628, %8, %cst_158 {dimension_numbers = #tpu.dot_dimension_numbers<[1], [0], [0], [1], [0, 0, 1, 1], [], []>} : vector<2x64xf32>, vector<64x128xf32>, vector<2x128xf32> -> vector<2x128xf32>
    %630 = vector.broadcast %9 : vector<1x128xf32> to vector<2x128xf32>
    %631 = arith.addf %629, %630 : vector<2x128xf32>
    %632 = vector.extract_strided_slice %631 {offsets = [0, 0], sizes = [2, 32], strides = [1, 1]} : vector<2x128xf32> to vector<2x32xf32>
    %633 = arith.negf %632 : vector<2x32xf32>
    %634 = math.exp %633 : vector<2x32xf32>
    %cst_159 = arith.constant 1.000000e+00 : f32
    %635 = vector.broadcast %cst_159 : f32 to vector<2x32xf32>
    %636 = arith.addf %635, %634 : vector<2x32xf32>
    %637 = arith.divf %635, %636 : vector<2x32xf32>
    %638 = vector.extract_strided_slice %631 {offsets = [0, 32], sizes = [2, 32], strides = [1, 1]} : vector<2x128xf32> to vector<2x32xf32>
    %639 = arith.negf %638 : vector<2x32xf32>
    %640 = math.exp %639 : vector<2x32xf32>
    %cst_160 = arith.constant 1.000000e+00 : f32
    %641 = vector.broadcast %cst_160 : f32 to vector<2x32xf32>
    %642 = arith.addf %641, %640 : vector<2x32xf32>
    %643 = arith.divf %641, %642 : vector<2x32xf32>
    %644 = vector.extract_strided_slice %631 {offsets = [0, 64], sizes = [2, 32], strides = [1, 1]} : vector<2x128xf32> to vector<2x32xf32>
    %645 = math.tanh %644 : vector<2x32xf32>
    %646 = vector.extract_strided_slice %631 {offsets = [0, 96], sizes = [2, 32], strides = [1, 1]} : vector<2x128xf32> to vector<2x32xf32>
    %647 = arith.negf %646 : vector<2x32xf32>
    %648 = math.exp %647 : vector<2x32xf32>
    %cst_161 = arith.constant 1.000000e+00 : f32
    %649 = vector.broadcast %cst_161 : f32 to vector<2x32xf32>
    %650 = arith.addf %649, %648 : vector<2x32xf32>
    %651 = arith.divf %649, %650 : vector<2x32xf32>
    %652 = arith.mulf %643, %504 : vector<2x32xf32>
    %653 = arith.mulf %637, %645 : vector<2x32xf32>
    %654 = arith.addf %652, %653 : vector<2x32xf32>
    %655 = vector.extract_strided_slice %11 {offsets = [0, 0, 0], sizes = [1, 1, 32], strides = [1, 1, 1]} : vector<4x1x32xf32> to vector<1x1x32xf32>
    %656 = vector.shape_cast %655 : vector<1x1x32xf32> to vector<1x32xf32>
    %657 = vector.extract_strided_slice %11 {offsets = [1, 0, 0], sizes = [1, 1, 32], strides = [1, 1, 1]} : vector<4x1x32xf32> to vector<1x1x32xf32>
    %658 = vector.shape_cast %657 : vector<1x1x32xf32> to vector<1x32xf32>
    %cst_162 = arith.constant dense<0.000000e+00> : vector<2xf32>
    %659 = vector.multi_reduction <add>, %654, %cst_162 [1] : vector<2x32xf32> to vector<2xf32>
    %660 = vector.shape_cast %659 : vector<2xf32> to vector<2x1xf32>
    %cst_163 = arith.constant 3.200000e+01 : f32
    %661 = vector.broadcast %cst_163 : f32 to vector<2x1xf32>
    %662 = arith.divf %660, %661 : vector<2x1xf32>
    %663 = vector.broadcast %662 : vector<2x1xf32> to vector<2x32xf32>
    %664 = arith.subf %654, %663 : vector<2x32xf32>
    %665 = arith.mulf %664, %664 : vector<2x32xf32>
    %cst_164 = arith.constant dense<0.000000e+00> : vector<2xf32>
    %666 = vector.multi_reduction <add>, %665, %cst_164 [1] : vector<2x32xf32> to vector<2xf32>
    %667 = vector.shape_cast %666 : vector<2xf32> to vector<2x1xf32>
    %cst_165 = arith.constant 3.200000e+01 : f32
    %668 = vector.broadcast %cst_165 : f32 to vector<2x1xf32>
    %669 = arith.divf %667, %668 : vector<2x1xf32>
    %670 = vector.broadcast %662 : vector<2x1xf32> to vector<2x32xf32>
    %671 = arith.subf %654, %670 : vector<2x32xf32>
    %cst_166 = arith.constant 9.99999974E-6 : f32
    %672 = vector.broadcast %cst_166 : f32 to vector<2x1xf32>
    %673 = arith.addf %669, %672 : vector<2x1xf32>
    %674 = math.rsqrt %673 : vector<2x1xf32>
    %675 = vector.broadcast %674 : vector<2x1xf32> to vector<2x32xf32>
    %676 = arith.mulf %671, %675 : vector<2x32xf32>
    %677 = vector.broadcast %656 : vector<1x32xf32> to vector<2x32xf32>
    %678 = arith.mulf %676, %677 : vector<2x32xf32>
    %679 = vector.broadcast %658 : vector<1x32xf32> to vector<2x32xf32>
    %680 = arith.addf %678, %679 : vector<2x32xf32>
    %681 = math.tanh %680 : vector<2x32xf32>
    %682 = arith.mulf %651, %681 : vector<2x32xf32>
    %683 = vector.extract_strided_slice %11 {offsets = [2, 0, 0], sizes = [1, 1, 32], strides = [1, 1, 1]} : vector<4x1x32xf32> to vector<1x1x32xf32>
    %684 = vector.shape_cast %683 : vector<1x1x32xf32> to vector<1x32xf32>
    %685 = vector.extract_strided_slice %11 {offsets = [3, 0, 0], sizes = [1, 1, 32], strides = [1, 1, 1]} : vector<4x1x32xf32> to vector<1x1x32xf32>
    %686 = vector.shape_cast %685 : vector<1x1x32xf32> to vector<1x32xf32>
    %cst_167 = arith.constant dense<0.000000e+00> : vector<2xf32>
    %687 = vector.multi_reduction <add>, %682, %cst_167 [1] : vector<2x32xf32> to vector<2xf32>
    %688 = vector.shape_cast %687 : vector<2xf32> to vector<2x1xf32>
    %cst_168 = arith.constant 3.200000e+01 : f32
    %689 = vector.broadcast %cst_168 : f32 to vector<2x1xf32>
    %690 = arith.divf %688, %689 : vector<2x1xf32>
    %691 = vector.broadcast %690 : vector<2x1xf32> to vector<2x32xf32>
    %692 = arith.subf %682, %691 : vector<2x32xf32>
    %693 = arith.mulf %692, %692 : vector<2x32xf32>
    %cst_169 = arith.constant dense<0.000000e+00> : vector<2xf32>
    %694 = vector.multi_reduction <add>, %693, %cst_169 [1] : vector<2x32xf32> to vector<2xf32>
    %695 = vector.shape_cast %694 : vector<2xf32> to vector<2x1xf32>
    %cst_170 = arith.constant 3.200000e+01 : f32
    %696 = vector.broadcast %cst_170 : f32 to vector<2x1xf32>
    %697 = arith.divf %695, %696 : vector<2x1xf32>
    %698 = vector.broadcast %690 : vector<2x1xf32> to vector<2x32xf32>
    %699 = arith.subf %682, %698 : vector<2x32xf32>
    %cst_171 = arith.constant 9.99999974E-6 : f32
    %700 = vector.broadcast %cst_171 : f32 to vector<2x1xf32>
    %701 = arith.addf %697, %700 : vector<2x1xf32>
    %702 = math.rsqrt %701 : vector<2x1xf32>
    %703 = vector.broadcast %702 : vector<2x1xf32> to vector<2x32xf32>
    %704 = arith.mulf %699, %703 : vector<2x32xf32>
    %705 = vector.broadcast %684 : vector<1x32xf32> to vector<2x32xf32>
    %706 = arith.mulf %704, %705 : vector<2x32xf32>
    %707 = vector.broadcast %686 : vector<1x32xf32> to vector<2x32xf32>
    %708 = arith.addf %706, %707 : vector<2x32xf32>
    %709 = vector.extract_strided_slice %543 {offsets = [0, 160], sizes = [2, 32], strides = [1, 1]} : vector<2x192xf32> to vector<2x32xf32>
    %710 = arith.addf %708, %709 : vector<2x32xf32>
    %711 = arith.addf %625, %710 : vector<2x32xf32>
    %cst_172 = arith.constant 5.000000e-01 : f32
    %712 = vector.broadcast %cst_172 : f32 to vector<2x32xf32>
    %713 = arith.mulf %711, %712 : vector<2x32xf32>
    %c2_i32_173 = arith.constant 2 : i32
    %714 = arith.muli %c3_i32, %c2_i32_173 : i32
    %715 = arith.index_cast %714 : i32 to index
    %c0_174 = arith.constant 0 : index
    %716 = vector.load %arg14[%715, %c0_174] : memref<16x32xf32, #tpu.memory_space<vmem>>, vector<2x32xf32>
    tpu.vector_store %arg14[%715, %c0_174], %713 {strides = array<i32>} : memref<16x32xf32, #tpu.memory_space<vmem>>, vector<2x32xf32>,
    %c4_i32 = arith.constant 4 : i32
    %c2_i32_175 = arith.constant 2 : i32
    %717 = arith.muli %c4_i32, %c2_i32_175 : i32
    %718 = arith.index_cast %717 : i32 to index
    %c0_176 = arith.constant 0 : index
    %719 = vector.load %arg17[%718, %c0_176] : memref<16x192xf32, #tpu.memory_space<vmem>>, vector<2x192xf32>
    %720 = vector.extract_strided_slice %719 {offsets = [0, 0], sizes = [2, 128], strides = [1, 1]} : vector<2x192xf32> to vector<2x128xf32>
    %cst_177 = arith.constant dense<0.000000e+00> : vector<2x128xf32>
    %721 = tpu.matmul %625, %7, %cst_177 {dimension_numbers = #tpu.dot_dimension_numbers<[1], [0], [0], [1], [0, 0, 1, 1], [], []>} : vector<2x32xf32>, vector<32x128xf32>, vector<2x128xf32> -> vector<2x128xf32>
    %722 = arith.addf %720, %721 : vector<2x128xf32>
    %723 = vector.extract_strided_slice %722 {offsets = [0, 0], sizes = [2, 32], strides = [1, 1]} : vector<2x128xf32> to vector<2x32xf32>
    %724 = arith.negf %723 : vector<2x32xf32>
    %725 = math.exp %724 : vector<2x32xf32>
    %cst_178 = arith.constant 1.000000e+00 : f32
    %726 = vector.broadcast %cst_178 : f32 to vector<2x32xf32>
    %727 = arith.addf %726, %725 : vector<2x32xf32>
    %728 = arith.divf %726, %727 : vector<2x32xf32>
    %729 = vector.extract_strided_slice %722 {offsets = [0, 32], sizes = [2, 32], strides = [1, 1]} : vector<2x128xf32> to vector<2x32xf32>
    %730 = arith.negf %729 : vector<2x32xf32>
    %731 = math.exp %730 : vector<2x32xf32>
    %cst_179 = arith.constant 1.000000e+00 : f32
    %732 = vector.broadcast %cst_179 : f32 to vector<2x32xf32>
    %733 = arith.addf %732, %731 : vector<2x32xf32>
    %734 = arith.divf %732, %733 : vector<2x32xf32>
    %735 = vector.extract_strided_slice %722 {offsets = [0, 64], sizes = [2, 32], strides = [1, 1]} : vector<2x128xf32> to vector<2x32xf32>
    %736 = math.tanh %735 : vector<2x32xf32>
    %737 = vector.extract_strided_slice %722 {offsets = [0, 96], sizes = [2, 32], strides = [1, 1]} : vector<2x128xf32> to vector<2x32xf32>
    %738 = arith.negf %737 : vector<2x32xf32>
    %739 = math.exp %738 : vector<2x32xf32>
    %cst_180 = arith.constant 1.000000e+00 : f32
    %740 = vector.broadcast %cst_180 : f32 to vector<2x32xf32>
    %741 = arith.addf %740, %739 : vector<2x32xf32>
    %742 = arith.divf %740, %741 : vector<2x32xf32>
    %743 = arith.mulf %734, %595 : vector<2x32xf32>
    %744 = arith.mulf %728, %736 : vector<2x32xf32>
    %745 = arith.addf %743, %744 : vector<2x32xf32>
    %746 = vector.extract_strided_slice %10 {offsets = [0, 0, 0], sizes = [1, 1, 32], strides = [1, 1, 1]} : vector<4x1x32xf32> to vector<1x1x32xf32>
    %747 = vector.shape_cast %746 : vector<1x1x32xf32> to vector<1x32xf32>
    %748 = vector.extract_strided_slice %10 {offsets = [1, 0, 0], sizes = [1, 1, 32], strides = [1, 1, 1]} : vector<4x1x32xf32> to vector<1x1x32xf32>
    %749 = vector.shape_cast %748 : vector<1x1x32xf32> to vector<1x32xf32>
    %cst_181 = arith.constant dense<0.000000e+00> : vector<2xf32>
    %750 = vector.multi_reduction <add>, %745, %cst_181 [1] : vector<2x32xf32> to vector<2xf32>
    %751 = vector.shape_cast %750 : vector<2xf32> to vector<2x1xf32>
    %cst_182 = arith.constant 3.200000e+01 : f32
    %752 = vector.broadcast %cst_182 : f32 to vector<2x1xf32>
    %753 = arith.divf %751, %752 : vector<2x1xf32>
    %754 = vector.broadcast %753 : vector<2x1xf32> to vector<2x32xf32>
    %755 = arith.subf %745, %754 : vector<2x32xf32>
    %756 = arith.mulf %755, %755 : vector<2x32xf32>
    %cst_183 = arith.constant dense<0.000000e+00> : vector<2xf32>
    %757 = vector.multi_reduction <add>, %756, %cst_183 [1] : vector<2x32xf32> to vector<2xf32>
    %758 = vector.shape_cast %757 : vector<2xf32> to vector<2x1xf32>
    %cst_184 = arith.constant 3.200000e+01 : f32
    %759 = vector.broadcast %cst_184 : f32 to vector<2x1xf32>
    %760 = arith.divf %758, %759 : vector<2x1xf32>
    %761 = vector.broadcast %753 : vector<2x1xf32> to vector<2x32xf32>
    %762 = arith.subf %745, %761 : vector<2x32xf32>
    %cst_185 = arith.constant 9.99999974E-6 : f32
    %763 = vector.broadcast %cst_185 : f32 to vector<2x1xf32>
    %764 = arith.addf %760, %763 : vector<2x1xf32>
    %765 = math.rsqrt %764 : vector<2x1xf32>
    %766 = vector.broadcast %765 : vector<2x1xf32> to vector<2x32xf32>
    %767 = arith.mulf %762, %766 : vector<2x32xf32>
    %768 = vector.broadcast %747 : vector<1x32xf32> to vector<2x32xf32>
    %769 = arith.mulf %767, %768 : vector<2x32xf32>
    %770 = vector.broadcast %749 : vector<1x32xf32> to vector<2x32xf32>
    %771 = arith.addf %769, %770 : vector<2x32xf32>
    %772 = math.tanh %771 : vector<2x32xf32>
    %773 = arith.mulf %742, %772 : vector<2x32xf32>
    %774 = vector.extract_strided_slice %10 {offsets = [2, 0, 0], sizes = [1, 1, 32], strides = [1, 1, 1]} : vector<4x1x32xf32> to vector<1x1x32xf32>
    %775 = vector.shape_cast %774 : vector<1x1x32xf32> to vector<1x32xf32>
    %776 = vector.extract_strided_slice %10 {offsets = [3, 0, 0], sizes = [1, 1, 32], strides = [1, 1, 1]} : vector<4x1x32xf32> to vector<1x1x32xf32>
    %777 = vector.shape_cast %776 : vector<1x1x32xf32> to vector<1x32xf32>
    %cst_186 = arith.constant dense<0.000000e+00> : vector<2xf32>
    %778 = vector.multi_reduction <add>, %773, %cst_186 [1] : vector<2x32xf32> to vector<2xf32>
    %779 = vector.shape_cast %778 : vector<2xf32> to vector<2x1xf32>
    %cst_187 = arith.constant 3.200000e+01 : f32
    %780 = vector.broadcast %cst_187 : f32 to vector<2x1xf32>
    %781 = arith.divf %779, %780 : vector<2x1xf32>
    %782 = vector.broadcast %781 : vector<2x1xf32> to vector<2x32xf32>
    %783 = arith.subf %773, %782 : vector<2x32xf32>
    %784 = arith.mulf %783, %783 : vector<2x32xf32>
    %cst_188 = arith.constant dense<0.000000e+00> : vector<2xf32>
    %785 = vector.multi_reduction <add>, %784, %cst_188 [1] : vector<2x32xf32> to vector<2xf32>
    %786 = vector.shape_cast %785 : vector<2xf32> to vector<2x1xf32>
    %cst_189 = arith.constant 3.200000e+01 : f32
    %787 = vector.broadcast %cst_189 : f32 to vector<2x1xf32>
    %788 = arith.divf %786, %787 : vector<2x1xf32>
    %789 = vector.broadcast %781 : vector<2x1xf32> to vector<2x32xf32>
    %790 = arith.subf %773, %789 : vector<2x32xf32>
    %cst_190 = arith.constant 9.99999974E-6 : f32
    %791 = vector.broadcast %cst_190 : f32 to vector<2x1xf32>
    %792 = arith.addf %788, %791 : vector<2x1xf32>
    %793 = math.rsqrt %792 : vector<2x1xf32>
    %794 = vector.broadcast %793 : vector<2x1xf32> to vector<2x32xf32>
    %795 = arith.mulf %790, %794 : vector<2x32xf32>
    %796 = vector.broadcast %775 : vector<1x32xf32> to vector<2x32xf32>
    %797 = arith.mulf %795, %796 : vector<2x32xf32>
    %798 = vector.broadcast %777 : vector<1x32xf32> to vector<2x32xf32>
    %799 = arith.addf %797, %798 : vector<2x32xf32>
    %800 = vector.extract_strided_slice %719 {offsets = [0, 128], sizes = [2, 32], strides = [1, 1]} : vector<2x192xf32> to vector<2x32xf32>
    %801 = arith.addf %799, %800 : vector<2x32xf32>
    %c0_191 = arith.constant 0 : index
    %c0_192 = arith.constant 0 : index
    %802 = vector.load %arg18[%c0_191, %c0_192] : memref<2x64xf32, #tpu.memory_space<vmem>>, vector<2x32xf32>
    tpu.vector_store %arg18[%c0_191, %c0_192], %801 {strides = array<i32>} : memref<2x64xf32, #tpu.memory_space<vmem>>, vector<2x32xf32>,
    %c0_193 = arith.constant 0 : index
    %c32_194 = arith.constant 32 : index
    %803 = vector.load %arg18[%c0_193, %c32_194] : memref<2x64xf32, #tpu.memory_space<vmem>>, vector<2x32xf32>
    tpu.vector_store %arg18[%c0_193, %c32_194], %710 {strides = array<i32>} : memref<2x64xf32, #tpu.memory_space<vmem>>, vector<2x32xf32>,
    %c0_195 = arith.constant 0 : index
    %c0_196 = arith.constant 0 : index
    %804 = vector.load %arg18[%c0_195, %c0_196] : memref<2x64xf32, #tpu.memory_space<vmem>>, vector<2x64xf32>
    %cst_197 = arith.constant dense<0.000000e+00> : vector<2x128xf32>
    %805 = tpu.matmul %804, %8, %cst_197 {dimension_numbers = #tpu.dot_dimension_numbers<[1], [0], [0], [1], [0, 0, 1, 1], [], []>} : vector<2x64xf32>, vector<64x128xf32>, vector<2x128xf32> -> vector<2x128xf32>
    %806 = vector.broadcast %9 : vector<1x128xf32> to vector<2x128xf32>
    %807 = arith.addf %805, %806 : vector<2x128xf32>
    %808 = vector.extract_strided_slice %807 {offsets = [0, 0], sizes = [2, 32], strides = [1, 1]} : vector<2x128xf32> to vector<2x32xf32>
    %809 = arith.negf %808 : vector<2x32xf32>
    %810 = math.exp %809 : vector<2x32xf32>
    %cst_198 = arith.constant 1.000000e+00 : f32
    %811 = vector.broadcast %cst_198 : f32 to vector<2x32xf32>
    %812 = arith.addf %811, %810 : vector<2x32xf32>
    %813 = arith.divf %811, %812 : vector<2x32xf32>
    %814 = vector.extract_strided_slice %807 {offsets = [0, 32], sizes = [2, 32], strides = [1, 1]} : vector<2x128xf32> to vector<2x32xf32>
    %815 = arith.negf %814 : vector<2x32xf32>
    %816 = math.exp %815 : vector<2x32xf32>
    %cst_199 = arith.constant 1.000000e+00 : f32
    %817 = vector.broadcast %cst_199 : f32 to vector<2x32xf32>
    %818 = arith.addf %817, %816 : vector<2x32xf32>
    %819 = arith.divf %817, %818 : vector<2x32xf32>
    %820 = vector.extract_strided_slice %807 {offsets = [0, 64], sizes = [2, 32], strides = [1, 1]} : vector<2x128xf32> to vector<2x32xf32>
    %821 = math.tanh %820 : vector<2x32xf32>
    %822 = vector.extract_strided_slice %807 {offsets = [0, 96], sizes = [2, 32], strides = [1, 1]} : vector<2x128xf32> to vector<2x32xf32>
    %823 = arith.negf %822 : vector<2x32xf32>
    %824 = math.exp %823 : vector<2x32xf32>
    %cst_200 = arith.constant 1.000000e+00 : f32
    %825 = vector.broadcast %cst_200 : f32 to vector<2x32xf32>
    %826 = arith.addf %825, %824 : vector<2x32xf32>
    %827 = arith.divf %825, %826 : vector<2x32xf32>
    %828 = arith.mulf %819, %680 : vector<2x32xf32>
    %829 = arith.mulf %813, %821 : vector<2x32xf32>
    %830 = arith.addf %828, %829 : vector<2x32xf32>
    %831 = vector.extract_strided_slice %11 {offsets = [0, 0, 0], sizes = [1, 1, 32], strides = [1, 1, 1]} : vector<4x1x32xf32> to vector<1x1x32xf32>
    %832 = vector.shape_cast %831 : vector<1x1x32xf32> to vector<1x32xf32>
    %833 = vector.extract_strided_slice %11 {offsets = [1, 0, 0], sizes = [1, 1, 32], strides = [1, 1, 1]} : vector<4x1x32xf32> to vector<1x1x32xf32>
    %834 = vector.shape_cast %833 : vector<1x1x32xf32> to vector<1x32xf32>
    %cst_201 = arith.constant dense<0.000000e+00> : vector<2xf32>
    %835 = vector.multi_reduction <add>, %830, %cst_201 [1] : vector<2x32xf32> to vector<2xf32>
    %836 = vector.shape_cast %835 : vector<2xf32> to vector<2x1xf32>
    %cst_202 = arith.constant 3.200000e+01 : f32
    %837 = vector.broadcast %cst_202 : f32 to vector<2x1xf32>
    %838 = arith.divf %836, %837 : vector<2x1xf32>
    %839 = vector.broadcast %838 : vector<2x1xf32> to vector<2x32xf32>
    %840 = arith.subf %830, %839 : vector<2x32xf32>
    %841 = arith.mulf %840, %840 : vector<2x32xf32>
    %cst_203 = arith.constant dense<0.000000e+00> : vector<2xf32>
    %842 = vector.multi_reduction <add>, %841, %cst_203 [1] : vector<2x32xf32> to vector<2xf32>
    %843 = vector.shape_cast %842 : vector<2xf32> to vector<2x1xf32>
    %cst_204 = arith.constant 3.200000e+01 : f32
    %844 = vector.broadcast %cst_204 : f32 to vector<2x1xf32>
    %845 = arith.divf %843, %844 : vector<2x1xf32>
    %846 = vector.broadcast %838 : vector<2x1xf32> to vector<2x32xf32>
    %847 = arith.subf %830, %846 : vector<2x32xf32>
    %cst_205 = arith.constant 9.99999974E-6 : f32
    %848 = vector.broadcast %cst_205 : f32 to vector<2x1xf32>
    %849 = arith.addf %845, %848 : vector<2x1xf32>
    %850 = math.rsqrt %849 : vector<2x1xf32>
    %851 = vector.broadcast %850 : vector<2x1xf32> to vector<2x32xf32>
    %852 = arith.mulf %847, %851 : vector<2x32xf32>
    %853 = vector.broadcast %832 : vector<1x32xf32> to vector<2x32xf32>
    %854 = arith.mulf %852, %853 : vector<2x32xf32>
    %855 = vector.broadcast %834 : vector<1x32xf32> to vector<2x32xf32>
    %856 = arith.addf %854, %855 : vector<2x32xf32>
    %857 = math.tanh %856 : vector<2x32xf32>
    %858 = arith.mulf %827, %857 : vector<2x32xf32>
    %859 = vector.extract_strided_slice %11 {offsets = [2, 0, 0], sizes = [1, 1, 32], strides = [1, 1, 1]} : vector<4x1x32xf32> to vector<1x1x32xf32>
    %860 = vector.shape_cast %859 : vector<1x1x32xf32> to vector<1x32xf32>
    %861 = vector.extract_strided_slice %11 {offsets = [3, 0, 0], sizes = [1, 1, 32], strides = [1, 1, 1]} : vector<4x1x32xf32> to vector<1x1x32xf32>
    %862 = vector.shape_cast %861 : vector<1x1x32xf32> to vector<1x32xf32>
    %cst_206 = arith.constant dense<0.000000e+00> : vector<2xf32>
    %863 = vector.multi_reduction <add>, %858, %cst_206 [1] : vector<2x32xf32> to vector<2xf32>
    %864 = vector.shape_cast %863 : vector<2xf32> to vector<2x1xf32>
    %cst_207 = arith.constant 3.200000e+01 : f32
    %865 = vector.broadcast %cst_207 : f32 to vector<2x1xf32>
    %866 = arith.divf %864, %865 : vector<2x1xf32>
    %867 = vector.broadcast %866 : vector<2x1xf32> to vector<2x32xf32>
    %868 = arith.subf %858, %867 : vector<2x32xf32>
    %869 = arith.mulf %868, %868 : vector<2x32xf32>
    %cst_208 = arith.constant dense<0.000000e+00> : vector<2xf32>
    %870 = vector.multi_reduction <add>, %869, %cst_208 [1] : vector<2x32xf32> to vector<2xf32>
    %871 = vector.shape_cast %870 : vector<2xf32> to vector<2x1xf32>
    %cst_209 = arith.constant 3.200000e+01 : f32
    %872 = vector.broadcast %cst_209 : f32 to vector<2x1xf32>
    %873 = arith.divf %871, %872 : vector<2x1xf32>
    %874 = vector.broadcast %866 : vector<2x1xf32> to vector<2x32xf32>
    %875 = arith.subf %858, %874 : vector<2x32xf32>
    %cst_210 = arith.constant 9.99999974E-6 : f32
    %876 = vector.broadcast %cst_210 : f32 to vector<2x1xf32>
    %877 = arith.addf %873, %876 : vector<2x1xf32>
    %878 = math.rsqrt %877 : vector<2x1xf32>
    %879 = vector.broadcast %878 : vector<2x1xf32> to vector<2x32xf32>
    %880 = arith.mulf %875, %879 : vector<2x32xf32>
    %881 = vector.broadcast %860 : vector<1x32xf32> to vector<2x32xf32>
    %882 = arith.mulf %880, %881 : vector<2x32xf32>
    %883 = vector.broadcast %862 : vector<1x32xf32> to vector<2x32xf32>
    %884 = arith.addf %882, %883 : vector<2x32xf32>
    %885 = vector.extract_strided_slice %719 {offsets = [0, 160], sizes = [2, 32], strides = [1, 1]} : vector<2x192xf32> to vector<2x32xf32>
    %886 = arith.addf %884, %885 : vector<2x32xf32>
    %887 = arith.addf %801, %886 : vector<2x32xf32>
    %cst_211 = arith.constant 5.000000e-01 : f32
    %888 = vector.broadcast %cst_211 : f32 to vector<2x32xf32>
    %889 = arith.mulf %887, %888 : vector<2x32xf32>
    %c2_i32_212 = arith.constant 2 : i32
    %890 = arith.muli %c4_i32, %c2_i32_212 : i32
    %891 = arith.index_cast %890 : i32 to index
    %c0_213 = arith.constant 0 : index
    %892 = vector.load %arg14[%891, %c0_213] : memref<16x32xf32, #tpu.memory_space<vmem>>, vector<2x32xf32>
    tpu.vector_store %arg14[%891, %c0_213], %889 {strides = array<i32>} : memref<16x32xf32, #tpu.memory_space<vmem>>, vector<2x32xf32>,
    %c5_i32 = arith.constant 5 : i32
    %c2_i32_214 = arith.constant 2 : i32
    %893 = arith.muli %c5_i32, %c2_i32_214 : i32
    %894 = arith.index_cast %893 : i32 to index
    %c0_215 = arith.constant 0 : index
    %895 = vector.load %arg17[%894, %c0_215] : memref<16x192xf32, #tpu.memory_space<vmem>>, vector<2x192xf32>
    %896 = vector.extract_strided_slice %895 {offsets = [0, 0], sizes = [2, 128], strides = [1, 1]} : vector<2x192xf32> to vector<2x128xf32>
    %cst_216 = arith.constant dense<0.000000e+00> : vector<2x128xf32>
    %897 = tpu.matmul %801, %7, %cst_216 {dimension_numbers = #tpu.dot_dimension_numbers<[1], [0], [0], [1], [0, 0, 1, 1], [], []>} : vector<2x32xf32>, vector<32x128xf32>, vector<2x128xf32> -> vector<2x128xf32>
    %898 = arith.addf %896, %897 : vector<2x128xf32>
    %899 = vector.extract_strided_slice %898 {offsets = [0, 0], sizes = [2, 32], strides = [1, 1]} : vector<2x128xf32> to vector<2x32xf32>
    %900 = arith.negf %899 : vector<2x32xf32>
    %901 = math.exp %900 : vector<2x32xf32>
    %cst_217 = arith.constant 1.000000e+00 : f32
    %902 = vector.broadcast %cst_217 : f32 to vector<2x32xf32>
    %903 = arith.addf %902, %901 : vector<2x32xf32>
    %904 = arith.divf %902, %903 : vector<2x32xf32>
    %905 = vector.extract_strided_slice %898 {offsets = [0, 32], sizes = [2, 32], strides = [1, 1]} : vector<2x128xf32> to vector<2x32xf32>
    %906 = arith.negf %905 : vector<2x32xf32>
    %907 = math.exp %906 : vector<2x32xf32>
    %cst_218 = arith.constant 1.000000e+00 : f32
    %908 = vector.broadcast %cst_218 : f32 to vector<2x32xf32>
    %909 = arith.addf %908, %907 : vector<2x32xf32>
    %910 = arith.divf %908, %909 : vector<2x32xf32>
    %911 = vector.extract_strided_slice %898 {offsets = [0, 64], sizes = [2, 32], strides = [1, 1]} : vector<2x128xf32> to vector<2x32xf32>
    %912 = math.tanh %911 : vector<2x32xf32>
    %913 = vector.extract_strided_slice %898 {offsets = [0, 96], sizes = [2, 32], strides = [1, 1]} : vector<2x128xf32> to vector<2x32xf32>
    %914 = arith.negf %913 : vector<2x32xf32>
    %915 = math.exp %914 : vector<2x32xf32>
    %cst_219 = arith.constant 1.000000e+00 : f32
    %916 = vector.broadcast %cst_219 : f32 to vector<2x32xf32>
    %917 = arith.addf %916, %915 : vector<2x32xf32>
    %918 = arith.divf %916, %917 : vector<2x32xf32>
    %919 = arith.mulf %910, %771 : vector<2x32xf32>
    %920 = arith.mulf %904, %912 : vector<2x32xf32>
    %921 = arith.addf %919, %920 : vector<2x32xf32>
    %922 = vector.extract_strided_slice %10 {offsets = [0, 0, 0], sizes = [1, 1, 32], strides = [1, 1, 1]} : vector<4x1x32xf32> to vector<1x1x32xf32>
    %923 = vector.shape_cast %922 : vector<1x1x32xf32> to vector<1x32xf32>
    %924 = vector.extract_strided_slice %10 {offsets = [1, 0, 0], sizes = [1, 1, 32], strides = [1, 1, 1]} : vector<4x1x32xf32> to vector<1x1x32xf32>
    %925 = vector.shape_cast %924 : vector<1x1x32xf32> to vector<1x32xf32>
    %cst_220 = arith.constant dense<0.000000e+00> : vector<2xf32>
    %926 = vector.multi_reduction <add>, %921, %cst_220 [1] : vector<2x32xf32> to vector<2xf32>
    %927 = vector.shape_cast %926 : vector<2xf32> to vector<2x1xf32>
    %cst_221 = arith.constant 3.200000e+01 : f32
    %928 = vector.broadcast %cst_221 : f32 to vector<2x1xf32>
    %929 = arith.divf %927, %928 : vector<2x1xf32>
    %930 = vector.broadcast %929 : vector<2x1xf32> to vector<2x32xf32>
    %931 = arith.subf %921, %930 : vector<2x32xf32>
    %932 = arith.mulf %931, %931 : vector<2x32xf32>
    %cst_222 = arith.constant dense<0.000000e+00> : vector<2xf32>
    %933 = vector.multi_reduction <add>, %932, %cst_222 [1] : vector<2x32xf32> to vector<2xf32>
    %934 = vector.shape_cast %933 : vector<2xf32> to vector<2x1xf32>
    %cst_223 = arith.constant 3.200000e+01 : f32
    %935 = vector.broadcast %cst_223 : f32 to vector<2x1xf32>
    %936 = arith.divf %934, %935 : vector<2x1xf32>
    %937 = vector.broadcast %929 : vector<2x1xf32> to vector<2x32xf32>
    %938 = arith.subf %921, %937 : vector<2x32xf32>
    %cst_224 = arith.constant 9.99999974E-6 : f32
    %939 = vector.broadcast %cst_224 : f32 to vector<2x1xf32>
    %940 = arith.addf %936, %939 : vector<2x1xf32>
    %941 = math.rsqrt %940 : vector<2x1xf32>
    %942 = vector.broadcast %941 : vector<2x1xf32> to vector<2x32xf32>
    %943 = arith.mulf %938, %942 : vector<2x32xf32>
    %944 = vector.broadcast %923 : vector<1x32xf32> to vector<2x32xf32>
    %945 = arith.mulf %943, %944 : vector<2x32xf32>
    %946 = vector.broadcast %925 : vector<1x32xf32> to vector<2x32xf32>
    %947 = arith.addf %945, %946 : vector<2x32xf32>
    %948 = math.tanh %947 : vector<2x32xf32>
    %949 = arith.mulf %918, %948 : vector<2x32xf32>
    %950 = vector.extract_strided_slice %10 {offsets = [2, 0, 0], sizes = [1, 1, 32], strides = [1, 1, 1]} : vector<4x1x32xf32> to vector<1x1x32xf32>
    %951 = vector.shape_cast %950 : vector<1x1x32xf32> to vector<1x32xf32>
    %952 = vector.extract_strided_slice %10 {offsets = [3, 0, 0], sizes = [1, 1, 32], strides = [1, 1, 1]} : vector<4x1x32xf32> to vector<1x1x32xf32>
    %953 = vector.shape_cast %952 : vector<1x1x32xf32> to vector<1x32xf32>
    %cst_225 = arith.constant dense<0.000000e+00> : vector<2xf32>
    %954 = vector.multi_reduction <add>, %949, %cst_225 [1] : vector<2x32xf32> to vector<2xf32>
    %955 = vector.shape_cast %954 : vector<2xf32> to vector<2x1xf32>
    %cst_226 = arith.constant 3.200000e+01 : f32
    %956 = vector.broadcast %cst_226 : f32 to vector<2x1xf32>
    %957 = arith.divf %955, %956 : vector<2x1xf32>
    %958 = vector.broadcast %957 : vector<2x1xf32> to vector<2x32xf32>
    %959 = arith.subf %949, %958 : vector<2x32xf32>
    %960 = arith.mulf %959, %959 : vector<2x32xf32>
    %cst_227 = arith.constant dense<0.000000e+00> : vector<2xf32>
    %961 = vector.multi_reduction <add>, %960, %cst_227 [1] : vector<2x32xf32> to vector<2xf32>
    %962 = vector.shape_cast %961 : vector<2xf32> to vector<2x1xf32>
    %cst_228 = arith.constant 3.200000e+01 : f32
    %963 = vector.broadcast %cst_228 : f32 to vector<2x1xf32>
    %964 = arith.divf %962, %963 : vector<2x1xf32>
    %965 = vector.broadcast %957 : vector<2x1xf32> to vector<2x32xf32>
    %966 = arith.subf %949, %965 : vector<2x32xf32>
    %cst_229 = arith.constant 9.99999974E-6 : f32
    %967 = vector.broadcast %cst_229 : f32 to vector<2x1xf32>
    %968 = arith.addf %964, %967 : vector<2x1xf32>
    %969 = math.rsqrt %968 : vector<2x1xf32>
    %970 = vector.broadcast %969 : vector<2x1xf32> to vector<2x32xf32>
    %971 = arith.mulf %966, %970 : vector<2x32xf32>
    %972 = vector.broadcast %951 : vector<1x32xf32> to vector<2x32xf32>
    %973 = arith.mulf %971, %972 : vector<2x32xf32>
    %974 = vector.broadcast %953 : vector<1x32xf32> to vector<2x32xf32>
    %975 = arith.addf %973, %974 : vector<2x32xf32>
    %976 = vector.extract_strided_slice %895 {offsets = [0, 128], sizes = [2, 32], strides = [1, 1]} : vector<2x192xf32> to vector<2x32xf32>
    %977 = arith.addf %975, %976 : vector<2x32xf32>
    %c0_230 = arith.constant 0 : index
    %c0_231 = arith.constant 0 : index
    %978 = vector.load %arg18[%c0_230, %c0_231] : memref<2x64xf32, #tpu.memory_space<vmem>>, vector<2x32xf32>
    tpu.vector_store %arg18[%c0_230, %c0_231], %977 {strides = array<i32>} : memref<2x64xf32, #tpu.memory_space<vmem>>, vector<2x32xf32>,
    %c0_232 = arith.constant 0 : index
    %c32_233 = arith.constant 32 : index
    %979 = vector.load %arg18[%c0_232, %c32_233] : memref<2x64xf32, #tpu.memory_space<vmem>>, vector<2x32xf32>
    tpu.vector_store %arg18[%c0_232, %c32_233], %886 {strides = array<i32>} : memref<2x64xf32, #tpu.memory_space<vmem>>, vector<2x32xf32>,
    %c0_234 = arith.constant 0 : index
    %c0_235 = arith.constant 0 : index
    %980 = vector.load %arg18[%c0_234, %c0_235] : memref<2x64xf32, #tpu.memory_space<vmem>>, vector<2x64xf32>
    %cst_236 = arith.constant dense<0.000000e+00> : vector<2x128xf32>
    %981 = tpu.matmul %980, %8, %cst_236 {dimension_numbers = #tpu.dot_dimension_numbers<[1], [0], [0], [1], [0, 0, 1, 1], [], []>} : vector<2x64xf32>, vector<64x128xf32>, vector<2x128xf32> -> vector<2x128xf32>
    %982 = vector.broadcast %9 : vector<1x128xf32> to vector<2x128xf32>
    %983 = arith.addf %981, %982 : vector<2x128xf32>
    %984 = vector.extract_strided_slice %983 {offsets = [0, 0], sizes = [2, 32], strides = [1, 1]} : vector<2x128xf32> to vector<2x32xf32>
    %985 = arith.negf %984 : vector<2x32xf32>
    %986 = math.exp %985 : vector<2x32xf32>
    %cst_237 = arith.constant 1.000000e+00 : f32
    %987 = vector.broadcast %cst_237 : f32 to vector<2x32xf32>
    %988 = arith.addf %987, %986 : vector<2x32xf32>
    %989 = arith.divf %987, %988 : vector<2x32xf32>
    %990 = vector.extract_strided_slice %983 {offsets = [0, 32], sizes = [2, 32], strides = [1, 1]} : vector<2x128xf32> to vector<2x32xf32>
    %991 = arith.negf %990 : vector<2x32xf32>
    %992 = math.exp %991 : vector<2x32xf32>
    %cst_238 = arith.constant 1.000000e+00 : f32
    %993 = vector.broadcast %cst_238 : f32 to vector<2x32xf32>
    %994 = arith.addf %993, %992 : vector<2x32xf32>
    %995 = arith.divf %993, %994 : vector<2x32xf32>
    %996 = vector.extract_strided_slice %983 {offsets = [0, 64], sizes = [2, 32], strides = [1, 1]} : vector<2x128xf32> to vector<2x32xf32>
    %997 = math.tanh %996 : vector<2x32xf32>
    %998 = vector.extract_strided_slice %983 {offsets = [0, 96], sizes = [2, 32], strides = [1, 1]} : vector<2x128xf32> to vector<2x32xf32>
    %999 = arith.negf %998 : vector<2x32xf32>
    %1000 = math.exp %999 : vector<2x32xf32>
    %cst_239 = arith.constant 1.000000e+00 : f32
    %1001 = vector.broadcast %cst_239 : f32 to vector<2x32xf32>
    %1002 = arith.addf %1001, %1000 : vector<2x32xf32>
    %1003 = arith.divf %1001, %1002 : vector<2x32xf32>
    %1004 = arith.mulf %995, %856 : vector<2x32xf32>
    %1005 = arith.mulf %989, %997 : vector<2x32xf32>
    %1006 = arith.addf %1004, %1005 : vector<2x32xf32>
    %1007 = vector.extract_strided_slice %11 {offsets = [0, 0, 0], sizes = [1, 1, 32], strides = [1, 1, 1]} : vector<4x1x32xf32> to vector<1x1x32xf32>
    %1008 = vector.shape_cast %1007 : vector<1x1x32xf32> to vector<1x32xf32>
    %1009 = vector.extract_strided_slice %11 {offsets = [1, 0, 0], sizes = [1, 1, 32], strides = [1, 1, 1]} : vector<4x1x32xf32> to vector<1x1x32xf32>
    %1010 = vector.shape_cast %1009 : vector<1x1x32xf32> to vector<1x32xf32>
    %cst_240 = arith.constant dense<0.000000e+00> : vector<2xf32>
    %1011 = vector.multi_reduction <add>, %1006, %cst_240 [1] : vector<2x32xf32> to vector<2xf32>
    %1012 = vector.shape_cast %1011 : vector<2xf32> to vector<2x1xf32>
    %cst_241 = arith.constant 3.200000e+01 : f32
    %1013 = vector.broadcast %cst_241 : f32 to vector<2x1xf32>
    %1014 = arith.divf %1012, %1013 : vector<2x1xf32>
    %1015 = vector.broadcast %1014 : vector<2x1xf32> to vector<2x32xf32>
    %1016 = arith.subf %1006, %1015 : vector<2x32xf32>
    %1017 = arith.mulf %1016, %1016 : vector<2x32xf32>
    %cst_242 = arith.constant dense<0.000000e+00> : vector<2xf32>
    %1018 = vector.multi_reduction <add>, %1017, %cst_242 [1] : vector<2x32xf32> to vector<2xf32>
    %1019 = vector.shape_cast %1018 : vector<2xf32> to vector<2x1xf32>
    %cst_243 = arith.constant 3.200000e+01 : f32
    %1020 = vector.broadcast %cst_243 : f32 to vector<2x1xf32>
    %1021 = arith.divf %1019, %1020 : vector<2x1xf32>
    %1022 = vector.broadcast %1014 : vector<2x1xf32> to vector<2x32xf32>
    %1023 = arith.subf %1006, %1022 : vector<2x32xf32>
    %cst_244 = arith.constant 9.99999974E-6 : f32
    %1024 = vector.broadcast %cst_244 : f32 to vector<2x1xf32>
    %1025 = arith.addf %1021, %1024 : vector<2x1xf32>
    %1026 = math.rsqrt %1025 : vector<2x1xf32>
    %1027 = vector.broadcast %1026 : vector<2x1xf32> to vector<2x32xf32>
    %1028 = arith.mulf %1023, %1027 : vector<2x32xf32>
    %1029 = vector.broadcast %1008 : vector<1x32xf32> to vector<2x32xf32>
    %1030 = arith.mulf %1028, %1029 : vector<2x32xf32>
    %1031 = vector.broadcast %1010 : vector<1x32xf32> to vector<2x32xf32>
    %1032 = arith.addf %1030, %1031 : vector<2x32xf32>
    %1033 = math.tanh %1032 : vector<2x32xf32>
    %1034 = arith.mulf %1003, %1033 : vector<2x32xf32>
    %1035 = vector.extract_strided_slice %11 {offsets = [2, 0, 0], sizes = [1, 1, 32], strides = [1, 1, 1]} : vector<4x1x32xf32> to vector<1x1x32xf32>
    %1036 = vector.shape_cast %1035 : vector<1x1x32xf32> to vector<1x32xf32>
    %1037 = vector.extract_strided_slice %11 {offsets = [3, 0, 0], sizes = [1, 1, 32], strides = [1, 1, 1]} : vector<4x1x32xf32> to vector<1x1x32xf32>
    %1038 = vector.shape_cast %1037 : vector<1x1x32xf32> to vector<1x32xf32>
    %cst_245 = arith.constant dense<0.000000e+00> : vector<2xf32>
    %1039 = vector.multi_reduction <add>, %1034, %cst_245 [1] : vector<2x32xf32> to vector<2xf32>
    %1040 = vector.shape_cast %1039 : vector<2xf32> to vector<2x1xf32>
    %cst_246 = arith.constant 3.200000e+01 : f32
    %1041 = vector.broadcast %cst_246 : f32 to vector<2x1xf32>
    %1042 = arith.divf %1040, %1041 : vector<2x1xf32>
    %1043 = vector.broadcast %1042 : vector<2x1xf32> to vector<2x32xf32>
    %1044 = arith.subf %1034, %1043 : vector<2x32xf32>
    %1045 = arith.mulf %1044, %1044 : vector<2x32xf32>
    %cst_247 = arith.constant dense<0.000000e+00> : vector<2xf32>
    %1046 = vector.multi_reduction <add>, %1045, %cst_247 [1] : vector<2x32xf32> to vector<2xf32>
    %1047 = vector.shape_cast %1046 : vector<2xf32> to vector<2x1xf32>
    %cst_248 = arith.constant 3.200000e+01 : f32
    %1048 = vector.broadcast %cst_248 : f32 to vector<2x1xf32>
    %1049 = arith.divf %1047, %1048 : vector<2x1xf32>
    %1050 = vector.broadcast %1042 : vector<2x1xf32> to vector<2x32xf32>
    %1051 = arith.subf %1034, %1050 : vector<2x32xf32>
    %cst_249 = arith.constant 9.99999974E-6 : f32
    %1052 = vector.broadcast %cst_249 : f32 to vector<2x1xf32>
    %1053 = arith.addf %1049, %1052 : vector<2x1xf32>
    %1054 = math.rsqrt %1053 : vector<2x1xf32>
    %1055 = vector.broadcast %1054 : vector<2x1xf32> to vector<2x32xf32>
    %1056 = arith.mulf %1051, %1055 : vector<2x32xf32>
    %1057 = vector.broadcast %1036 : vector<1x32xf32> to vector<2x32xf32>
    %1058 = arith.mulf %1056, %1057 : vector<2x32xf32>
    %1059 = vector.broadcast %1038 : vector<1x32xf32> to vector<2x32xf32>
    %1060 = arith.addf %1058, %1059 : vector<2x32xf32>
    %1061 = vector.extract_strided_slice %895 {offsets = [0, 160], sizes = [2, 32], strides = [1, 1]} : vector<2x192xf32> to vector<2x32xf32>
    %1062 = arith.addf %1060, %1061 : vector<2x32xf32>
    %1063 = arith.addf %977, %1062 : vector<2x32xf32>
    %cst_250 = arith.constant 5.000000e-01 : f32
    %1064 = vector.broadcast %cst_250 : f32 to vector<2x32xf32>
    %1065 = arith.mulf %1063, %1064 : vector<2x32xf32>
    %c2_i32_251 = arith.constant 2 : i32
    %1066 = arith.muli %c5_i32, %c2_i32_251 : i32
    %1067 = arith.index_cast %1066 : i32 to index
    %c0_252 = arith.constant 0 : index
    %1068 = vector.load %arg14[%1067, %c0_252] : memref<16x32xf32, #tpu.memory_space<vmem>>, vector<2x32xf32>
    tpu.vector_store %arg14[%1067, %c0_252], %1065 {strides = array<i32>} : memref<16x32xf32, #tpu.memory_space<vmem>>, vector<2x32xf32>,
    %c6_i32 = arith.constant 6 : i32
    %c2_i32_253 = arith.constant 2 : i32
    %1069 = arith.muli %c6_i32, %c2_i32_253 : i32
    %1070 = arith.index_cast %1069 : i32 to index
    %c0_254 = arith.constant 0 : index
    %1071 = vector.load %arg17[%1070, %c0_254] : memref<16x192xf32, #tpu.memory_space<vmem>>, vector<2x192xf32>
    %1072 = vector.extract_strided_slice %1071 {offsets = [0, 0], sizes = [2, 128], strides = [1, 1]} : vector<2x192xf32> to vector<2x128xf32>
    %cst_255 = arith.constant dense<0.000000e+00> : vector<2x128xf32>
    %1073 = tpu.matmul %977, %7, %cst_255 {dimension_numbers = #tpu.dot_dimension_numbers<[1], [0], [0], [1], [0, 0, 1, 1], [], []>} : vector<2x32xf32>, vector<32x128xf32>, vector<2x128xf32> -> vector<2x128xf32>
    %1074 = arith.addf %1072, %1073 : vector<2x128xf32>
    %1075 = vector.extract_strided_slice %1074 {offsets = [0, 0], sizes = [2, 32], strides = [1, 1]} : vector<2x128xf32> to vector<2x32xf32>
    %1076 = arith.negf %1075 : vector<2x32xf32>
    %1077 = math.exp %1076 : vector<2x32xf32>
    %cst_256 = arith.constant 1.000000e+00 : f32
    %1078 = vector.broadcast %cst_256 : f32 to vector<2x32xf32>
    %1079 = arith.addf %1078, %1077 : vector<2x32xf32>
    %1080 = arith.divf %1078, %1079 : vector<2x32xf32>
    %1081 = vector.extract_strided_slice %1074 {offsets = [0, 32], sizes = [2, 32], strides = [1, 1]} : vector<2x128xf32> to vector<2x32xf32>
    %1082 = arith.negf %1081 : vector<2x32xf32>
    %1083 = math.exp %1082 : vector<2x32xf32>
    %cst_257 = arith.constant 1.000000e+00 : f32
    %1084 = vector.broadcast %cst_257 : f32 to vector<2x32xf32>
    %1085 = arith.addf %1084, %1083 : vector<2x32xf32>
    %1086 = arith.divf %1084, %1085 : vector<2x32xf32>
    %1087 = vector.extract_strided_slice %1074 {offsets = [0, 64], sizes = [2, 32], strides = [1, 1]} : vector<2x128xf32> to vector<2x32xf32>
    %1088 = math.tanh %1087 : vector<2x32xf32>
    %1089 = vector.extract_strided_slice %1074 {offsets = [0, 96], sizes = [2, 32], strides = [1, 1]} : vector<2x128xf32> to vector<2x32xf32>
    %1090 = arith.negf %1089 : vector<2x32xf32>
    %1091 = math.exp %1090 : vector<2x32xf32>
    %cst_258 = arith.constant 1.000000e+00 : f32
    %1092 = vector.broadcast %cst_258 : f32 to vector<2x32xf32>
    %1093 = arith.addf %1092, %1091 : vector<2x32xf32>
    %1094 = arith.divf %1092, %1093 : vector<2x32xf32>
    %1095 = arith.mulf %1086, %947 : vector<2x32xf32>
    %1096 = arith.mulf %1080, %1088 : vector<2x32xf32>
    %1097 = arith.addf %1095, %1096 : vector<2x32xf32>
    %1098 = vector.extract_strided_slice %10 {offsets = [0, 0, 0], sizes = [1, 1, 32], strides = [1, 1, 1]} : vector<4x1x32xf32> to vector<1x1x32xf32>
    %1099 = vector.shape_cast %1098 : vector<1x1x32xf32> to vector<1x32xf32>
    %1100 = vector.extract_strided_slice %10 {offsets = [1, 0, 0], sizes = [1, 1, 32], strides = [1, 1, 1]} : vector<4x1x32xf32> to vector<1x1x32xf32>
    %1101 = vector.shape_cast %1100 : vector<1x1x32xf32> to vector<1x32xf32>
    %cst_259 = arith.constant dense<0.000000e+00> : vector<2xf32>
    %1102 = vector.multi_reduction <add>, %1097, %cst_259 [1] : vector<2x32xf32> to vector<2xf32>
    %1103 = vector.shape_cast %1102 : vector<2xf32> to vector<2x1xf32>
    %cst_260 = arith.constant 3.200000e+01 : f32
    %1104 = vector.broadcast %cst_260 : f32 to vector<2x1xf32>
    %1105 = arith.divf %1103, %1104 : vector<2x1xf32>
    %1106 = vector.broadcast %1105 : vector<2x1xf32> to vector<2x32xf32>
    %1107 = arith.subf %1097, %1106 : vector<2x32xf32>
    %1108 = arith.mulf %1107, %1107 : vector<2x32xf32>
    %cst_261 = arith.constant dense<0.000000e+00> : vector<2xf32>
    %1109 = vector.multi_reduction <add>, %1108, %cst_261 [1] : vector<2x32xf32> to vector<2xf32>
    %1110 = vector.shape_cast %1109 : vector<2xf32> to vector<2x1xf32>
    %cst_262 = arith.constant 3.200000e+01 : f32
    %1111 = vector.broadcast %cst_262 : f32 to vector<2x1xf32>
    %1112 = arith.divf %1110, %1111 : vector<2x1xf32>
    %1113 = vector.broadcast %1105 : vector<2x1xf32> to vector<2x32xf32>
    %1114 = arith.subf %1097, %1113 : vector<2x32xf32>
    %cst_263 = arith.constant 9.99999974E-6 : f32
    %1115 = vector.broadcast %cst_263 : f32 to vector<2x1xf32>
    %1116 = arith.addf %1112, %1115 : vector<2x1xf32>
    %1117 = math.rsqrt %1116 : vector<2x1xf32>
    %1118 = vector.broadcast %1117 : vector<2x1xf32> to vector<2x32xf32>
    %1119 = arith.mulf %1114, %1118 : vector<2x32xf32>
    %1120 = vector.broadcast %1099 : vector<1x32xf32> to vector<2x32xf32>
    %1121 = arith.mulf %1119, %1120 : vector<2x32xf32>
    %1122 = vector.broadcast %1101 : vector<1x32xf32> to vector<2x32xf32>
    %1123 = arith.addf %1121, %1122 : vector<2x32xf32>
    %1124 = math.tanh %1123 : vector<2x32xf32>
    %1125 = arith.mulf %1094, %1124 : vector<2x32xf32>
    %1126 = vector.extract_strided_slice %10 {offsets = [2, 0, 0], sizes = [1, 1, 32], strides = [1, 1, 1]} : vector<4x1x32xf32> to vector<1x1x32xf32>
    %1127 = vector.shape_cast %1126 : vector<1x1x32xf32> to vector<1x32xf32>
    %1128 = vector.extract_strided_slice %10 {offsets = [3, 0, 0], sizes = [1, 1, 32], strides = [1, 1, 1]} : vector<4x1x32xf32> to vector<1x1x32xf32>
    %1129 = vector.shape_cast %1128 : vector<1x1x32xf32> to vector<1x32xf32>
    %cst_264 = arith.constant dense<0.000000e+00> : vector<2xf32>
    %1130 = vector.multi_reduction <add>, %1125, %cst_264 [1] : vector<2x32xf32> to vector<2xf32>
    %1131 = vector.shape_cast %1130 : vector<2xf32> to vector<2x1xf32>
    %cst_265 = arith.constant 3.200000e+01 : f32
    %1132 = vector.broadcast %cst_265 : f32 to vector<2x1xf32>
    %1133 = arith.divf %1131, %1132 : vector<2x1xf32>
    %1134 = vector.broadcast %1133 : vector<2x1xf32> to vector<2x32xf32>
    %1135 = arith.subf %1125, %1134 : vector<2x32xf32>
    %1136 = arith.mulf %1135, %1135 : vector<2x32xf32>
    %cst_266 = arith.constant dense<0.000000e+00> : vector<2xf32>
    %1137 = vector.multi_reduction <add>, %1136, %cst_266 [1] : vector<2x32xf32> to vector<2xf32>
    %1138 = vector.shape_cast %1137 : vector<2xf32> to vector<2x1xf32>
    %cst_267 = arith.constant 3.200000e+01 : f32
    %1139 = vector.broadcast %cst_267 : f32 to vector<2x1xf32>
    %1140 = arith.divf %1138, %1139 : vector<2x1xf32>
    %1141 = vector.broadcast %1133 : vector<2x1xf32> to vector<2x32xf32>
    %1142 = arith.subf %1125, %1141 : vector<2x32xf32>
    %cst_268 = arith.constant 9.99999974E-6 : f32
    %1143 = vector.broadcast %cst_268 : f32 to vector<2x1xf32>
    %1144 = arith.addf %1140, %1143 : vector<2x1xf32>
    %1145 = math.rsqrt %1144 : vector<2x1xf32>
    %1146 = vector.broadcast %1145 : vector<2x1xf32> to vector<2x32xf32>
    %1147 = arith.mulf %1142, %1146 : vector<2x32xf32>
    %1148 = vector.broadcast %1127 : vector<1x32xf32> to vector<2x32xf32>
    %1149 = arith.mulf %1147, %1148 : vector<2x32xf32>
    %1150 = vector.broadcast %1129 : vector<1x32xf32> to vector<2x32xf32>
    %1151 = arith.addf %1149, %1150 : vector<2x32xf32>
    %1152 = vector.extract_strided_slice %1071 {offsets = [0, 128], sizes = [2, 32], strides = [1, 1]} : vector<2x192xf32> to vector<2x32xf32>
    %1153 = arith.addf %1151, %1152 : vector<2x32xf32>
    %c0_269 = arith.constant 0 : index
    %c0_270 = arith.constant 0 : index
    %1154 = vector.load %arg18[%c0_269, %c0_270] : memref<2x64xf32, #tpu.memory_space<vmem>>, vector<2x32xf32>
    tpu.vector_store %arg18[%c0_269, %c0_270], %1153 {strides = array<i32>} : memref<2x64xf32, #tpu.memory_space<vmem>>, vector<2x32xf32>,
    %c0_271 = arith.constant 0 : index
    %c32_272 = arith.constant 32 : index
    %1155 = vector.load %arg18[%c0_271, %c32_272] : memref<2x64xf32, #tpu.memory_space<vmem>>, vector<2x32xf32>
    tpu.vector_store %arg18[%c0_271, %c32_272], %1062 {strides = array<i32>} : memref<2x64xf32, #tpu.memory_space<vmem>>, vector<2x32xf32>,
    %c0_273 = arith.constant 0 : index
    %c0_274 = arith.constant 0 : index
    %1156 = vector.load %arg18[%c0_273, %c0_274] : memref<2x64xf32, #tpu.memory_space<vmem>>, vector<2x64xf32>
    %cst_275 = arith.constant dense<0.000000e+00> : vector<2x128xf32>
    %1157 = tpu.matmul %1156, %8, %cst_275 {dimension_numbers = #tpu.dot_dimension_numbers<[1], [0], [0], [1], [0, 0, 1, 1], [], []>} : vector<2x64xf32>, vector<64x128xf32>, vector<2x128xf32> -> vector<2x128xf32>
    %1158 = vector.broadcast %9 : vector<1x128xf32> to vector<2x128xf32>
    %1159 = arith.addf %1157, %1158 : vector<2x128xf32>
    %1160 = vector.extract_strided_slice %1159 {offsets = [0, 0], sizes = [2, 32], strides = [1, 1]} : vector<2x128xf32> to vector<2x32xf32>
    %1161 = arith.negf %1160 : vector<2x32xf32>
    %1162 = math.exp %1161 : vector<2x32xf32>
    %cst_276 = arith.constant 1.000000e+00 : f32
    %1163 = vector.broadcast %cst_276 : f32 to vector<2x32xf32>
    %1164 = arith.addf %1163, %1162 : vector<2x32xf32>
    %1165 = arith.divf %1163, %1164 : vector<2x32xf32>
    %1166 = vector.extract_strided_slice %1159 {offsets = [0, 32], sizes = [2, 32], strides = [1, 1]} : vector<2x128xf32> to vector<2x32xf32>
    %1167 = arith.negf %1166 : vector<2x32xf32>
    %1168 = math.exp %1167 : vector<2x32xf32>
    %cst_277 = arith.constant 1.000000e+00 : f32
    %1169 = vector.broadcast %cst_277 : f32 to vector<2x32xf32>
    %1170 = arith.addf %1169, %1168 : vector<2x32xf32>
    %1171 = arith.divf %1169, %1170 : vector<2x32xf32>
    %1172 = vector.extract_strided_slice %1159 {offsets = [0, 64], sizes = [2, 32], strides = [1, 1]} : vector<2x128xf32> to vector<2x32xf32>
    %1173 = math.tanh %1172 : vector<2x32xf32>
    %1174 = vector.extract_strided_slice %1159 {offsets = [0, 96], sizes = [2, 32], strides = [1, 1]} : vector<2x128xf32> to vector<2x32xf32>
    %1175 = arith.negf %1174 : vector<2x32xf32>
    %1176 = math.exp %1175 : vector<2x32xf32>
    %cst_278 = arith.constant 1.000000e+00 : f32
    %1177 = vector.broadcast %cst_278 : f32 to vector<2x32xf32>
    %1178 = arith.addf %1177, %1176 : vector<2x32xf32>
    %1179 = arith.divf %1177, %1178 : vector<2x32xf32>
    %1180 = arith.mulf %1171, %1032 : vector<2x32xf32>
    %1181 = arith.mulf %1165, %1173 : vector<2x32xf32>
    %1182 = arith.addf %1180, %1181 : vector<2x32xf32>
    %1183 = vector.extract_strided_slice %11 {offsets = [0, 0, 0], sizes = [1, 1, 32], strides = [1, 1, 1]} : vector<4x1x32xf32> to vector<1x1x32xf32>
    %1184 = vector.shape_cast %1183 : vector<1x1x32xf32> to vector<1x32xf32>
    %1185 = vector.extract_strided_slice %11 {offsets = [1, 0, 0], sizes = [1, 1, 32], strides = [1, 1, 1]} : vector<4x1x32xf32> to vector<1x1x32xf32>
    %1186 = vector.shape_cast %1185 : vector<1x1x32xf32> to vector<1x32xf32>
    %cst_279 = arith.constant dense<0.000000e+00> : vector<2xf32>
    %1187 = vector.multi_reduction <add>, %1182, %cst_279 [1] : vector<2x32xf32> to vector<2xf32>
    %1188 = vector.shape_cast %1187 : vector<2xf32> to vector<2x1xf32>
    %cst_280 = arith.constant 3.200000e+01 : f32
    %1189 = vector.broadcast %cst_280 : f32 to vector<2x1xf32>
    %1190 = arith.divf %1188, %1189 : vector<2x1xf32>
    %1191 = vector.broadcast %1190 : vector<2x1xf32> to vector<2x32xf32>
    %1192 = arith.subf %1182, %1191 : vector<2x32xf32>
    %1193 = arith.mulf %1192, %1192 : vector<2x32xf32>
    %cst_281 = arith.constant dense<0.000000e+00> : vector<2xf32>
    %1194 = vector.multi_reduction <add>, %1193, %cst_281 [1] : vector<2x32xf32> to vector<2xf32>
    %1195 = vector.shape_cast %1194 : vector<2xf32> to vector<2x1xf32>
    %cst_282 = arith.constant 3.200000e+01 : f32
    %1196 = vector.broadcast %cst_282 : f32 to vector<2x1xf32>
    %1197 = arith.divf %1195, %1196 : vector<2x1xf32>
    %1198 = vector.broadcast %1190 : vector<2x1xf32> to vector<2x32xf32>
    %1199 = arith.subf %1182, %1198 : vector<2x32xf32>
    %cst_283 = arith.constant 9.99999974E-6 : f32
    %1200 = vector.broadcast %cst_283 : f32 to vector<2x1xf32>
    %1201 = arith.addf %1197, %1200 : vector<2x1xf32>
    %1202 = math.rsqrt %1201 : vector<2x1xf32>
    %1203 = vector.broadcast %1202 : vector<2x1xf32> to vector<2x32xf32>
    %1204 = arith.mulf %1199, %1203 : vector<2x32xf32>
    %1205 = vector.broadcast %1184 : vector<1x32xf32> to vector<2x32xf32>
    %1206 = arith.mulf %1204, %1205 : vector<2x32xf32>
    %1207 = vector.broadcast %1186 : vector<1x32xf32> to vector<2x32xf32>
    %1208 = arith.addf %1206, %1207 : vector<2x32xf32>
    %1209 = math.tanh %1208 : vector<2x32xf32>
    %1210 = arith.mulf %1179, %1209 : vector<2x32xf32>
    %1211 = vector.extract_strided_slice %11 {offsets = [2, 0, 0], sizes = [1, 1, 32], strides = [1, 1, 1]} : vector<4x1x32xf32> to vector<1x1x32xf32>
    %1212 = vector.shape_cast %1211 : vector<1x1x32xf32> to vector<1x32xf32>
    %1213 = vector.extract_strided_slice %11 {offsets = [3, 0, 0], sizes = [1, 1, 32], strides = [1, 1, 1]} : vector<4x1x32xf32> to vector<1x1x32xf32>
    %1214 = vector.shape_cast %1213 : vector<1x1x32xf32> to vector<1x32xf32>
    %cst_284 = arith.constant dense<0.000000e+00> : vector<2xf32>
    %1215 = vector.multi_reduction <add>, %1210, %cst_284 [1] : vector<2x32xf32> to vector<2xf32>
    %1216 = vector.shape_cast %1215 : vector<2xf32> to vector<2x1xf32>
    %cst_285 = arith.constant 3.200000e+01 : f32
    %1217 = vector.broadcast %cst_285 : f32 to vector<2x1xf32>
    %1218 = arith.divf %1216, %1217 : vector<2x1xf32>
    %1219 = vector.broadcast %1218 : vector<2x1xf32> to vector<2x32xf32>
    %1220 = arith.subf %1210, %1219 : vector<2x32xf32>
    %1221 = arith.mulf %1220, %1220 : vector<2x32xf32>
    %cst_286 = arith.constant dense<0.000000e+00> : vector<2xf32>
    %1222 = vector.multi_reduction <add>, %1221, %cst_286 [1] : vector<2x32xf32> to vector<2xf32>
    %1223 = vector.shape_cast %1222 : vector<2xf32> to vector<2x1xf32>
    %cst_287 = arith.constant 3.200000e+01 : f32
    %1224 = vector.broadcast %cst_287 : f32 to vector<2x1xf32>
    %1225 = arith.divf %1223, %1224 : vector<2x1xf32>
    %1226 = vector.broadcast %1218 : vector<2x1xf32> to vector<2x32xf32>
    %1227 = arith.subf %1210, %1226 : vector<2x32xf32>
    %cst_288 = arith.constant 9.99999974E-6 : f32
    %1228 = vector.broadcast %cst_288 : f32 to vector<2x1xf32>
    %1229 = arith.addf %1225, %1228 : vector<2x1xf32>
    %1230 = math.rsqrt %1229 : vector<2x1xf32>
    %1231 = vector.broadcast %1230 : vector<2x1xf32> to vector<2x32xf32>
    %1232 = arith.mulf %1227, %1231 : vector<2x32xf32>
    %1233 = vector.broadcast %1212 : vector<1x32xf32> to vector<2x32xf32>
    %1234 = arith.mulf %1232, %1233 : vector<2x32xf32>
    %1235 = vector.broadcast %1214 : vector<1x32xf32> to vector<2x32xf32>
    %1236 = arith.addf %1234, %1235 : vector<2x32xf32>
    %1237 = vector.extract_strided_slice %1071 {offsets = [0, 160], sizes = [2, 32], strides = [1, 1]} : vector<2x192xf32> to vector<2x32xf32>
    %1238 = arith.addf %1236, %1237 : vector<2x32xf32>
    %1239 = arith.addf %1153, %1238 : vector<2x32xf32>
    %cst_289 = arith.constant 5.000000e-01 : f32
    %1240 = vector.broadcast %cst_289 : f32 to vector<2x32xf32>
    %1241 = arith.mulf %1239, %1240 : vector<2x32xf32>
    %c2_i32_290 = arith.constant 2 : i32
    %1242 = arith.muli %c6_i32, %c2_i32_290 : i32
    %1243 = arith.index_cast %1242 : i32 to index
    %c0_291 = arith.constant 0 : index
    %1244 = vector.load %arg14[%1243, %c0_291] : memref<16x32xf32, #tpu.memory_space<vmem>>, vector<2x32xf32>
    tpu.vector_store %arg14[%1243, %c0_291], %1241 {strides = array<i32>} : memref<16x32xf32, #tpu.memory_space<vmem>>, vector<2x32xf32>,
    %c7_i32 = arith.constant 7 : i32
    %c2_i32_292 = arith.constant 2 : i32
    %1245 = arith.muli %c7_i32, %c2_i32_292 : i32
    %1246 = arith.index_cast %1245 : i32 to index
    %c0_293 = arith.constant 0 : index
    %1247 = vector.load %arg17[%1246, %c0_293] : memref<16x192xf32, #tpu.memory_space<vmem>>, vector<2x192xf32>
    %1248 = vector.extract_strided_slice %1247 {offsets = [0, 0], sizes = [2, 128], strides = [1, 1]} : vector<2x192xf32> to vector<2x128xf32>
    %cst_294 = arith.constant dense<0.000000e+00> : vector<2x128xf32>
    %1249 = tpu.matmul %1153, %7, %cst_294 {dimension_numbers = #tpu.dot_dimension_numbers<[1], [0], [0], [1], [0, 0, 1, 1], [], []>} : vector<2x32xf32>, vector<32x128xf32>, vector<2x128xf32> -> vector<2x128xf32>
    %1250 = arith.addf %1248, %1249 : vector<2x128xf32>
    %1251 = vector.extract_strided_slice %1250 {offsets = [0, 0], sizes = [2, 32], strides = [1, 1]} : vector<2x128xf32> to vector<2x32xf32>
    %1252 = arith.negf %1251 : vector<2x32xf32>
    %1253 = math.exp %1252 : vector<2x32xf32>
    %cst_295 = arith.constant 1.000000e+00 : f32
    %1254 = vector.broadcast %cst_295 : f32 to vector<2x32xf32>
    %1255 = arith.addf %1254, %1253 : vector<2x32xf32>
    %1256 = arith.divf %1254, %1255 : vector<2x32xf32>
    %1257 = vector.extract_strided_slice %1250 {offsets = [0, 32], sizes = [2, 32], strides = [1, 1]} : vector<2x128xf32> to vector<2x32xf32>
    %1258 = arith.negf %1257 : vector<2x32xf32>
    %1259 = math.exp %1258 : vector<2x32xf32>
    %cst_296 = arith.constant 1.000000e+00 : f32
    %1260 = vector.broadcast %cst_296 : f32 to vector<2x32xf32>
    %1261 = arith.addf %1260, %1259 : vector<2x32xf32>
    %1262 = arith.divf %1260, %1261 : vector<2x32xf32>
    %1263 = vector.extract_strided_slice %1250 {offsets = [0, 64], sizes = [2, 32], strides = [1, 1]} : vector<2x128xf32> to vector<2x32xf32>
    %1264 = math.tanh %1263 : vector<2x32xf32>
    %1265 = vector.extract_strided_slice %1250 {offsets = [0, 96], sizes = [2, 32], strides = [1, 1]} : vector<2x128xf32> to vector<2x32xf32>
    %1266 = arith.negf %1265 : vector<2x32xf32>
    %1267 = math.exp %1266 : vector<2x32xf32>
    %cst_297 = arith.constant 1.000000e+00 : f32
    %1268 = vector.broadcast %cst_297 : f32 to vector<2x32xf32>
    %1269 = arith.addf %1268, %1267 : vector<2x32xf32>
    %1270 = arith.divf %1268, %1269 : vector<2x32xf32>
    %1271 = arith.mulf %1262, %1123 : vector<2x32xf32>
    %1272 = arith.mulf %1256, %1264 : vector<2x32xf32>
    %1273 = arith.addf %1271, %1272 : vector<2x32xf32>
    %1274 = vector.extract_strided_slice %10 {offsets = [0, 0, 0], sizes = [1, 1, 32], strides = [1, 1, 1]} : vector<4x1x32xf32> to vector<1x1x32xf32>
    %1275 = vector.shape_cast %1274 : vector<1x1x32xf32> to vector<1x32xf32>
    %1276 = vector.extract_strided_slice %10 {offsets = [1, 0, 0], sizes = [1, 1, 32], strides = [1, 1, 1]} : vector<4x1x32xf32> to vector<1x1x32xf32>
    %1277 = vector.shape_cast %1276 : vector<1x1x32xf32> to vector<1x32xf32>
    %cst_298 = arith.constant dense<0.000000e+00> : vector<2xf32>
    %1278 = vector.multi_reduction <add>, %1273, %cst_298 [1] : vector<2x32xf32> to vector<2xf32>
    %1279 = vector.shape_cast %1278 : vector<2xf32> to vector<2x1xf32>
    %cst_299 = arith.constant 3.200000e+01 : f32
    %1280 = vector.broadcast %cst_299 : f32 to vector<2x1xf32>
    %1281 = arith.divf %1279, %1280 : vector<2x1xf32>
    %1282 = vector.broadcast %1281 : vector<2x1xf32> to vector<2x32xf32>
    %1283 = arith.subf %1273, %1282 : vector<2x32xf32>
    %1284 = arith.mulf %1283, %1283 : vector<2x32xf32>
    %cst_300 = arith.constant dense<0.000000e+00> : vector<2xf32>
    %1285 = vector.multi_reduction <add>, %1284, %cst_300 [1] : vector<2x32xf32> to vector<2xf32>
    %1286 = vector.shape_cast %1285 : vector<2xf32> to vector<2x1xf32>
    %cst_301 = arith.constant 3.200000e+01 : f32
    %1287 = vector.broadcast %cst_301 : f32 to vector<2x1xf32>
    %1288 = arith.divf %1286, %1287 : vector<2x1xf32>
    %1289 = vector.broadcast %1281 : vector<2x1xf32> to vector<2x32xf32>
    %1290 = arith.subf %1273, %1289 : vector<2x32xf32>
    %cst_302 = arith.constant 9.99999974E-6 : f32
    %1291 = vector.broadcast %cst_302 : f32 to vector<2x1xf32>
    %1292 = arith.addf %1288, %1291 : vector<2x1xf32>
    %1293 = math.rsqrt %1292 : vector<2x1xf32>
    %1294 = vector.broadcast %1293 : vector<2x1xf32> to vector<2x32xf32>
    %1295 = arith.mulf %1290, %1294 : vector<2x32xf32>
    %1296 = vector.broadcast %1275 : vector<1x32xf32> to vector<2x32xf32>
    %1297 = arith.mulf %1295, %1296 : vector<2x32xf32>
    %1298 = vector.broadcast %1277 : vector<1x32xf32> to vector<2x32xf32>
    %1299 = arith.addf %1297, %1298 : vector<2x32xf32>
    %1300 = math.tanh %1299 : vector<2x32xf32>
    %1301 = arith.mulf %1270, %1300 : vector<2x32xf32>
    %1302 = vector.extract_strided_slice %10 {offsets = [2, 0, 0], sizes = [1, 1, 32], strides = [1, 1, 1]} : vector<4x1x32xf32> to vector<1x1x32xf32>
    %1303 = vector.shape_cast %1302 : vector<1x1x32xf32> to vector<1x32xf32>
    %1304 = vector.extract_strided_slice %10 {offsets = [3, 0, 0], sizes = [1, 1, 32], strides = [1, 1, 1]} : vector<4x1x32xf32> to vector<1x1x32xf32>
    %1305 = vector.shape_cast %1304 : vector<1x1x32xf32> to vector<1x32xf32>
    %cst_303 = arith.constant dense<0.000000e+00> : vector<2xf32>
    %1306 = vector.multi_reduction <add>, %1301, %cst_303 [1] : vector<2x32xf32> to vector<2xf32>
    %1307 = vector.shape_cast %1306 : vector<2xf32> to vector<2x1xf32>
    %cst_304 = arith.constant 3.200000e+01 : f32
    %1308 = vector.broadcast %cst_304 : f32 to vector<2x1xf32>
    %1309 = arith.divf %1307, %1308 : vector<2x1xf32>
    %1310 = vector.broadcast %1309 : vector<2x1xf32> to vector<2x32xf32>
    %1311 = arith.subf %1301, %1310 : vector<2x32xf32>
    %1312 = arith.mulf %1311, %1311 : vector<2x32xf32>
    %cst_305 = arith.constant dense<0.000000e+00> : vector<2xf32>
    %1313 = vector.multi_reduction <add>, %1312, %cst_305 [1] : vector<2x32xf32> to vector<2xf32>
    %1314 = vector.shape_cast %1313 : vector<2xf32> to vector<2x1xf32>
    %cst_306 = arith.constant 3.200000e+01 : f32
    %1315 = vector.broadcast %cst_306 : f32 to vector<2x1xf32>
    %1316 = arith.divf %1314, %1315 : vector<2x1xf32>
    %1317 = vector.broadcast %1309 : vector<2x1xf32> to vector<2x32xf32>
    %1318 = arith.subf %1301, %1317 : vector<2x32xf32>
    %cst_307 = arith.constant 9.99999974E-6 : f32
    %1319 = vector.broadcast %cst_307 : f32 to vector<2x1xf32>
    %1320 = arith.addf %1316, %1319 : vector<2x1xf32>
    %1321 = math.rsqrt %1320 : vector<2x1xf32>
    %1322 = vector.broadcast %1321 : vector<2x1xf32> to vector<2x32xf32>
    %1323 = arith.mulf %1318, %1322 : vector<2x32xf32>
    %1324 = vector.broadcast %1303 : vector<1x32xf32> to vector<2x32xf32>
    %1325 = arith.mulf %1323, %1324 : vector<2x32xf32>
    %1326 = vector.broadcast %1305 : vector<1x32xf32> to vector<2x32xf32>
    %1327 = arith.addf %1325, %1326 : vector<2x32xf32>
    %1328 = vector.extract_strided_slice %1247 {offsets = [0, 128], sizes = [2, 32], strides = [1, 1]} : vector<2x192xf32> to vector<2x32xf32>
    %1329 = arith.addf %1327, %1328 : vector<2x32xf32>
    %c0_308 = arith.constant 0 : index
    %c0_309 = arith.constant 0 : index
    %1330 = vector.load %arg18[%c0_308, %c0_309] : memref<2x64xf32, #tpu.memory_space<vmem>>, vector<2x32xf32>
    tpu.vector_store %arg18[%c0_308, %c0_309], %1329 {strides = array<i32>} : memref<2x64xf32, #tpu.memory_space<vmem>>, vector<2x32xf32>,
    %c0_310 = arith.constant 0 : index
    %c32_311 = arith.constant 32 : index
    %1331 = vector.load %arg18[%c0_310, %c32_311] : memref<2x64xf32, #tpu.memory_space<vmem>>, vector<2x32xf32>
    tpu.vector_store %arg18[%c0_310, %c32_311], %1238 {strides = array<i32>} : memref<2x64xf32, #tpu.memory_space<vmem>>, vector<2x32xf32>,
    %c0_312 = arith.constant 0 : index
    %c0_313 = arith.constant 0 : index
    %1332 = vector.load %arg18[%c0_312, %c0_313] : memref<2x64xf32, #tpu.memory_space<vmem>>, vector<2x64xf32>
    %cst_314 = arith.constant dense<0.000000e+00> : vector<2x128xf32>
    %1333 = tpu.matmul %1332, %8, %cst_314 {dimension_numbers = #tpu.dot_dimension_numbers<[1], [0], [0], [1], [0, 0, 1, 1], [], []>} : vector<2x64xf32>, vector<64x128xf32>, vector<2x128xf32> -> vector<2x128xf32>
    %1334 = vector.broadcast %9 : vector<1x128xf32> to vector<2x128xf32>
    %1335 = arith.addf %1333, %1334 : vector<2x128xf32>
    %1336 = vector.extract_strided_slice %1335 {offsets = [0, 0], sizes = [2, 32], strides = [1, 1]} : vector<2x128xf32> to vector<2x32xf32>
    %1337 = arith.negf %1336 : vector<2x32xf32>
    %1338 = math.exp %1337 : vector<2x32xf32>
    %cst_315 = arith.constant 1.000000e+00 : f32
    %1339 = vector.broadcast %cst_315 : f32 to vector<2x32xf32>
    %1340 = arith.addf %1339, %1338 : vector<2x32xf32>
    %1341 = arith.divf %1339, %1340 : vector<2x32xf32>
    %1342 = vector.extract_strided_slice %1335 {offsets = [0, 32], sizes = [2, 32], strides = [1, 1]} : vector<2x128xf32> to vector<2x32xf32>
    %1343 = arith.negf %1342 : vector<2x32xf32>
    %1344 = math.exp %1343 : vector<2x32xf32>
    %cst_316 = arith.constant 1.000000e+00 : f32
    %1345 = vector.broadcast %cst_316 : f32 to vector<2x32xf32>
    %1346 = arith.addf %1345, %1344 : vector<2x32xf32>
    %1347 = arith.divf %1345, %1346 : vector<2x32xf32>
    %1348 = vector.extract_strided_slice %1335 {offsets = [0, 64], sizes = [2, 32], strides = [1, 1]} : vector<2x128xf32> to vector<2x32xf32>
    %1349 = math.tanh %1348 : vector<2x32xf32>
    %1350 = vector.extract_strided_slice %1335 {offsets = [0, 96], sizes = [2, 32], strides = [1, 1]} : vector<2x128xf32> to vector<2x32xf32>
    %1351 = arith.negf %1350 : vector<2x32xf32>
    %1352 = math.exp %1351 : vector<2x32xf32>
    %cst_317 = arith.constant 1.000000e+00 : f32
    %1353 = vector.broadcast %cst_317 : f32 to vector<2x32xf32>
    %1354 = arith.addf %1353, %1352 : vector<2x32xf32>
    %1355 = arith.divf %1353, %1354 : vector<2x32xf32>
    %1356 = arith.mulf %1347, %1208 : vector<2x32xf32>
    %1357 = arith.mulf %1341, %1349 : vector<2x32xf32>
    %1358 = arith.addf %1356, %1357 : vector<2x32xf32>
    %1359 = vector.extract_strided_slice %11 {offsets = [0, 0, 0], sizes = [1, 1, 32], strides = [1, 1, 1]} : vector<4x1x32xf32> to vector<1x1x32xf32>
    %1360 = vector.shape_cast %1359 : vector<1x1x32xf32> to vector<1x32xf32>
    %1361 = vector.extract_strided_slice %11 {offsets = [1, 0, 0], sizes = [1, 1, 32], strides = [1, 1, 1]} : vector<4x1x32xf32> to vector<1x1x32xf32>
    %1362 = vector.shape_cast %1361 : vector<1x1x32xf32> to vector<1x32xf32>
    %cst_318 = arith.constant dense<0.000000e+00> : vector<2xf32>
    %1363 = vector.multi_reduction <add>, %1358, %cst_318 [1] : vector<2x32xf32> to vector<2xf32>
    %1364 = vector.shape_cast %1363 : vector<2xf32> to vector<2x1xf32>
    %cst_319 = arith.constant 3.200000e+01 : f32
    %1365 = vector.broadcast %cst_319 : f32 to vector<2x1xf32>
    %1366 = arith.divf %1364, %1365 : vector<2x1xf32>
    %1367 = vector.broadcast %1366 : vector<2x1xf32> to vector<2x32xf32>
    %1368 = arith.subf %1358, %1367 : vector<2x32xf32>
    %1369 = arith.mulf %1368, %1368 : vector<2x32xf32>
    %cst_320 = arith.constant dense<0.000000e+00> : vector<2xf32>
    %1370 = vector.multi_reduction <add>, %1369, %cst_320 [1] : vector<2x32xf32> to vector<2xf32>
    %1371 = vector.shape_cast %1370 : vector<2xf32> to vector<2x1xf32>
    %cst_321 = arith.constant 3.200000e+01 : f32
    %1372 = vector.broadcast %cst_321 : f32 to vector<2x1xf32>
    %1373 = arith.divf %1371, %1372 : vector<2x1xf32>
    %1374 = vector.broadcast %1366 : vector<2x1xf32> to vector<2x32xf32>
    %1375 = arith.subf %1358, %1374 : vector<2x32xf32>
    %cst_322 = arith.constant 9.99999974E-6 : f32
    %1376 = vector.broadcast %cst_322 : f32 to vector<2x1xf32>
    %1377 = arith.addf %1373, %1376 : vector<2x1xf32>
    %1378 = math.rsqrt %1377 : vector<2x1xf32>
    %1379 = vector.broadcast %1378 : vector<2x1xf32> to vector<2x32xf32>
    %1380 = arith.mulf %1375, %1379 : vector<2x32xf32>
    %1381 = vector.broadcast %1360 : vector<1x32xf32> to vector<2x32xf32>
    %1382 = arith.mulf %1380, %1381 : vector<2x32xf32>
    %1383 = vector.broadcast %1362 : vector<1x32xf32> to vector<2x32xf32>
    %1384 = arith.addf %1382, %1383 : vector<2x32xf32>
    %1385 = math.tanh %1384 : vector<2x32xf32>
    %1386 = arith.mulf %1355, %1385 : vector<2x32xf32>
    %1387 = vector.extract_strided_slice %11 {offsets = [2, 0, 0], sizes = [1, 1, 32], strides = [1, 1, 1]} : vector<4x1x32xf32> to vector<1x1x32xf32>
    %1388 = vector.shape_cast %1387 : vector<1x1x32xf32> to vector<1x32xf32>
    %1389 = vector.extract_strided_slice %11 {offsets = [3, 0, 0], sizes = [1, 1, 32], strides = [1, 1, 1]} : vector<4x1x32xf32> to vector<1x1x32xf32>
    %1390 = vector.shape_cast %1389 : vector<1x1x32xf32> to vector<1x32xf32>
    %cst_323 = arith.constant dense<0.000000e+00> : vector<2xf32>
    %1391 = vector.multi_reduction <add>, %1386, %cst_323 [1] : vector<2x32xf32> to vector<2xf32>
    %1392 = vector.shape_cast %1391 : vector<2xf32> to vector<2x1xf32>
    %cst_324 = arith.constant 3.200000e+01 : f32
    %1393 = vector.broadcast %cst_324 : f32 to vector<2x1xf32>
    %1394 = arith.divf %1392, %1393 : vector<2x1xf32>
    %1395 = vector.broadcast %1394 : vector<2x1xf32> to vector<2x32xf32>
    %1396 = arith.subf %1386, %1395 : vector<2x32xf32>
    %1397 = arith.mulf %1396, %1396 : vector<2x32xf32>
    %cst_325 = arith.constant dense<0.000000e+00> : vector<2xf32>
    %1398 = vector.multi_reduction <add>, %1397, %cst_325 [1] : vector<2x32xf32> to vector<2xf32>
    %1399 = vector.shape_cast %1398 : vector<2xf32> to vector<2x1xf32>
    %cst_326 = arith.constant 3.200000e+01 : f32
    %1400 = vector.broadcast %cst_326 : f32 to vector<2x1xf32>
    %1401 = arith.divf %1399, %1400 : vector<2x1xf32>
    %1402 = vector.broadcast %1394 : vector<2x1xf32> to vector<2x32xf32>
    %1403 = arith.subf %1386, %1402 : vector<2x32xf32>
    %cst_327 = arith.constant 9.99999974E-6 : f32
    %1404 = vector.broadcast %cst_327 : f32 to vector<2x1xf32>
    %1405 = arith.addf %1401, %1404 : vector<2x1xf32>
    %1406 = math.rsqrt %1405 : vector<2x1xf32>
    %1407 = vector.broadcast %1406 : vector<2x1xf32> to vector<2x32xf32>
    %1408 = arith.mulf %1403, %1407 : vector<2x32xf32>
    %1409 = vector.broadcast %1388 : vector<1x32xf32> to vector<2x32xf32>
    %1410 = arith.mulf %1408, %1409 : vector<2x32xf32>
    %1411 = vector.broadcast %1390 : vector<1x32xf32> to vector<2x32xf32>
    %1412 = arith.addf %1410, %1411 : vector<2x32xf32>
    %1413 = vector.extract_strided_slice %1247 {offsets = [0, 160], sizes = [2, 32], strides = [1, 1]} : vector<2x192xf32> to vector<2x32xf32>
    %1414 = arith.addf %1412, %1413 : vector<2x32xf32>
    %1415 = arith.addf %1329, %1414 : vector<2x32xf32>
    %cst_328 = arith.constant 5.000000e-01 : f32
    %1416 = vector.broadcast %cst_328 : f32 to vector<2x32xf32>
    %1417 = arith.mulf %1415, %1416 : vector<2x32xf32>
    %c2_i32_329 = arith.constant 2 : i32
    %1418 = arith.muli %c7_i32, %c2_i32_329 : i32
    %1419 = arith.index_cast %1418 : i32 to index
    %c0_330 = arith.constant 0 : index
    %1420 = vector.load %arg14[%1419, %c0_330] : memref<16x32xf32, #tpu.memory_space<vmem>>, vector<2x32xf32>
    tpu.vector_store %arg14[%1419, %c0_330], %1417 {strides = array<i32>} : memref<16x32xf32, #tpu.memory_space<vmem>>, vector<2x32xf32>,
    %c8_i32 = arith.constant 8 : i32
    %c0_331 = arith.constant 0 : index
    %c0_332 = arith.constant 0 : index
    %1421 = vector.load %arg14[%c0_331, %c0_332] : memref<16x32xf32, #tpu.memory_space<vmem>>, vector<16x32xf32>
    %c0_333 = arith.constant 0 : index
    %c0_334 = arith.constant 0 : index
    %1422 = vector.load %arg8[%c0_333, %c0_334] : memref<32x32xf32, #tpu.memory_space<vmem>>, vector<32x32xf32>
    %cst_335 = arith.constant dense<0.000000e+00> : vector<16x32xf32>
    %1423 = tpu.matmul %1421, %1422, %cst_335 {dimension_numbers = #tpu.dot_dimension_numbers<[1], [0], [0], [1], [0, 0, 1, 1], [], []>} : vector<16x32xf32>, vector<32x32xf32>, vector<16x32xf32> -> vector<16x32xf32>
    %c0_336 = arith.constant 0 : index
    %c0_337 = arith.constant 0 : index
    %1424 = vector.load %arg9[%c0_336, %c0_337] : memref<1x32xf32, #tpu.memory_space<vmem>>, vector<1x32xf32>
    %1425 = vector.broadcast %1424 : vector<1x32xf32> to vector<16x32xf32>
    %1426 = arith.addf %1423, %1425 : vector<16x32xf32>
    %1427 = math.tanh %1426 : vector<16x32xf32>
    %c0_338 = arith.constant 0 : index
    %c0_339 = arith.constant 0 : index
    %1428 = vector.load %arg10[%c0_338, %c0_339] : memref<1x32xf32, #tpu.memory_space<vmem>>, vector<1x32xf32>
    %1429 = vector.broadcast %1428 : vector<1x32xf32> to vector<16x32xf32>
    %1430 = arith.mulf %1427, %1429 : vector<16x32xf32>
    %cst_340 = arith.constant dense<0.000000e+00> : vector<16xf32>
    %1431 = vector.multi_reduction <add>, %1430, %cst_340 [1] : vector<16x32xf32> to vector<16xf32>
    %1432 = vector.shape_cast %1431 : vector<16xf32> to vector<16x1xf32>
    %c0_341 = arith.constant 0 : index
    %c0_342 = arith.constant 0 : index
    %1433 = vector.load %arg11[%c0_341, %c0_342] : memref<1x1xf32, #tpu.memory_space<vmem>>, vector<1x1xf32>
    %1434 = vector.broadcast %1433 : vector<1x1xf32> to vector<16x1xf32>
    %1435 = arith.addf %1432, %1434 : vector<16x1xf32>
    %cst_343 = arith.constant dense<0xFF800000> : vector<1xf32>
    %1436 = vector.multi_reduction <maximumf>, %1435, %cst_343 [0] : vector<16x1xf32> to vector<1xf32>
    %1437 = vector.shape_cast %1436 : vector<1xf32> to vector<1x1xf32>
    %1438 = vector.broadcast %1437 : vector<1x1xf32> to vector<16x1xf32>
    %1439 = arith.subf %1435, %1438 : vector<16x1xf32>
    %1440 = math.exp %1439 : vector<16x1xf32>
    %c0_344 = arith.constant 0 : index
    %c0_345 = arith.constant 0 : index
    %1441 = vector.load %arg12[%c0_344, %c0_345] : memref<2x16xf32, #tpu.memory_space<vmem>>, vector<2x16xf32>
    %cst_346 = arith.constant dense<0.000000e+00> : vector<2x1xf32>
    %1442 = tpu.matmul %1441, %1440, %cst_346 {dimension_numbers = #tpu.dot_dimension_numbers<[1], [0], [0], [1], [0, 0, 1, 1], [], []>} : vector<2x16xf32>, vector<16x1xf32>, vector<2x1xf32> -> vector<2x1xf32>
    %c0_347 = arith.constant 0 : index
    %c0_348 = arith.constant 0 : index
    %1443 = vector.load %arg13[%c0_347, %c0_348] : memref<16x2xf32, #tpu.memory_space<vmem>>, vector<16x2xf32>
    %cst_349 = arith.constant dense<0.000000e+00> : vector<16x1xf32>
    %1444 = tpu.matmul %1443, %1442, %cst_349 {dimension_numbers = #tpu.dot_dimension_numbers<[1], [0], [0], [1], [0, 0, 1, 1], [], []>} : vector<16x2xf32>, vector<2x1xf32>, vector<16x1xf32> -> vector<16x1xf32>
    %1445 = arith.divf %1440, %1444 : vector<16x1xf32>
    %c0_350 = arith.constant 0 : index
    %c0_351 = arith.constant 0 : index
    %1446 = vector.load %arg16[%c0_350, %c0_351] : memref<16x1xf32, #tpu.memory_space<vmem>>, vector<16x1xf32>
    tpu.vector_store %arg16[%c0_350, %c0_351], %1445 {strides = array<i32>} : memref<16x1xf32, #tpu.memory_space<vmem>>, vector<16x1xf32>,
    %c0_352 = arith.constant 0 : index
    %c0_353 = arith.constant 0 : index
    %1447 = vector.load %arg12[%c0_352, %c0_353] : memref<2x16xf32, #tpu.memory_space<vmem>>, vector<2x16xf32>
    %1448 = vector.broadcast %1445 : vector<16x1xf32> to vector<16x32xf32>
    %1449 = arith.mulf %1448, %1421 : vector<16x32xf32>
    %cst_354 = arith.constant dense<0.000000e+00> : vector<2x32xf32>
    %1450 = tpu.matmul %1447, %1449, %cst_354 {dimension_numbers = #tpu.dot_dimension_numbers<[1], [0], [0], [1], [0, 0, 1, 1], [], []>} : vector<2x16xf32>, vector<16x32xf32>, vector<2x32xf32> -> vector<2x32xf32>
    %c0_355 = arith.constant 0 : index
    %c0_356 = arith.constant 0 : index
    %1451 = vector.load %arg15[%c0_355, %c0_356] : memref<2x32xf32, #tpu.memory_space<vmem>>, vector<2x32xf32>
    tpu.vector_store %arg15[%c0_355, %c0_356], %1450 {strides = array<i32>} : memref<2x32xf32, #tpu.memory_space<vmem>>, vector<2x32xf32>,
    return
  }
}

</mosaic_0001>

<bundles_post_ra>
// kernel: enhanced_lstm_forward.1
= control target key start
LH: loop header
LB: loop body
LE: loop exit
PB: predicated region body
PF: predicated region fallthrough
CT: control target
= control target key end

     0   :  { %s4070_s0 = inlined_call_operand.vmem [shape: f32[16,16], index: 0, kind: input, shape index: {}]   ;;  %s4071_s1 = inlined_call_operand.vmem [shape: f32[16,192], index: 1, kind: input, shape index: {}]   ;;  %s4072_s2 = inlined_call_operand.vmem [shape: f32[1,192], index: 2, kind: input, shape index: {}]   ;;  %s4073_s3 = inlined_call_operand.vmem [shape: f32[32,128], index: 3, kind: input, shape index: {}]   ;;  %s4074_s4 = inlined_call_operand.vmem [shape: f32[64,128], index: 4, kind: input, shape index: {}]   ;;  %s4075_s5 = inlined_call_operand.vmem [shape: f32[1,128], index: 5, kind: input, shape index: {}]   ;;  %s4076_s6 = inlined_call_operand.vmem [shape: f32[4,1,32], index: 6, kind: input, shape index: {}]   ;;  %s4077_s7 = inlined_call_operand.vmem [shape: f32[4,1,32], index: 7, kind: input, shape index: {}]   ;;  %s4078_s8 = inlined_call_operand.vmem [shape: f32[32,32], index: 8, kind: input, shape index: {}]   ;;  %s4079_s9 = inlined_call_operand.vmem [shape: f32[1,32], index: 9, kind: input, shape index: {}]   ;;  %s4080_s10 = inlined_call_operand.vmem [shape: f32[1,32], index: 10, kind: input, shape index: {}]   ;;  %s4081_s11 = inlined_call_operand.<no memory space> [shape: f32[1,1], index: 11, kind: input, shape index: {}]   ;;  %s4082_s12 = inlined_call_operand.vmem [shape: f32[2,16], index: 12, kind: input, shape index: {}]   ;;  %s4083_s13 = inlined_call_operand.vmem [shape: f32[16,2], index: 13, kind: input, shape index: {}]   ;;  %s4084_s14 = inlined_call_operand.vmem [shape: f32[16,32], index: 14, kind: output, shape index: {0}]   ;;  %s4085_s15 = inlined_call_operand.hbm [shape: f32[2,32], index: 15, kind: output, shape index: {1}]   ;;  %s4086_s16 = inlined_call_operand.vmem [shape: f32[16,1], index: 16, kind: output, shape index: {2}]  }
   0x1   :  { %4088 = sst [smem:[#allocation8_spill]] %s4070_s0  ;;  %v22_v0 = vstv %s4081_s11 }
   0x2   :  { %23 = vst [vmem:[#allocation4] sm:$0x1] %v22_v0 }
   0x3   :  { %v57_v1 = vld [vmem:[%s4071_s1 + $0x10] sm:$0xff]  ;;  %v3123_v2 = vld [vmem:[%s4073_s3 + $0x18] sm:$0xff]  ;;  %v55_v3 = vld [vmem:[%s4071_s1] sm:$0xff]  ;;  %s4089_s17 = sld [smem:[#allocation8_spill]]  ;;  %vm65_vm0 = vcmask 130048  }
   0x4   :  { %86 = vmatpush.msra.mxu0 %v57_v1  ;;  %162 = vmatpush.msra.mxu2 %v3123_v2  ;;  %v3132_v4 = vld [vmem:[%s4073_s3 + $0x10] sm:$0xff]  ;;  %v3142_v6 = vld [vmem:[%s4073_s3 + $0x8] sm:$0xff]  ;;  %v3148_v7 = vld [vmem:[%s4073_s3] sm:$0xff] }
   0x6   :  { %87 = vmatpush.msra.mxu0 %v55_v3  ;;  %163 = vmatpush.msra.mxu2 %v3132_v4 }
   0x8   :  { %164 = vmatpush.msra.mxu2 %v3142_v6 }
   0x9   :  { %v3137_v5 = vld [vmem:[%s4089_s17] sm:$0xff] }
   0xa   :  { %2714 = vmatmul.msk.f32.vlgmr.msra.gmra.mxu0 %vm65_vm0, %v3137_v5  ;;  %165 = vmatpush.msra.mxu2 %v3148_v7 }
   0xb   :  { %24 = vsyncpa [#allocation6], 0  ;;  %v3022_v8 = vmov 0.0   ;;  %v3162_v9 = vld [vmem:[%s4072_s2] sm:$0x3]  ;;  %s3023_s24 = smov 64  }
   0xc   :  { %166 = vmatmul.f32.vlgmr.msra.gmra.mxu2 %v3022_v8  ;;  %v61_v10 = vperm.slane %v3162_v9, 0  ;;  %s3024_s2 = smov 32   ;;  %s3025_s25 = smov 96   ;;  %vm206_vm5 = vcmask 254976   ;;  %v3026_v37 = vmov 32.0   ;;  %vm119_vm10 = vcmask 523264  }
   0xd   :  { %487 = vmatpush.msrb.mxu2 %v3123_v2  ;;  %v2764_v48 = vld [vmem:[%s4076_s6] ss:$0 sm:$0xff]  ;;  %v2765_v49 = vld [vmem:[%s4076_s6 + $0x1] ss:$0 sm:$0xff]  ;;  %vm146_vm14 = vcmask 261120   ;;  %vm310_vm15 = vcmask 517376  }
   0xe   :  { %s3028_s22 = smov [#allocation5]  }
   0xf   :  { %488 = vmatpush.msrb.mxu2 %v3132_v4  ;;  %s2697_s23 = sshll.u32 %s3028_s22, 4  ;;  %s2698_s23 = int_to_ptr.vmem [resolvable:$true] %s2697_s23 }
  0x11   :  { %489 = vmatpush.msrb.mxu2 %v3142_v6 }
  0x13   :  { %490 = vmatpush.msrb.mxu2 %v3148_v7 }
  0x87   :  { %v89_v11 = vpop.f32.mrf.mxu0 }
  0x88   :  { %v90_v12 = vadd.f32 %v89_v11, %v61_v10 }
  0x8a   :  { %118 = vst [vmem:[#allocation2] sm:$0xff] %v90_v12 }
  0x8f   :  { %v167_v14 = vpop.f32.mrf.mxu2 }
  0x91   :  { %v144_v13 = vld [vmem:[#allocation2] sm:$0x3] }
  0x92   :  { %v170_v15 = vadd.f32 %v167_v14, %v144_v13 }
  0x94   :  { %2776 = vtanh.f32 %v170_v15  ;;  %v2718_v17 = vmul.f32 -1.442695, %v170_v15 }
  0x96   :  { %2778 = vpow2.f32 %v2718_v17  ;;  %v56_v17 = vld [vmem:[%s4071_s1 + $0x8] sm:$0xff] }
  0x9a   :  { %v2777_v16 = vpop.eup %2776 }
  0x9b   :  { %193 = vrot.lane.b32.xlu0 %v2777_v16, %s3023_s24  ;;  %v58_v16 = vld [vmem:[%s4071_s1 + $0x18] sm:$0xff] }
  0x9c   :  { %v2779_v18 = vpop.eup %2778  ;;  %109 = vmatpush.msra.mxu1 %v58_v16 }
  0x9d   :  { %v174_v19 = vadd.f32 1.0, %v2779_v18 }
  0x9e   :  { %110 = vmatpush.msra.mxu1 %v56_v17 }
  0x9f   :  { %2780 = vrcp.f32 %v174_v19  ;;  %v186_v25 = vand.u32 2147483648, %v174_v19  ;;  %vm180_vm2 = vweird.f32 %v174_v19  ;;  %v184_v26 = vand.u32 2147483647, %v174_v19  ;;  %2716 = vmatmul.msk.f32.vlgmr.msra.gmra.mxu1 %vm65_vm0, %v3137_v5 }
  0xa0   :  { %2782 = vrcp.f32 %v3026_v37  ;;  %778 = vmatpush.msrb.mxu1 %v3123_v2 }
  0xa1   :  { %v187_v28 = vor.u32 1.1754944e-38, %v186_v25  ;;  %vm185_vm4 = vcmp.eq.f32.partialorder %v184_v26, 8.507059e+37 }
  0xa2   :  { %779 = vmatpush.msrb.mxu1 %v3132_v4 }
  0xa4   :  { %780 = vmatpush.msrb.mxu1 %v3142_v6 }
  0xa5   :  { %v2781_v20 = vpop.eup %2780 }
  0xa6   :  { %v176_v21 = vmul.f32 %v2781_v20, %v174_v19  ;;  %vm181_vm1 = vweird.f32 %v2781_v20  ;;  %v2783_v38 = vpop.eup %2782  ;;  %781 = vmatpush.msrb.mxu1 %v3148_v7 }
  0xa7   :  { %vm182_vm3 = vmor %vm180_vm2, %vm181_vm1  ;;  %v211_v39 = vmul.f32 32.0, %v2783_v38  ;;  %vm215_vm6 = vweird.f32 %v2783_v38 }
  0xa8   :  { %v177_v22 = vsub.f32 1.0, %v176_v21  ;;  %1358 = vmatpush.msra.mxu1 %v3123_v2  ;;  %v2767_v21 = vld [vmem:[%s4076_s6 + $0x3] ss:$0 sm:$0xff] }
  0xa9   :  { %v212_v40 = vsub.f32 1.0, %v211_v39 }
  0xaa   :  { %v178_v23 = vmul.f32 %v2781_v20, %v177_v22  ;;  %1359 = vmatpush.msra.mxu1 %v3132_v4 }
  0xab   :  { %v213_v41 = vmul.f32 %v2783_v38, %v212_v40 }
  0xac   :  { %v179_v24 = vadd.f32 %v2781_v20, %v178_v23  ;;  %1360 = vmatpush.msra.mxu1 %v3142_v6 }
  0xad   :  { %v214_v42 = vadd.f32 %v2783_v38, %v213_v41 }
  0xae   :  { %v183_v27 = vsel %vm182_vm3, %v2781_v20, %v179_v24  ;;  %1361 = vmatpush.msra.mxu1 %v3148_v7  ;;  %v62_v24 = vperm.slane %v3162_v9, 1 }
  0xaf   :  { %v188_v30 = vsel %vm185_vm4, %v187_v28, %v183_v27  ;;  %v3171_v43 = vsel %vm215_vm6, %v2783_v38, %v214_v42  ;;  %v2766_v28 = vld [vmem:[%s4076_s6 + $0x2] ss:$0 sm:$0xff] }
  0xb0   :  { %v191_v32 = vmul.f32 0.0, %v188_v30 }
 0x10d   :  { %v194_v29 = vpop.permute.xlu0 %193 }
 0x10e   :  { %v196_v31 = vmul.f32 %v194_v29, %v188_v30  ;;  %v3235_v29 = vld [vmem:[%s4074_s4 + $0x38] sm:$0xff] }
 0x10f   :  { %327 = vmatpush.msra.mxu3 %v3235_v29  ;;  %631 = vmatpush.msrb.mxu0 %v3235_v29 }
 0x110   :  { %198 = vrot.lane.b32.xlu0 %v196_v31, %s3024_s2  ;;  %921 = vmatpush.msra.mxu2 %v3235_v29 }
 0x118   :  { %242 = vrot.lane.b32.xlu0 %v2764_v48, %s3024_s2 }
 0x11c   :  { %v112_v25 = vpop.f32.mrf.mxu1 }
 0x11d   :  { %v113_v26 = vadd.f32 %v112_v25, %v62_v24 }
 0x11f   :  { %120 = vst.msk [vmem:[#allocation2 + $0x8] sm:$0xff] %vm119_vm10, %v113_v26 }
 0x120   :  { %248 = vrot.lane.b32.xlu0 %v2765_v49, %s3024_s2 }
 0x126   :  { %v3224_v27 = vld [vmem:[#allocation2 + $0x8] sm:$0x3] }
 0x182   :  { %v199_v33 = vpop.permute.xlu0 %198 }
 0x183   :  { %v201_v34 = vadd.f32 %v199_v33, %v191_v32  ;;  %v3248_v33 = vld [vmem:[%s4074_s4 + $0x28] sm:$0xff] }
 0x185   :  { %203 = vrot.lane.b32.xlu1 %v201_v34, %s3025_s25 }
 0x18a   :  { %v3185_v58 = vpop.permute.xlu0 %242 }
 0x192   :  { %v3187_v0 = vpop.permute.xlu0 %248 }
 0x1f7   :  { %v204_v35 = vpop.permute.xlu1 %203 }
 0x1f8   :  { %v207_v36 = vsel %vm206_vm5, %v204_v35, 0.0 }
 0x1f9   :  { %208 = vadd.xlane.f32.xlu1 %v207_v36 }
 0x26c   :  { %v209_v44 = vpop.xlane.xlu1 %208 }
 0x26d   :  { %v217_v45 = vmul.f32 %v3171_v43, %v209_v44 }
 0x26f   :  { %v218_v46 = vsub.f32 %v201_v34, %v217_v45 }
 0x271   :  { %v219_v47 = vmul.f32 %v218_v46, %v218_v46 }
 0x273   :  { %221 = vrot.lane.b32.xlu2 %v219_v47, %s3025_s25 }
 0x2cd   :  { %v222_v50 = vpop.permute.xlu2 %221 }
 0x2ce   :  { %v224_v51 = vsel %vm206_vm5, %v222_v50, 0.0  ;;  %v131_v50 = vld [vmem:[%s4074_s4 + $0x20] sm:$0xff] }
 0x2cf   :  { %225 = vadd.xlane.f32.xlu2 %v224_v51  ;;  %v130_v51 = vld [vmem:[%s4074_s4 + $0x18] sm:$0xff] }
 0x342   :  { %v226_v52 = vpop.xlane.xlu2 %225 }
 0x343   :  { %v227_v53 = vmul.f32 %v226_v52, %v3171_v43  ;;  %v129_v52 = vld [vmem:[%s4074_s4 + $0x10] sm:$0xff] }
 0x345   :  { %v228_v54 = vadd.f32 1e-05, %v227_v53  ;;  %v128_v53 = vld [vmem:[%s4074_s4 + $0x8] sm:$0xff] }
 0x347   :  { %2784 = vrsqrt.f32 %v228_v54  ;;  %vm235_vm8 = vweird.f32 %v228_v54 }
 0x34d   :  { %v2785_v55 = vpop.eup %2784 }
 0x34e   :  { %v230_v56 = vmul.f32 %v2785_v55, %v228_v54  ;;  %vm236_vm7 = vweird.f32 %v2785_v55  ;;  %v127_v54 = vld [vmem:[%s4074_s4] sm:$0xff] }
 0x34f   :  { %vm237_vm9 = vmor %vm235_vm8, %vm236_vm7 }
 0x350   :  { %v231_v57 = vmul.f32 %v2785_v55, %v230_v56 }
 0x352   :  { %v232_v59 = vmul.f32 0.5, %v231_v57 }
 0x354   :  { %v233_v60 = vsub.f32 1.5, %v232_v59  ;;  %v471_v59 = vld [vmem:[#allocation2] sm:$0xc] }
 0x356   :  { %v234_v61 = vmul.f32 %v2785_v55, %v233_v60 }
 0x358   :  { %v238_v62 = vsel %vm237_vm9, %v2785_v55, %v234_v61  ;;  %v3303_v61 = vld [vmem:[%s4075_s5] ss:$0 sm:$0xff] }
 0x359   :  { %v239_v63 = vmul.f32 %v238_v62, %v218_v46 }
 0x35b   :  { %v245_v1 = vmul.f32 %v3185_v58, %v239_v63 }
 0x35d   :  { %v3191_v3 = vadd.f32 %v3187_v0, %v245_v1 }
 0x35f   :  { %2786 = vtanh.f32 %v3191_v3 }
 0x365   :  { %v2787_v11 = vpop.eup %2786 }
 0x366   :  { %254 = vrot.lane.b32.xlu0 %v2787_v11, %s3023_s24 }
 0x3d8   :  { %v255_v12 = vpop.permute.xlu0 %254 }
 0x3d9   :  { %v257_v13 = vmul.f32 %v255_v12, %v188_v30  ;;  %v3240_v30 = vld [vmem:[%s4074_s4 + $0x30] sm:$0xff] }
 0x3da   :  { %328 = vmatpush.msra.mxu3 %v3240_v30  ;;  %632 = vmatpush.msrb.mxu0 %v3240_v30 }
 0x3db   :  { %259 = vrot.lane.b32.xlu0 %v257_v13, %s3024_s2  ;;  %922 = vmatpush.msra.mxu2 %v3240_v30 }
 0x3dc   :  { %329 = vmatpush.msra.mxu3 %v3248_v33  ;;  %633 = vmatpush.msrb.mxu0 %v3248_v33 }
 0x3dd   :  { %923 = vmatpush.msra.mxu2 %v3248_v33 }
 0x3de   :  { %330 = vmatpush.msra.mxu3 %v131_v50  ;;  %634 = vmatpush.msrb.mxu0 %v131_v50 }
 0x3df   :  { %924 = vmatpush.msra.mxu2 %v131_v50 }
 0x3e0   :  { %331 = vmatpush.msra.mxu3 %v130_v51  ;;  %635 = vmatpush.msrb.mxu0 %v130_v51 }
 0x3e1   :  { %925 = vmatpush.msra.mxu2 %v130_v51 }
 0x3e2   :  { %332 = vmatpush.msra.mxu3 %v129_v52  ;;  %636 = vmatpush.msrb.mxu0 %v129_v52 }
 0x3e3   :  { %926 = vmatpush.msra.mxu2 %v129_v52 }
 0x3e4   :  { %333 = vmatpush.msra.mxu3 %v128_v53  ;;  %637 = vmatpush.msrb.mxu0 %v128_v53 }
 0x3e5   :  { %927 = vmatpush.msra.mxu2 %v128_v53 }
 0x3e6   :  { %334 = vmatpush.msra.mxu3 %v127_v54  ;;  %638 = vmatpush.msrb.mxu0 %v127_v54 }
 0x3e7   :  { %928 = vmatpush.msra.mxu2 %v127_v54 }
 0x3e8   :  { %1068 = vmatpush.msrb.mxu3 %v3123_v2  ;;  %1211 = vmatpush.msra.mxu0 %v3235_v29 }
 0x3ea   :  { %1069 = vmatpush.msrb.mxu3 %v3132_v4  ;;  %1212 = vmatpush.msra.mxu0 %v3240_v30 }
 0x3ec   :  { %1070 = vmatpush.msrb.mxu3 %v3142_v6  ;;  %1213 = vmatpush.msra.mxu0 %v3248_v33 }
 0x3ee   :  { %1071 = vmatpush.msrb.mxu3 %v3148_v7  ;;  %1214 = vmatpush.msra.mxu0 %v131_v50 }
 0x3f0   :  { %1215 = vmatpush.msra.mxu0 %v130_v51 }
 0x3f2   :  { %1216 = vmatpush.msra.mxu0 %v129_v52 }
 0x3f4   :  { %1217 = vmatpush.msra.mxu0 %v128_v53 }
 0x3f6   :  { %1218 = vmatpush.msra.mxu0 %v127_v54 }
 0x44d   :  { %v260_v14 = vpop.permute.xlu0 %259 }
 0x44e   :  { %v262_v15 = vsel %vm206_vm5, %v260_v14, 0.0 }
 0x44f   :  { %263 = vadd.xlane.f32.xlu0 %v262_v15 }
 0x4c2   :  { %v264_v18 = vpop.xlane.xlu0 %263 }
 0x4c3   :  { %v265_v19 = vmul.f32 %v264_v18, %v3171_v43 }
 0x4c5   :  { %v266_v5 = vsub.f32 %v257_v13, %v265_v19 }
 0x4c7   :  { %v267_v20 = vmul.f32 %v266_v5, %v266_v5 }
 0x4c9   :  { %269 = vrot.lane.b32.xlu2 %v267_v20, %s3024_s2 }
 0x4d1   :  { %296 = vrot.lane.b32.xlu2 %v2767_v21, %s3025_s25 }
 0x4d9   :  { %301 = vrot.lane.b32.xlu2 %v3224_v27, %s3025_s25 }
 0x523   :  { %v270_v22 = vpop.permute.xlu2 %269 }
 0x524   :  { %v272_v23 = vsel %vm206_vm5, %v270_v22, 0.0 }
 0x525   :  { %273 = vadd.xlane.f32.xlu1 %v272_v23 }
 0x52b   :  { %v3257_v39 = vpop.permute.xlu2 %296 }
 0x533   :  { %v302_v47 = vpop.permute.xlu2 %301 }
 0x53e   :  { %290 = vrot.lane.b32.xlu1 %v2766_v28, %s3025_s25 }
 0x598   :  { %v274_v31 = vpop.xlane.xlu1 %273 }
 0x599   :  { %v275_v32 = vmul.f32 %v274_v31, %v3171_v43 }
 0x59b   :  { %v276_v34 = vadd.f32 1e-05, %v275_v32 }
 0x59d   :  { %2788 = vrsqrt.f32 %v276_v34  ;;  %vm283_vm12 = vweird.f32 %v276_v34 }
 0x5a3   :  { %v2789_v35 = vpop.eup %2788 }
 0x5a4   :  { %v278_v36 = vmul.f32 %v2789_v35, %v276_v34  ;;  %vm284_vm11 = vweird.f32 %v2789_v35 }
 0x5a5   :  { %vm285_vm13 = vmor %vm283_vm12, %vm284_vm11  ;;  %vm537_vm11 = vcmask 257026  }
 0x5a6   :  { %v279_v37 = vmul.f32 %v2789_v35, %v278_v36 }
 0x5a8   :  { %v280_v38 = vmul.f32 0.5, %v279_v37 }
 0x5aa   :  { %v281_v40 = vsub.f32 1.5, %v280_v38 }
 0x5ac   :  { %v282_v41 = vmul.f32 %v2789_v35, %v281_v40 }
 0x5ae   :  { %v286_v42 = vsel %vm285_vm13, %v2789_v35, %v282_v41 }
 0x5af   :  { %v287_v44 = vmul.f32 %v286_v42, %v266_v5 }
 0x5b0   :  { %v3259_v45 = vpop.permute.xlu1 %290 }
 0x5b1   :  { %v293_v46 = vmul.f32 %v3259_v45, %v287_v44 }
 0x5b3   :  { %v299_v48 = vadd.f32 %v3257_v39, %v293_v46  ;;  %v520_v46 = vrot.slane %v3191_v3, 6 }
 0x5b5   :  { %v3263_v49 = vadd.f32 %v302_v47, %v299_v48 }
 0x5b7   :  { %306 = vrot.lane.b32.xlu1 %v3263_v49, %s3024_s2 }
 0x629   :  { %v307_v55 = vpop.permute.xlu1 %306 }
 0x62a   :  { %309 = vst.msk [vmem:[#allocation3] sm:$0x3] %vm206_vm5, %v307_v55  ;;  %2721 = vmatmul.msk.f32.vlgmr.msrb.gmra.mxu2 %vm146_vm14, %v307_v55 }
 0x62b   :  { %311 = vst.msk [vmem:[#allocation3] sm:$0x3] %vm310_vm15, %v3022_v8  ;;  %1780 = vmatpush.msrb.mxu2 %v3235_v29 }
 0x62d   :  { %1781 = vmatpush.msrb.mxu2 %v3240_v30 }
 0x62f   :  { %1782 = vmatpush.msrb.mxu2 %v3248_v33 }
 0x631   :  { %1783 = vmatpush.msrb.mxu2 %v131_v50 }
 0x632   :  { %v312_v56 = vld [vmem:[#allocation3] sm:$0x3] }
 0x633   :  { %2719 = vmatmul.msk.f32.vlgmr.msra.gmra.mxu3 %vm119_vm10, %v312_v56  ;;  %1784 = vmatpush.msrb.mxu2 %v130_v51 }
 0x634   :  { %1497 = vmatpush.msra.mxu3 %v3235_v29 }
 0x635   :  { %1785 = vmatpush.msrb.mxu2 %v129_v52 }
 0x636   :  { %1498 = vmatpush.msra.mxu3 %v3240_v30 }
 0x637   :  { %1786 = vmatpush.msrb.mxu2 %v128_v53 }
 0x638   :  { %1499 = vmatpush.msra.mxu3 %v3248_v33 }
 0x639   :  { %1787 = vmatpush.msrb.mxu2 %v127_v54 }
 0x63a   :  { %1500 = vmatpush.msra.mxu3 %v131_v50 }
 0x63c   :  { %1501 = vmatpush.msra.mxu3 %v130_v51 }
 0x63e   :  { %1502 = vmatpush.msra.mxu3 %v129_v52 }
 0x640   :  { %1503 = vmatpush.msra.mxu3 %v128_v53 }
 0x642   :  { %1504 = vmatpush.msra.mxu3 %v127_v54 }
 0x6ad   :  { %v492_v8 = vpop.f32.mrf.mxu2 }
 0x6ae   :  { %v496_v57 = vrot.slane %v492_v8, 6 }
 0x6b0   :  { %v498_v60 = vadd.f32 %v496_v57, %v471_v59 }
 0x6b2   :  { %2790 = vtanh.f32 %v498_v60  ;;  %v2722_v12 = vmul.f32 -1.442695, %v498_v60 }
 0x6b6   :  { %v336_v62 = vpop.f32.mrf.mxu3 }
 0x6b7   :  { %v337_v63 = vadd.f32 %v3303_v61, %v336_v62 }
 0x6b8   :  { %v2791_v1 = vpop.eup %2790 }
 0x6b9   :  { %2792 = vtanh.f32 %v337_v63  ;;  %524 = vrot.lane.b32.xlu2 %v2791_v1, %s3023_s24  ;;  %v2720_v18 = vmul.f32 -1.442695, %v337_v63 }
 0x6ba   :  { %2794 = vpow2.f32 %v2722_v12  ;;  %v2769_v12 = vld [vmem:[%s4077_s7] ss:$0 sm:$0xff] }
 0x6bf   :  { %v2793_v11 = vpop.eup %2792 }
 0x6c0   :  { %361 = vrot.lane.b32.xlu0 %v2793_v11, %s3023_s24  ;;  %v2795_v13 = vpop.eup %2794 }
 0x6c1   :  { %v502_v14 = vadd.f32 1.0, %v2795_v13 }
 0x6c3   :  { %2796 = vrcp.f32 %v502_v14  ;;  %v514_v20 = vand.u32 2147483648, %v502_v14  ;;  %vm508_vm2 = vweird.f32 %v502_v14  ;;  %v512_v21 = vand.u32 2147483647, %v502_v14 }
 0x6c4   :  { %2798 = vpow2.f32 %v2720_v18 }
 0x6c5   :  { %v515_v25 = vor.u32 1.1754944e-38, %v514_v20  ;;  %vm513_vm4 = vcmp.eq.f32.partialorder %v512_v21, 8.507059e+37 }
 0x6c9   :  { %v2797_v15 = vpop.eup %2796 }
 0x6ca   :  { %v504_v16 = vmul.f32 %v2797_v15, %v502_v14  ;;  %vm509_vm1 = vweird.f32 %v2797_v15  ;;  %v2799_v22 = vpop.eup %2798 }
 0x6cb   :  { %vm510_vm3 = vmor %vm508_vm2, %vm509_vm1  ;;  %v342_v26 = vadd.f32 1.0, %v2799_v22 }
 0x6cc   :  { %v505_v17 = vsub.f32 1.0, %v504_v16 }
 0x6cd   :  { %2800 = vrcp.f32 %v342_v26  ;;  %vm348_vm6 = vweird.f32 %v342_v26  ;;  %v354_v35 = vand.u32 2147483648, %v342_v26  ;;  %v352_v37 = vand.u32 2147483647, %v342_v26 }
 0x6ce   :  { %v506_v19 = vmul.f32 %v2797_v15, %v505_v17  ;;  %v2770_v17 = vld [vmem:[%s4077_s7 + $0x1] ss:$0 sm:$0xff] }
 0x6cf   :  { %v355_v38 = vor.u32 1.1754944e-38, %v354_v35  ;;  %vm353_vm9 = vcmp.eq.f32.partialorder %v352_v37, 8.507059e+37 }
 0x6d0   :  { %v507_v5 = vadd.f32 %v2797_v15, %v506_v19 }
 0x6d2   :  { %v511_v23 = vsel %vm510_vm3, %v2797_v15, %v507_v5 }
 0x6d3   :  { %v3308_v29 = vsel %vm513_vm4, %v515_v25, %v511_v23  ;;  %v2801_v31 = vpop.eup %2800 }
 0x6d4   :  { %v344_v32 = vmul.f32 %v2801_v31, %v342_v26  ;;  %vm349_vm7 = vweird.f32 %v2801_v31  ;;  %v522_v47 = vmul.f32 %v520_v46, %v3308_v29 }
 0x6d5   :  { %vm350_vm8 = vmor %vm348_vm6, %vm349_vm7 }
 0x6d6   :  { %v345_v33 = vsub.f32 1.0, %v344_v32 }
 0x6d8   :  { %v346_v34 = vmul.f32 %v2801_v31, %v345_v33 }
 0x6da   :  { %v347_v36 = vadd.f32 %v2801_v31, %v346_v34 }
 0x6dc   :  { %v351_v40 = vsel %vm350_vm8, %v2801_v31, %v347_v36 }
 0x6dd   :  { %v3312_v42 = vsel %vm353_vm9, %v355_v38, %v351_v40 }
 0x6de   :  { %v359_v51 = vmul.f32 0.0, %v3312_v42 }
 0x713   :  { %v525_v28 = vpop.permute.xlu2 %524 }
 0x714   :  { %v527_v30 = vmul.f32 %v525_v28, %v3308_v29 }
 0x716   :  { %529 = vrot.lane.b32.xlu1 %v527_v30, %s3024_s2 }
 0x732   :  { %v362_v41 = vpop.permute.xlu0 %361 }
 0x733   :  { %v364_v44 = vmul.f32 %v362_v41, %v3312_v42 }
 0x735   :  { %366 = vrot.lane.b32.xlu2 %v364_v44, %s3024_s2 }
 0x788   :  { %v530_v48 = vpop.permute.xlu1 %529 }
 0x789   :  { %v532_v50 = vadd.f32 %v530_v48, %v522_v47 }
 0x78b   :  { %534 = vrot.lane.b32.xlu1 %v532_v50, %s3025_s25 }
 0x78f   :  { %v367_v52 = vpop.permute.xlu2 %366 }
 0x790   :  { %v369_v53 = vadd.f32 %v367_v52, %v359_v51 }
 0x792   :  { %371 = vrot.lane.b32.xlu2 %v369_v53, %s3025_s25 }
 0x7ec   :  { %v372_v54 = vpop.permute.xlu2 %371 }
 0x7ed   :  { %v374_v55 = vsel %vm206_vm5, %v372_v54, 0.0 }
 0x7ee   :  { %375 = vadd.xlane.f32.xlu0 %v374_v55 }
 0x7fd   :  { %v535_v56 = vpop.permute.xlu1 %534 }
 0x7fe   :  { %v538_v3 = vsel %vm537_vm11, %v535_v56, 0.0 }
 0x7ff   :  { %539 = vadd.xlane.f32.xlu1 %v538_v3 }
 0x802   :  { %402 = vrot.lane.b32.xlu0 %v2769_v12, %s3024_s2 }
 0x861   :  { %v376_v59 = vpop.xlane.xlu0 %375 }
 0x862   :  { %v377_v62 = vmul.f32 %v376_v59, %v3171_v43 }
 0x864   :  { %v378_v1 = vsub.f32 %v369_v53, %v377_v62 }
 0x866   :  { %v379_v11 = vmul.f32 %v378_v1, %v378_v1 }
 0x872   :  { %v540_v8 = vpop.xlane.xlu1 %539 }
 0x873   :  { %v541_v57 = vmul.f32 %v540_v8, %v3171_v43 }
 0x874   :  { %v3344_v47 = vpop.permute.xlu0 %402 }
 0x875   :  { %v542_v60 = vsub.f32 %v532_v50, %v541_v57 }
 0x877   :  { %v543_v63 = vmul.f32 %v542_v60, %v542_v60 }
 0x879   :  { %545 = vrot.lane.b32.xlu2 %v543_v63, %s3025_s25  ;;  %v2771_v63 = vld [vmem:[%s4077_s7 + $0x2] ss:$0 sm:$0xff] }
 0x881   :  { %381 = vrot.lane.b32.xlu2 %v379_v11, %s3025_s25 }
 0x8d3   :  { %v546_v13 = vpop.permute.xlu2 %545 }
 0x8d4   :  { %v548_v14 = vsel %vm537_vm11, %v546_v13, 0.0 }
 0x8d5   :  { %549 = vadd.xlane.f32.xlu2 %v548_v14 }
 0x8db   :  { %v382_v15 = vpop.permute.xlu2 %381 }
 0x8dc   :  { %v384_v16 = vsel %vm206_vm5, %v382_v15, 0.0 }
 0x8dd   :  { %385 = vadd.xlane.f32.xlu1 %v384_v16 }
 0x8f6   :  { %408 = vrot.lane.b32.xlu1 %v2770_v17, %s3024_s2 }
 0x948   :  { %v550_v18 = vpop.xlane.xlu2 %549 }
 0x949   :  { %v551_v19 = vmul.f32 %v550_v18, %v3171_v43  ;;  %v3372_v18 = vld [vmem:[#allocation2 + $0x8] sm:$0xc] }
 0x94b   :  { %v552_v5 = vadd.f32 1e-05, %v551_v19 }
 0x94d   :  { %2802 = vrsqrt.f32 %v552_v5  ;;  %vm559_vm13 = vweird.f32 %v552_v5 }
 0x950   :  { %v386_v20 = vpop.xlane.xlu1 %385 }
 0x951   :  { %v387_v21 = vmul.f32 %v386_v20, %v3171_v43 }
 0x953   :  { %v2803_v22 = vpop.eup %2802  ;;  %v388_v23 = vadd.f32 1e-05, %v387_v21 }
 0x954   :  { %v554_v25 = vmul.f32 %v2803_v22, %v552_v5  ;;  %vm560_vm12 = vweird.f32 %v2803_v22  ;;  %v2772_v5 = vld [vmem:[%s4077_s7 + $0x3] ss:$0 sm:$0xff] }
 0x955   :  { %2804 = vrsqrt.f32 %v388_v23  ;;  %vm561_vm1 = vmor %vm559_vm13, %vm560_vm12  ;;  %vm395_vm3 = vweird.f32 %v388_v23 }
 0x956   :  { %v555_v26 = vmul.f32 %v2803_v22, %v554_v25 }
 0x958   :  { %v556_v28 = vmul.f32 0.5, %v555_v26 }
 0x95a   :  { %v557_v30 = vsub.f32 1.5, %v556_v28 }
 0x95b   :  { %v2805_v31 = vpop.eup %2804 }
 0x95c   :  { %v558_v32 = vmul.f32 %v2803_v22, %v557_v30  ;;  %v390_v33 = vmul.f32 %v2805_v31, %v388_v23  ;;  %vm396_vm2 = vweird.f32 %v2805_v31 }
 0x95d   :  { %vm397_vm4 = vmor %vm395_vm3, %vm396_vm2 }
 0x95e   :  { %v562_v34 = vsel %vm561_vm1, %v2803_v22, %v558_v32  ;;  %v391_v35 = vmul.f32 %v2805_v31, %v390_v33 }
 0x95f   :  { %v563_v36 = vmul.f32 %v562_v34, %v542_v60 }
 0x960   :  { %v392_v37 = vmul.f32 0.5, %v391_v35 }
 0x961   :  { %v564_v38 = vmul.f32 %v563_v36, %v3185_v58 }
 0x962   :  { %v393_v40 = vsub.f32 1.5, %v392_v37 }
 0x963   :  { %v3341_v41 = vadd.f32 %v564_v38, %v3187_v0 }
 0x964   :  { %v394_v44 = vmul.f32 %v2805_v31, %v393_v40 }
 0x965   :  { %2806 = vtanh.f32 %v3341_v41 }
 0x966   :  { %v398_v46 = vsel %vm397_vm4, %v2805_v31, %v394_v44 }
 0x967   :  { %v399_v48 = vmul.f32 %v398_v46, %v378_v1 }
 0x968   :  { %v3346_v50 = vpop.permute.xlu1 %408 }
 0x969   :  { %v405_v51 = vmul.f32 %v3344_v47, %v399_v48 }
 0x96b   :  { %v2807_v52 = vpop.eup %2806  ;;  %v3350_v53 = vadd.f32 %v3346_v50, %v405_v51 }
 0x96c   :  { %568 = vrot.lane.b32.xlu2 %v2807_v52, %s3023_s24 }
 0x96d   :  { %2808 = vtanh.f32 %v3350_v53 }
 0x973   :  { %v2809_v54 = vpop.eup %2808 }
 0x974   :  { %414 = vrot.lane.b32.xlu0 %v2809_v54, %s3023_s24 }
 0x9c6   :  { %v569_v55 = vpop.permute.xlu2 %568 }
 0x9c7   :  { %v571_v56 = vmul.f32 %v569_v55, %v3308_v29 }
 0x9c9   :  { %573 = vrot.lane.b32.xlu0 %v571_v56, %s3024_s2 }
 0x9e6   :  { %v415_v3 = vpop.permute.xlu0 %414 }
 0x9e7   :  { %v417_v8 = vmul.f32 %v415_v3, %v3312_v42 }
 0x9e9   :  { %419 = vrot.lane.b32.xlu1 %v417_v8, %s3024_s2 }
 0xa3b   :  { %v574_v57 = vpop.permute.xlu0 %573 }
 0xa3c   :  { %v576_v59 = vsel %vm537_vm11, %v574_v57, 0.0 }
 0xa3d   :  { %577 = vadd.xlane.f32.xlu0 %v576_v59 }
 0xa5b   :  { %v420_v60 = vpop.permute.xlu1 %419 }
 0xa5c   :  { %v422_v62 = vsel %vm206_vm5, %v420_v60, 0.0 }
 0xa5d   :  { %423 = vadd.xlane.f32.xlu1 %v422_v62 }
 0xa76   :  { %450 = vrot.lane.b32.xlu1 %v2771_v63, %s3025_s25 }
 0xa7e   :  { %460 = vrot.lane.b32.xlu1 %v3224_v27, %s3023_s24 }
 0xab0   :  { %v578_v29 = vpop.xlane.xlu0 %577 }
 0xab1   :  { %v579_v42 = vmul.f32 %v578_v29, %v3171_v43 }
 0xab3   :  { %v580_v1 = vsub.f32 %v571_v56, %v579_v42  ;;  %v54_v42 = vld [vmem:[%s4089_s17 + $0x8] sm:$0xff] }
 0xab4   :  { %2717 = vmatmul.msk.f32.gmra.mxu1 %vm65_vm0, %v54_v42  ;;  %2715 = vmatmul.msk.f32.gmra.mxu0 %vm65_vm0, %v54_v42 }
 0xab5   :  { %v581_v11 = vmul.f32 %v580_v1, %v580_v1 }
 0xab7   :  { %583 = vrot.lane.b32.xlu2 %v581_v11, %s3024_s2 }
 0xad0   :  { %v424_v12 = vpop.xlane.xlu1 %423 }
 0xad1   :  { %v425_v13 = vmul.f32 %v424_v12, %v3171_v43 }
 0xad3   :  { %v426_v14 = vsub.f32 %v417_v8, %v425_v13 }
 0xad5   :  { %v427_v15 = vmul.f32 %v426_v14, %v426_v14 }
 0xad7   :  { %429 = vrot.lane.b32.xlu2 %v427_v15, %s3024_s2 }
 0xae8   :  { %v3391_v55 = vpop.permute.xlu1 %450 }
 0xaf0   :  { %v461_v63 = vpop.permute.xlu1 %460 }
 0xb11   :  { %v584_v16 = vpop.permute.xlu2 %583 }
 0xb12   :  { %v586_v17 = vsel %vm537_vm11, %v584_v16, 0.0 }
 0xb13   :  { %587 = vadd.xlane.f32.xlu2 %v586_v17 }
 0xb2b   :  { %605 = vrot.lane.b32.xlu2 %v3372_v18, %s3025_s25 }
 0xb31   :  { %v430_v27 = vpop.permute.xlu2 %429  ;;  %v92_v16 = vpop.f32.mrf.mxu0 }
 0xb32   :  { %v432_v19 = vsel %vm206_vm5, %v430_v27, 0.0  ;;  %v93_v17 = vadd.f32 %v92_v16, %v61_v10 }
 0xb33   :  { %433 = vadd.xlane.f32.xlu0 %v432_v19 }
 0xb34   :  { %121 = vst [vmem:[#allocation2 + $0x10] sm:$0xff] %v93_v17 }
 0xb47   :  { %456 = vrot.lane.b32.xlu0 %v2772_v5, %s3025_s25 }
 0xb86   :  { %v588_v20 = vpop.xlane.xlu2 %587 }
 0xb87   :  { %v589_v21 = vmul.f32 %v588_v20, %v3171_v43 }
 0xb89   :  { %v590_v22 = vadd.f32 1e-05, %v589_v21 }
 0xb8b   :  { %2810 = vrsqrt.f32 %v590_v22  ;;  %vm597_vm7 = vweird.f32 %v590_v22 }
 0xb8e   :  { %v606_v36 = vpop.permute.xlu2 %605 }
 0xb91   :  { %v2811_v23 = vpop.eup %2810 }
 0xb92   :  { %v592_v25 = vmul.f32 %v2811_v23, %v590_v22  ;;  %vm598_vm6 = vweird.f32 %v2811_v23 }
 0xb93   :  { %vm599_vm8 = vmor %vm597_vm7, %vm598_vm6 }
 0xb94   :  { %v593_v26 = vmul.f32 %v2811_v23, %v592_v25 }
 0xb96   :  { %v594_v28 = vmul.f32 0.5, %v593_v26 }
 0xb98   :  { %v595_v30 = vsub.f32 1.5, %v594_v28 }
 0xb9a   :  { %v596_v31 = vmul.f32 %v2811_v23, %v595_v30 }
 0xb9c   :  { %v600_v32 = vsel %vm599_vm8, %v2811_v23, %v596_v31 }
 0xb9d   :  { %v601_v33 = vmul.f32 %v600_v32, %v580_v1 }
 0xb9f   :  { %v602_v34 = vmul.f32 %v601_v33, %v3259_v45 }
 0xba1   :  { %v603_v35 = vadd.f32 %v602_v34, %v3257_v39 }
 0xba3   :  { %v3384_v37 = vadd.f32 %v606_v36, %v603_v35 }
 0xba5   :  { %610 = vrot.lane.b32.xlu0 %v3384_v37, %s3024_s2  ;;  %v761_v46 = vrot.slane %v3384_v37, 2 }
 0xba6   :  { %v434_v38 = vpop.xlane.xlu0 %433 }
 0xba7   :  { %v435_v40 = vmul.f32 %v434_v38, %v3171_v43 }
 0xba9   :  { %v436_v44 = vadd.f32 1e-05, %v435_v40 }
 0xbab   :  { %2812 = vrsqrt.f32 %v436_v44  ;;  %vm443_vm12 = vweird.f32 %v436_v44 }
 0xbad   :  { %762 = vrot.lane.b32.xlu0 %v761_v46, %s3024_s2 }
 0xbb1   :  { %v2813_v48 = vpop.eup %2812 }
 0xbb2   :  { %v438_v51 = vmul.f32 %v2813_v48, %v436_v44  ;;  %vm444_vm9 = vweird.f32 %v2813_v48 }
 0xbb3   :  { %vm445_vm13 = vmor %vm443_vm12, %vm444_vm9  ;;  %vm828_vm12 = vcmask 259076  }
 0xbb4   :  { %v439_v52 = vmul.f32 %v2813_v48, %v438_v51 }
 0xbb6   :  { %v440_v54 = vmul.f32 0.5, %v439_v52 }
 0xbb8   :  { %v441_v56 = vsub.f32 1.5, %v440_v54 }
 0xbb9   :  { %v3393_v59 = vpop.permute.xlu0 %456 }
 0xbba   :  { %v442_v3 = vmul.f32 %v2813_v48, %v441_v56 }
 0xbbc   :  { %v446_v8 = vsel %vm445_vm13, %v2813_v48, %v442_v3 }
 0xbbd   :  { %v447_v57 = vmul.f32 %v446_v8, %v426_v14  ;;  %v115_v14 = vpop.f32.mrf.mxu1 }
 0xbbe   :  { %v116_v15 = vadd.f32 %v115_v14, %v62_v24 }
 0xbbf   :  { %v453_v60 = vmul.f32 %v3391_v55, %v447_v57 }
 0xbc0   :  { %122 = vst.msk [vmem:[#allocation2 + $0x18] sm:$0xff] %vm119_vm10, %v116_v15 }
 0xbc1   :  { %v459_v62 = vadd.f32 %v3393_v59, %v453_v60 }
 0xbc3   :  { %v3397_v29 = vadd.f32 %v461_v63, %v459_v62  ;;  %v811_v63 = vrot.slane %v3341_v41, 6 }
 0xbc5   :  { %615 = vrot.lane.b32.xlu1 %v3397_v29, %s3023_s24 }
 0xc17   :  { %v611_v1 = vpop.permute.xlu0 %610 }
 0xc18   :  { %613 = vst.msk [vmem:[#allocation3 - $0x2] sm:$0xc] %vm537_vm11, %v611_v1 }
 0xc1f   :  { %v763_v11 = vpop.permute.xlu0 %762 }
 0xc20   :  { %2725 = vmatmul.msk.f32.vlgmr.msrb.gmra.mxu1 %vm146_vm14, %v763_v11 }
 0xc21   :  { %1637 = vmatpush.msrb.mxu1 %v3123_v2 }
 0xc23   :  { %1638 = vmatpush.msrb.mxu1 %v3132_v4 }
 0xc25   :  { %1639 = vmatpush.msrb.mxu1 %v3142_v6 }
 0xc27   :  { %1640 = vmatpush.msrb.mxu1 %v3148_v7 }
 0xc37   :  { %v616_v12 = vpop.permute.xlu1 %615 }
 0xc38   :  { %618 = vst.msk [vmem:[#allocation3] sm:$0x3] %vm310_vm15, %v616_v12 }
 0xc3f   :  { %v619_v13 = vld [vmem:[#allocation3] sm:$0x3] }
 0xc40   :  { %2723 = vmatmul.msk.f32.vlgmr.msrb.gmra.mxu0 %vm119_vm10, %v619_v13 }
 0xc41   :  { %1927 = vmatpush.msrb.mxu0 %v3123_v2  ;;  %v759_v2 = vld [vmem:[#allocation2] sm:$0x30] }
 0xc43   :  { %1928 = vmatpush.msrb.mxu0 %v3132_v4 }
 0xc45   :  { %1929 = vmatpush.msrb.mxu0 %v3142_v6 }
 0xc47   :  { %1930 = vmatpush.msrb.mxu0 %v3148_v7 }
 0xc9d   :  { %v783_v27 = vpop.f32.mrf.mxu1 }
 0xc9e   :  { %v787_v19 = vrot.slane %v783_v27, 4 }
 0xca0   :  { %v789_v5 = vadd.f32 %v787_v19, %v759_v2 }
 0xca2   :  { %2814 = vtanh.f32 %v789_v5  ;;  %v2726_v20 = vmul.f32 -1.442695, %v789_v5 }
 0xca8   :  { %v2815_v4 = vpop.eup %2814 }
 0xca9   :  { %815 = vrot.lane.b32.xlu1 %v2815_v4, %s3023_s24 }
 0xcbd   :  { %v640_v6 = vpop.f32.mrf.mxu0 }
 0xcbe   :  { %v641_v7 = vadd.f32 %v3303_v61, %v640_v6 }
 0xcc0   :  { %2816 = vtanh.f32 %v641_v7  ;;  %v2724_v23 = vmul.f32 -1.442695, %v641_v7 }
 0xcc1   :  { %2818 = vpow2.f32 %v2726_v20 }
 0xcc6   :  { %v2817_v24 = vpop.eup %2816 }
 0xcc7   :  { %665 = vrot.lane.b32.xlu0 %v2817_v24, %s3023_s24  ;;  %v2819_v9 = vpop.eup %2818 }
 0xcc8   :  { %v793_v10 = vadd.f32 1.0, %v2819_v9 }
 0xcca   :  { %2820 = vrcp.f32 %v793_v10  ;;  %v805_v30 = vand.u32 2147483648, %v793_v10  ;;  %vm799_vm2 = vweird.f32 %v793_v10  ;;  %v803_v32 = vand.u32 2147483647, %v793_v10 }
 0xccb   :  { %2822 = vpow2.f32 %v2724_v23 }
 0xccc   :  { %v806_v35 = vor.u32 1.1754944e-38, %v805_v30  ;;  %vm804_vm4 = vcmp.eq.f32.partialorder %v803_v32, 8.507059e+37 }
 0xcd0   :  { %v2821_v21 = vpop.eup %2820 }
 0xcd1   :  { %v795_v22 = vmul.f32 %v2821_v21, %v793_v10  ;;  %vm800_vm1 = vweird.f32 %v2821_v21  ;;  %v2823_v31 = vpop.eup %2822 }
 0xcd2   :  { %vm801_vm3 = vmor %vm799_vm2, %vm800_vm1  ;;  %v646_v34 = vadd.f32 1.0, %v2823_v31 }
 0xcd3   :  { %v796_v25 = vsub.f32 1.0, %v795_v22 }
 0xcd4   :  { %2824 = vrcp.f32 %v646_v34  ;;  %v658_v54 = vand.u32 2147483648, %v646_v34  ;;  %vm652_vm7 = vweird.f32 %v646_v34  ;;  %v656_v56 = vand.u32 2147483647, %v646_v34 }
 0xcd5   :  { %v797_v26 = vmul.f32 %v2821_v21, %v796_v25 }
 0xcd6   :  { %v659_v8 = vor.u32 1.1754944e-38, %v658_v54  ;;  %vm657_vm9 = vcmp.eq.f32.partialorder %v656_v56, 8.507059e+37 }
 0xcd7   :  { %v798_v28 = vadd.f32 %v2821_v21, %v797_v26 }
 0xcd9   :  { %v802_v33 = vsel %vm801_vm3, %v2821_v21, %v798_v28 }
 0xcda   :  { %v3426_v38 = vsel %vm804_vm4, %v806_v35, %v802_v33  ;;  %v2825_v44 = vpop.eup %2824 }
 0xcdb   :  { %v648_v46 = vmul.f32 %v2825_v44, %v646_v34  ;;  %vm653_vm6 = vweird.f32 %v2825_v44  ;;  %v813_v42 = vmul.f32 %v811_v63, %v3426_v38 }
 0xcdc   :  { %vm654_vm8 = vmor %vm652_vm7, %vm653_vm6 }
 0xcdd   :  { %v649_v48 = vsub.f32 1.0, %v648_v46 }
 0xcdf   :  { %v650_v51 = vmul.f32 %v2825_v44, %v649_v48 }
 0xce1   :  { %v651_v52 = vadd.f32 %v2825_v44, %v650_v51 }
 0xce3   :  { %v655_v3 = vsel %vm654_vm8, %v2825_v44, %v651_v52 }
 0xce4   :  { %v3430_v57 = vsel %vm657_vm9, %v659_v8, %v655_v3 }
 0xce5   :  { %v663_v12 = vmul.f32 %v3430_v57, %v3350_v53 }
 0xd1b   :  { %v816_v36 = vpop.permute.xlu1 %815 }
 0xd1c   :  { %v818_v40 = vmul.f32 %v816_v36, %v3426_v38 }
 0xd1e   :  { %820 = vrot.lane.b32.xlu2 %v818_v40, %s3024_s2 }
 0xd39   :  { %v666_v60 = vpop.permute.xlu0 %665 }
 0xd3a   :  { %v668_v62 = vmul.f32 %v666_v60, %v3430_v57 }
 0xd3c   :  { %670 = vrot.lane.b32.xlu1 %v668_v62, %s3024_s2 }
 0xd78   :  { %v821_v1 = vpop.permute.xlu2 %820 }
 0xd79   :  { %v823_v11 = vadd.f32 %v821_v1, %v813_v42 }
 0xd7b   :  { %825 = vrot.lane.b32.xlu0 %v823_v11, %s3025_s25 }
 0xdae   :  { %v671_v13 = vpop.permute.xlu1 %670 }
 0xdaf   :  { %v673_v14 = vadd.f32 %v671_v13, %v663_v12 }
 0xdb1   :  { %675 = vrot.lane.b32.xlu2 %v673_v14, %s3025_s25 }
 0xded   :  { %v826_v15 = vpop.permute.xlu0 %825 }
 0xdee   :  { %v829_v16 = vsel %vm828_vm12, %v826_v15, 0.0 }
 0xdef   :  { %830 = vadd.xlane.f32.xlu1 %v829_v16 }
 0xe0b   :  { %v676_v17 = vpop.permute.xlu2 %675 }
 0xe0c   :  { %v678_v41 = vsel %vm206_vm5, %v676_v17, 0.0 }
 0xe0d   :  { %679 = vadd.xlane.f32.xlu0 %v678_v41 }
 0xe62   :  { %v831_v27 = vpop.xlane.xlu1 %830 }
 0xe63   :  { %v832_v19 = vmul.f32 %v831_v27, %v3171_v43  ;;  %v3468_v27 = vld [vmem:[#allocation2 + $0x8] sm:$0x30] }
 0xe65   :  { %v833_v2 = vsub.f32 %v823_v11, %v832_v19 }
 0xe67   :  { %v834_v5 = vmul.f32 %v833_v2, %v833_v2 }
 0xe69   :  { %836 = vrot.lane.b32.xlu2 %v834_v5, %s3025_s25 }
 0xe80   :  { %v680_v53 = vpop.xlane.xlu0 %679 }
 0xe81   :  { %v681_v4 = vmul.f32 %v680_v53, %v3171_v43 }
 0xe83   :  { %v682_v6 = vsub.f32 %v673_v14, %v681_v4 }
 0xe85   :  { %v683_v7 = vmul.f32 %v682_v6, %v682_v6 }
 0xe87   :  { %685 = vrot.lane.b32.xlu2 %v683_v7, %s3025_s25 }
 0xec3   :  { %v837_v24 = vpop.permute.xlu2 %836 }
 0xec4   :  { %v839_v20 = vsel %vm828_vm12, %v837_v24, 0.0 }
 0xec5   :  { %840 = vadd.xlane.f32.xlu2 %v839_v20 }
 0xee1   :  { %v686_v9 = vpop.permute.xlu2 %685 }
 0xee2   :  { %v688_v10 = vsel %vm206_vm5, %v686_v9, 0.0 }
 0xee3   :  { %689 = vadd.xlane.f32.xlu1 %v688_v10  ;;  %v744_v10 = vrot.slane %v3372_v18, 2 }
 0xf38   :  { %v841_v21 = vpop.xlane.xlu2 %840 }
 0xf39   :  { %v842_v22 = vmul.f32 %v841_v21, %v3171_v43 }
 0xf3b   :  { %v843_v23 = vadd.f32 1e-05, %v842_v22 }
 0xf3d   :  { %2826 = vrsqrt.f32 %v843_v23  ;;  %vm850_vm1 = vweird.f32 %v843_v23 }
 0xf43   :  { %v2827_v25 = vpop.eup %2826 }
 0xf44   :  { %v845_v26 = vmul.f32 %v2827_v25, %v843_v23  ;;  %vm851_vm13 = vweird.f32 %v2827_v25 }
 0xf45   :  { %vm852_vm2 = vmor %vm850_vm1, %vm851_vm13 }
 0xf46   :  { %v846_v28 = vmul.f32 %v2827_v25, %v845_v26 }
 0xf48   :  { %v847_v30 = vmul.f32 0.5, %v846_v28 }
 0xf4a   :  { %v848_v31 = vsub.f32 1.5, %v847_v30 }
 0xf4c   :  { %v849_v32 = vmul.f32 %v2827_v25, %v848_v31 }
 0xf4e   :  { %v853_v33 = vsel %vm852_vm2, %v2827_v25, %v849_v32 }
 0xf4f   :  { %v854_v34 = vmul.f32 %v853_v33, %v833_v2 }
 0xf51   :  { %v855_v35 = vmul.f32 %v854_v34, %v3185_v58 }
 0xf53   :  { %v3451_v36 = vadd.f32 %v855_v35, %v3187_v0 }
 0xf55   :  { %2828 = vtanh.f32 %v3451_v36 }
 0xf56   :  { %v690_v40 = vpop.xlane.xlu1 %689 }
 0xf57   :  { %v691_v44 = vmul.f32 %v690_v40, %v3171_v43 }
 0xf59   :  { %v692_v46 = vadd.f32 1e-05, %v691_v44 }
 0xf5b   :  { %v2829_v48 = vpop.eup %2828  ;;  %2830 = vrsqrt.f32 %v692_v46  ;;  %vm699_vm4 = vweird.f32 %v692_v46 }
 0xf5c   :  { %859 = vrot.lane.b32.xlu0 %v2829_v48, %s3023_s24 }
 0xf61   :  { %v2831_v51 = vpop.eup %2830 }
 0xf62   :  { %v694_v52 = vmul.f32 %v2831_v51, %v692_v46  ;;  %vm700_vm3 = vweird.f32 %v2831_v51 }
 0xf63   :  { %vm701_vm6 = vmor %vm699_vm4, %vm700_vm3 }
 0xf64   :  { %v695_v54 = vmul.f32 %v2831_v51, %v694_v52 }
 0xf66   :  { %v696_v56 = vmul.f32 0.5, %v695_v54 }
 0xf68   :  { %v697_v3 = vsub.f32 1.5, %v696_v56 }
 0xf6a   :  { %v698_v8 = vmul.f32 %v2831_v51, %v697_v3 }
 0xf6c   :  { %v702_v60 = vsel %vm701_vm6, %v2831_v51, %v698_v8 }
 0xf6d   :  { %v703_v62 = vmul.f32 %v702_v60, %v682_v6 }
 0xf6f   :  { %v704_v63 = vmul.f32 %v703_v62, %v3344_v47 }
 0xf71   :  { %v3458_v42 = vadd.f32 %v704_v63, %v3346_v50 }
 0xf73   :  { %2832 = vtanh.f32 %v3458_v42 }
 0xf79   :  { %v2833_v1 = vpop.eup %2832 }
 0xf7a   :  { %708 = vrot.lane.b32.xlu1 %v2833_v1, %s3023_s24 }
 0xfce   :  { %v860_v11 = vpop.permute.xlu0 %859 }
 0xfcf   :  { %v862_v12 = vmul.f32 %v860_v11, %v3426_v38 }
 0xfd1   :  { %864 = vrot.lane.b32.xlu2 %v862_v12, %s3024_s2 }
 0xfec   :  { %v709_v13 = vpop.permute.xlu1 %708 }
 0xfed   :  { %v711_v14 = vmul.f32 %v709_v13, %v3430_v57 }
 0xfef   :  { %713 = vrot.lane.b32.xlu0 %v711_v14, %s3024_s2 }
0x102b   :  { %v865_v15 = vpop.permute.xlu2 %864 }
0x102c   :  { %v867_v16 = vsel %vm828_vm12, %v865_v15, 0.0 }
0x102d   :  { %868 = vadd.xlane.f32.xlu0 %v867_v16 }
0x1061   :  { %v714_v17 = vpop.permute.xlu0 %713 }
0x1062   :  { %v716_v41 = vsel %vm206_vm5, %v714_v17, 0.0  ;;  %v2982_v17 = vld [vmem:[%s4073_s3 + $0x18] sm:$0xff] }
0x1063   :  { %717 = vadd.xlane.f32.xlu1 %v716_v41  ;;  %v2983_v41 = vld [vmem:[%s4073_s3 + $0x10] sm:$0xff] }
0x107c   :  { %896 = vrot.lane.b32.xlu1 %v3468_v27, %s3025_s25 }
0x10a0   :  { %v869_v38 = vpop.xlane.xlu0 %868 }
0x10a1   :  { %v870_v19 = vmul.f32 %v869_v38, %v3171_v43  ;;  %v2984_v38 = vld [vmem:[%s4073_s3 + $0x8] sm:$0xff] }
0x10a3   :  { %v871_v2 = vsub.f32 %v862_v12, %v870_v19  ;;  %v2985_v19 = vld [vmem:[%s4073_s3] sm:$0xff] }
0x10a5   :  { %v872_v57 = vmul.f32 %v871_v2, %v871_v2 }
0x10a7   :  { %874 = vrot.lane.b32.xlu2 %v872_v57, %s3024_s2 }
0x10d6   :  { %v718_v5 = vpop.xlane.xlu1 %717 }
0x10d7   :  { %v719_v53 = vmul.f32 %v718_v5, %v3171_v43 }
0x10d9   :  { %v720_v4 = vsub.f32 %v711_v14, %v719_v53 }
0x10db   :  { %v721_v6 = vmul.f32 %v720_v4, %v720_v4 }
0x10dd   :  { %723 = vrot.lane.b32.xlu2 %v721_v6, %s3024_s2 }
0x10ee   :  { %v897_v40 = vpop.permute.xlu1 %896 }
0x1101   :  { %v875_v7 = vpop.permute.xlu2 %874 }
0x1102   :  { %v877_v24 = vsel %vm828_vm12, %v875_v7, 0.0 }
0x1106   :  { %878 = vadd.xlane.f32.xlu2 %v877_v24 }
0x1137   :  { %v724_v20 = vpop.permute.xlu2 %723 }
0x1138   :  { %v726_v9 = vsel %vm206_vm5, %v724_v20, 0.0 }
0x1139   :  { %727 = vadd.xlane.f32.xlu0 %v726_v9 }
0x114d   :  { %745 = vrot.lane.b32.xlu0 %v744_v10, %s3023_s24 }
0x1179   :  { %v879_v21 = vpop.xlane.xlu2 %878 }
0x117a   :  { %v880_v22 = vmul.f32 %v879_v21, %v3171_v43 }
0x117c   :  { %v881_v23 = vadd.f32 1e-05, %v880_v22 }
0x117e   :  { %2834 = vrsqrt.f32 %v881_v23  ;;  %vm888_vm8 = vweird.f32 %v881_v23 }
0x1184   :  { %v2835_v25 = vpop.eup %2834 }
0x1185   :  { %v883_v26 = vmul.f32 %v2835_v25, %v881_v23  ;;  %vm889_vm7 = vweird.f32 %v2835_v25 }
0x1186   :  { %vm890_vm9 = vmor %vm888_vm8, %vm889_vm7 }
0x1187   :  { %v884_v28 = vmul.f32 %v2835_v25, %v883_v26 }
0x1189   :  { %v885_v30 = vmul.f32 0.5, %v884_v28 }
0x118b   :  { %v886_v31 = vsub.f32 1.5, %v885_v30 }
0x118d   :  { %v887_v32 = vmul.f32 %v2835_v25, %v886_v31 }
0x118f   :  { %v891_v33 = vsel %vm890_vm9, %v2835_v25, %v887_v32 }
0x1190   :  { %v892_v34 = vmul.f32 %v891_v33, %v871_v2 }
0x1192   :  { %v893_v18 = vmul.f32 %v892_v34, %v3259_v45 }
0x1194   :  { %v894_v35 = vadd.f32 %v893_v18, %v3257_v39 }
0x1196   :  { %v3483_v44 = vadd.f32 %v897_v40, %v894_v35 }
0x1198   :  { %901 = vrot.lane.b32.xlu2 %v3483_v44, %s3024_s2  ;;  %v1051_v46 = vrot.slane %v3483_v44, 4 }
0x119a   :  { %1052 = vrot.lane.b32.xlu1 %v1051_v46, %s3024_s2 }
0x11ac   :  { %v728_v48 = vpop.xlane.xlu0 %727 }
0x11ad   :  { %v729_v51 = vmul.f32 %v728_v48, %v3171_v43 }
0x11af   :  { %v730_v52 = vadd.f32 1e-05, %v729_v51 }
0x11b1   :  { %2836 = vrsqrt.f32 %v730_v52  ;;  %vm737_vm1 = vweird.f32 %v730_v52 }
0x11b7   :  { %v2837_v54 = vpop.eup %2836 }
0x11b8   :  { %v732_v56 = vmul.f32 %v2837_v54, %v730_v52  ;;  %vm738_vm13 = vweird.f32 %v2837_v54 }
0x11b9   :  { %vm739_vm2 = vmor %vm737_vm1, %vm738_vm13 }
0x11ba   :  { %v733_v3 = vmul.f32 %v2837_v54, %v732_v56 }
0x11bc   :  { %v734_v8 = vmul.f32 0.5, %v733_v3 }
0x11be   :  { %v735_v60 = vsub.f32 1.5, %v734_v8 }
0x11bf   :  { %v746_v13 = vpop.permute.xlu0 %745 }
0x11c0   :  { %v736_v62 = vmul.f32 %v2837_v54, %v735_v60 }
0x11c2   :  { %v740_v63 = vsel %vm739_vm2, %v2837_v54, %v736_v62  ;;  %vm1118_vm2 = vcmask 261126  }
0x11c3   :  { %v741_v1 = vmul.f32 %v740_v63, %v720_v4  ;;  %v1049_v4 = vld [vmem:[#allocation2] sm:$0xc0] }
0x11c5   :  { %v742_v11 = vmul.f32 %v741_v1, %v3391_v55 }
0x11c7   :  { %v743_v12 = vadd.f32 %v742_v11, %v3393_v59 }
0x11c9   :  { %v3492_v14 = vadd.f32 %v746_v13, %v743_v12  ;;  %v1101_v13 = vrot.slane %v3451_v36, 6 }
0x11cb   :  { %905 = vrot.lane.b32.xlu0 %v3492_v14, %s3023_s24 }
0x11f2   :  { %v902_v15 = vpop.permute.xlu2 %901 }
0x11f3   :  { %904 = vst.msk [vmem:[#allocation3 - $0x4] sm:$0x30] %vm828_vm12, %v902_v15 }
0x120c   :  { %v1053_v16 = vpop.permute.xlu1 %1052 }
0x120d   :  { %2729 = vmatmul.msk.f32.vlgmr.msrb.gmra.mxu3 %vm146_vm14, %v1053_v16 }
0x120e   :  { %2216 = vmatpush.msrb.mxu3 %v2982_v17 }
0x1210   :  { %2217 = vmatpush.msrb.mxu3 %v2983_v41 }
0x1212   :  { %2218 = vmatpush.msrb.mxu3 %v2984_v38 }
0x1214   :  { %2219 = vmatpush.msrb.mxu3 %v2985_v19 }
0x123d   :  { %v906_v2 = vpop.permute.xlu0 %905 }
0x123e   :  { %908 = vst.msk [vmem:[#allocation3] sm:$0x3] %vm310_vm15, %v906_v2 }
0x1245   :  { %v909_v57 = vld [vmem:[#allocation3] sm:$0x3] }
0x1246   :  { %2727 = vmatmul.msk.f32.vlgmr.msra.gmra.mxu2 %vm119_vm10, %v909_v57 }
0x1290   :  { %v1073_v5 = vpop.f32.mrf.mxu3 }
0x1291   :  { %v1077_v53 = vrot.slane %v1073_v5, 2 }
0x1293   :  { %v1079_v6 = vadd.f32 %v1077_v53, %v1049_v4 }
0x1295   :  { %2838 = vtanh.f32 %v1079_v6  ;;  %v2730_v10 = vmul.f32 -1.442695, %v1079_v6 }
0x129b   :  { %v2839_v7 = vpop.eup %2838 }
0x129c   :  { %1105 = vrot.lane.b32.xlu0 %v2839_v7, %s3023_s24 }
0x12c9   :  { %v930_v24 = vpop.f32.mrf.mxu2 }
0x12ca   :  { %v931_v20 = vadd.f32 %v3303_v61, %v930_v24 }
0x12cc   :  { %2840 = vtanh.f32 %v931_v20  ;;  %v2728_v40 = vmul.f32 -1.442695, %v931_v20 }
0x12cd   :  { %2842 = vpow2.f32 %v2730_v10 }
0x12d2   :  { %v2841_v9 = vpop.eup %2840 }
0x12d3   :  { %955 = vrot.lane.b32.xlu1 %v2841_v9, %s3023_s24  ;;  %v2843_v21 = vpop.eup %2842 }
0x12d4   :  { %v1083_v22 = vadd.f32 1.0, %v2843_v21 }
0x12d6   :  { %2844 = vrcp.f32 %v1083_v22  ;;  %v1095_v31 = vand.u32 2147483648, %v1083_v22  ;;  %vm1089_vm4 = vweird.f32 %v1083_v22  ;;  %v1093_v32 = vand.u32 2147483647, %v1083_v22 }
0x12d7   :  { %2846 = vpow2.f32 %v2728_v40 }
0x12d8   :  { %v1096_v33 = vor.u32 1.1754944e-38, %v1095_v31  ;;  %vm1094_vm7 = vcmp.eq.f32.partialorder %v1093_v32, 8.507059e+37 }
0x12dc   :  { %v2845_v23 = vpop.eup %2844 }
0x12dd   :  { %v1085_v25 = vmul.f32 %v2845_v23, %v1083_v22  ;;  %vm1090_vm3 = vweird.f32 %v2845_v23  ;;  %v2847_v46 = vpop.eup %2846 }
0x12de   :  { %vm1091_vm6 = vmor %vm1089_vm4, %vm1090_vm3  ;;  %v936_v48 = vadd.f32 1.0, %v2847_v46 }
0x12df   :  { %v1086_v26 = vsub.f32 1.0, %v1085_v25 }
0x12e0   :  { %2848 = vrcp.f32 %v936_v48  ;;  %v948_v8 = vand.u32 2147483648, %v936_v48  ;;  %vm942_vm9 = vweird.f32 %v936_v48  ;;  %v946_v60 = vand.u32 2147483647, %v936_v48 }
0x12e1   :  { %v1087_v28 = vmul.f32 %v2845_v23, %v1086_v26 }
0x12e2   :  { %v949_v63 = vor.u32 1.1754944e-38, %v948_v8  ;;  %vm947_vm1 = vcmp.eq.f32.partialorder %v946_v60, 8.507059e+37 }
0x12e3   :  { %v1088_v30 = vadd.f32 %v2845_v23, %v1087_v28 }
0x12e5   :  { %v1092_v61 = vsel %vm1091_vm6, %v2845_v23, %v1088_v30 }
0x12e6   :  { %v3515_v18 = vsel %vm1094_vm7, %v1096_v33, %v1092_v61  ;;  %v2849_v51 = vpop.eup %2848 }
0x12e7   :  { %v938_v52 = vmul.f32 %v2849_v51, %v936_v48  ;;  %vm943_vm8 = vweird.f32 %v2849_v51  ;;  %v1103_v15 = vmul.f32 %v1101_v13, %v3515_v18 }
0x12e8   :  { %vm944_vm13 = vmor %vm942_vm9, %vm943_vm8 }
0x12e9   :  { %v939_v54 = vsub.f32 1.0, %v938_v52 }
0x12eb   :  { %v940_v56 = vmul.f32 %v2849_v51, %v939_v54 }
0x12ed   :  { %v941_v3 = vadd.f32 %v2849_v51, %v940_v56 }
0x12ef   :  { %v945_v62 = vsel %vm944_vm13, %v2849_v51, %v941_v3 }
0x12f0   :  { %v3519_v1 = vsel %vm947_vm1, %v949_v63, %v945_v62 }
0x12f1   :  { %v953_v41 = vmul.f32 %v3519_v1, %v3458_v42 }
0x130e   :  { %v1106_v34 = vpop.permute.xlu0 %1105 }
0x130f   :  { %v1108_v35 = vmul.f32 %v1106_v34, %v3515_v18 }
0x1311   :  { %1110 = vrot.lane.b32.xlu0 %v1108_v35, %s3024_s2 }
0x1345   :  { %v956_v11 = vpop.permute.xlu1 %955 }
0x1346   :  { %v958_v12 = vmul.f32 %v956_v11, %v3519_v1 }
0x1348   :  { %960 = vrot.lane.b32.xlu1 %v958_v12, %s3024_s2 }
0x1383   :  { %v1111_v16 = vpop.permute.xlu0 %1110 }
0x1384   :  { %v1113_v17 = vadd.f32 %v1111_v16, %v1103_v15 }
0x1386   :  { %1115 = vrot.lane.b32.xlu2 %v1113_v17, %s3025_s25 }
0x13ba   :  { %v961_v38 = vpop.permute.xlu1 %960 }
0x13bb   :  { %v963_v19 = vadd.f32 %v961_v38, %v953_v41 }
0x13bd   :  { %965 = vrot.lane.b32.xlu0 %v963_v19, %s3025_s25 }
0x13e0   :  { %v1116_v2 = vpop.permute.xlu2 %1115 }
0x13e1   :  { %v1119_v57 = vsel %vm1118_vm2, %v1116_v2, 0.0 }
0x13e2   :  { %1120 = vadd.xlane.f32.xlu1 %v1119_v57 }
0x142f   :  { %v966_v5 = vpop.permute.xlu0 %965 }
0x1430   :  { %v968_v36 = vsel %vm206_vm5, %v966_v5, 0.0 }
0x1431   :  { %969 = vadd.xlane.f32.xlu2 %v968_v36 }
0x1455   :  { %v1121_v53 = vpop.xlane.xlu1 %1120 }
0x1456   :  { %v1122_v4 = vmul.f32 %v1121_v53, %v3171_v43 }
0x1458   :  { %v1123_v6 = vsub.f32 %v1113_v17, %v1122_v4  ;;  %v3557_v4 = vld [vmem:[#allocation2 + $0x8] sm:$0xc0] }
0x145a   :  { %v1124_v7 = vmul.f32 %v1123_v6, %v1123_v6 }
0x145c   :  { %1126 = vrot.lane.b32.xlu0 %v1124_v7, %s3025_s25 }
0x14a4   :  { %v970_v42 = vpop.xlane.xlu2 %969 }
0x14a5   :  { %v971_v24 = vmul.f32 %v970_v42, %v3171_v43 }
0x14a7   :  { %v972_v20 = vsub.f32 %v963_v19, %v971_v24 }
0x14a9   :  { %v973_v9 = vmul.f32 %v972_v20, %v972_v20 }
0x14ab   :  { %975 = vrot.lane.b32.xlu0 %v973_v9, %s3025_s25 }
0x14ce   :  { %v1127_v10 = vpop.permute.xlu0 %1126 }
0x14cf   :  { %v1129_v21 = vsel %vm1118_vm2, %v1127_v10, 0.0 }
0x14d5   :  { %1130 = vadd.xlane.f32.xlu0 %v1129_v21 }
0x151d   :  { %v976_v22 = vpop.permute.xlu0 %975 }
0x151e   :  { %v978_v23 = vsel %vm206_vm5, %v976_v22, 0.0 }
0x151f   :  { %979 = vadd.xlane.f32.xlu1 %v978_v23 }
0x1548   :  { %v1131_v25 = vpop.xlane.xlu0 %1130 }
0x1549   :  { %v1132_v26 = vmul.f32 %v1131_v25, %v3171_v43  ;;  %v1034_v25 = vrot.slane %v3468_v27, 4 }
0x154b   :  { %v1133_v28 = vadd.f32 1e-05, %v1132_v26 }
0x154d   :  { %2850 = vrsqrt.f32 %v1133_v28  ;;  %vm1140_vm4 = vweird.f32 %v1133_v28 }
0x1553   :  { %v2851_v30 = vpop.eup %2850 }
0x1554   :  { %v1135_v31 = vmul.f32 %v2851_v30, %v1133_v28  ;;  %vm1141_vm3 = vweird.f32 %v2851_v30 }
0x1555   :  { %vm1142_vm6 = vmor %vm1140_vm4, %vm1141_vm3 }
0x1556   :  { %v1136_v32 = vmul.f32 %v2851_v30, %v1135_v31 }
0x1558   :  { %v1137_v61 = vmul.f32 0.5, %v1136_v32 }
0x155a   :  { %v1138_v33 = vsub.f32 1.5, %v1137_v61 }
0x155c   :  { %v1139_v34 = vmul.f32 %v2851_v30, %v1138_v33 }
0x155e   :  { %v1143_v35 = vsel %vm1142_vm6, %v2851_v30, %v1139_v34 }
0x155f   :  { %v1144_v40 = vmul.f32 %v1143_v35, %v1123_v6 }
0x1561   :  { %v1145_v46 = vmul.f32 %v1144_v40, %v3185_v58 }
0x1563   :  { %v3540_v48 = vadd.f32 %v1145_v46, %v3187_v0 }
0x1565   :  { %2852 = vtanh.f32 %v3540_v48 }
0x156b   :  { %v2853_v51 = vpop.eup %2852 }
0x156c   :  { %1149 = vrot.lane.b32.xlu2 %v2853_v51, %s3023_s24 }
0x1592   :  { %v980_v52 = vpop.xlane.xlu1 %979 }
0x1593   :  { %v981_v54 = vmul.f32 %v980_v52, %v3171_v43 }
0x1595   :  { %v982_v56 = vadd.f32 1e-05, %v981_v54 }
0x1597   :  { %2854 = vrsqrt.f32 %v982_v56  ;;  %vm989_vm8 = vweird.f32 %v982_v56 }
0x159d   :  { %v2855_v3 = vpop.eup %2854 }
0x159e   :  { %v984_v8 = vmul.f32 %v2855_v3, %v982_v56  ;;  %vm990_vm7 = vweird.f32 %v2855_v3 }
0x159f   :  { %vm991_vm9 = vmor %vm989_vm8, %vm990_vm7 }
0x15a0   :  { %v985_v60 = vmul.f32 %v2855_v3, %v984_v8 }
0x15a2   :  { %v986_v62 = vmul.f32 0.5, %v985_v60 }
0x15a4   :  { %v987_v63 = vsub.f32 1.5, %v986_v62 }
0x15a6   :  { %v988_v11 = vmul.f32 %v2855_v3, %v987_v63 }
0x15a8   :  { %v992_v12 = vsel %vm991_vm9, %v2855_v3, %v988_v11 }
0x15a9   :  { %v993_v13 = vmul.f32 %v992_v12, %v972_v20 }
0x15ab   :  { %v994_v15 = vmul.f32 %v993_v13, %v3344_v47 }
0x15ad   :  { %v3547_v16 = vadd.f32 %v994_v15, %v3346_v50 }
0x15af   :  { %2856 = vtanh.f32 %v3547_v16 }
0x15b5   :  { %v2857_v17 = vpop.eup %2856 }
0x15b6   :  { %998 = vrot.lane.b32.xlu1 %v2857_v17, %s3023_s24 }
0x15c6   :  { %v1150_v41 = vpop.permute.xlu2 %1149 }
0x15c7   :  { %v1152_v38 = vmul.f32 %v1150_v41, %v3515_v18 }
0x15c9   :  { %1154 = vrot.lane.b32.xlu0 %v1152_v38, %s3024_s2 }
0x1628   :  { %v999_v19 = vpop.permute.xlu1 %998 }
0x1629   :  { %v1001_v2 = vmul.f32 %v999_v19, %v3519_v1 }
0x162b   :  { %1003 = vrot.lane.b32.xlu2 %v1001_v2, %s3024_s2 }
0x163b   :  { %v1155_v57 = vpop.permute.xlu0 %1154 }
0x163c   :  { %v1157_v5 = vsel %vm1118_vm2, %v1155_v57, 0.0 }
0x163d   :  { %1158 = vadd.xlane.f32.xlu1 %v1157_v5 }
0x1685   :  { %v1004_v36 = vpop.permute.xlu2 %1003 }
0x1686   :  { %v1006_v53 = vsel %vm206_vm5, %v1004_v36, 0.0 }
0x1687   :  { %1007 = vadd.xlane.f32.xlu2 %v1006_v53  ;;  %v2986_v53 = vld [vmem:[%s4074_s4 + $0x38] sm:$0xff] }
0x169f   :  { %1186 = vrot.lane.b32.xlu2 %v3557_v4, %s3025_s25 }
0x16b0   :  { %v1159_v18 = vpop.xlane.xlu1 %1158 }
0x16b1   :  { %v1160_v6 = vmul.f32 %v1159_v18, %v3171_v43  ;;  %v2987_v18 = vld [vmem:[%s4074_s4 + $0x30] sm:$0xff] }
0x16b3   :  { %v1161_v7 = vsub.f32 %v1152_v38, %v1160_v6  ;;  %v2988_v6 = vld [vmem:[%s4074_s4 + $0x28] sm:$0xff] }
0x16b5   :  { %v1162_v1 = vmul.f32 %v1161_v7, %v1161_v7 }
0x16b7   :  { %1164 = vrot.lane.b32.xlu0 %v1162_v1, %s3024_s2  ;;  %v2990_v1 = vld [vmem:[%s4074_s4 + $0x18] sm:$0xff] }
0x16fa   :  { %v1008_v42 = vpop.xlane.xlu2 %1007 }
0x16fb   :  { %v1009_v24 = vmul.f32 %v1008_v42, %v3171_v43  ;;  %v2991_v42 = vld [vmem:[%s4074_s4 + $0x10] sm:$0xff] }
0x16fd   :  { %v1010_v20 = vsub.f32 %v1001_v2, %v1009_v24  ;;  %v2992_v24 = vld [vmem:[%s4074_s4 + $0x8] sm:$0xff] }
0x16ff   :  { %v1011_v9 = vmul.f32 %v1010_v20, %v1010_v20 }
0x1701   :  { %1013 = vrot.lane.b32.xlu0 %v1011_v9, %s3024_s2 }
0x1702   :  { %v1187_v52 = vpop.permute.xlu2 %1186 }
0x1729   :  { %v1165_v10 = vpop.permute.xlu0 %1164 }
0x172a   :  { %v1167_v21 = vsel %vm1118_vm2, %v1165_v10, 0.0 }
0x172b   :  { %1168 = vadd.xlane.f32.xlu0 %v1167_v21  ;;  %v1339_v21 = vld [vmem:[#allocation2 + $0x10] sm:$0x3] }
0x1773   :  { %v1014_v22 = vpop.permute.xlu0 %1013 }
0x1774   :  { %v1016_v23 = vsel %vm206_vm5, %v1014_v22, 0.0 }
0x1775   :  { %1017 = vadd.xlane.f32.xlu1 %v1016_v23 }
0x178e   :  { %1035 = vrot.lane.b32.xlu1 %v1034_v25, %s3023_s24 }
0x179e   :  { %v1169_v26 = vpop.xlane.xlu0 %1168 }
0x179f   :  { %v1170_v28 = vmul.f32 %v1169_v26, %v3171_v43 }
0x17a1   :  { %v1171_v30 = vadd.f32 1e-05, %v1170_v28 }
0x17a3   :  { %2858 = vrsqrt.f32 %v1171_v30  ;;  %vm1178_vm1 = vweird.f32 %v1171_v30 }
0x17a9   :  { %v2859_v31 = vpop.eup %2858 }
0x17aa   :  { %v1173_v32 = vmul.f32 %v2859_v31, %v1171_v30  ;;  %vm1179_vm13 = vweird.f32 %v2859_v31  ;;  %v3617_v30 = vld [vmem:[%s4075_s5] ss:$0 sm:$0xff] }
0x17ab   :  { %vm1180_vm3 = vmor %vm1178_vm1, %vm1179_vm13 }
0x17ac   :  { %v1174_v61 = vmul.f32 %v2859_v31, %v1173_v32 }
0x17ae   :  { %v1175_v33 = vmul.f32 0.5, %v1174_v61 }
0x17b0   :  { %v1176_v34 = vsub.f32 1.5, %v1175_v33 }
0x17b2   :  { %v1177_v35 = vmul.f32 %v2859_v31, %v1176_v34 }
0x17b4   :  { %v1181_v40 = vsel %vm1180_vm3, %v2859_v31, %v1177_v35 }
0x17b5   :  { %v1182_v46 = vmul.f32 %v1181_v40, %v1161_v7  ;;  %v2989_v7 = vld [vmem:[%s4074_s4 + $0x20] sm:$0xff] }
0x17b7   :  { %v1183_v27 = vmul.f32 %v1182_v46, %v3259_v45 }
0x17b9   :  { %v1184_v51 = vadd.f32 %v1183_v27, %v3257_v39 }
0x17bb   :  { %v3572_v54 = vadd.f32 %v1187_v52, %v1184_v51 }
0x17bd   :  { %1191 = vrot.lane.b32.xlu0 %v3572_v54, %s3024_s2  ;;  %v1341_v56 = vrot.slane %v3572_v54, 6 }
0x17bf   :  { %1342 = vrot.lane.b32.xlu1 %v1341_v56, %s3024_s2 }
0x17e8   :  { %v1018_v3 = vpop.xlane.xlu1 %1017 }
0x17e9   :  { %v1019_v8 = vmul.f32 %v1018_v3, %v3171_v43 }
0x17eb   :  { %v1020_v60 = vadd.f32 1e-05, %v1019_v8 }
0x17ed   :  { %2860 = vrsqrt.f32 %v1020_v60  ;;  %vm1027_vm6 = vweird.f32 %v1020_v60 }
0x17f3   :  { %v2861_v62 = vpop.eup %2860 }
0x17f4   :  { %v1022_v63 = vmul.f32 %v2861_v62, %v1020_v60  ;;  %vm1028_vm4 = vweird.f32 %v2861_v62 }
0x17f5   :  { %vm1029_vm7 = vmor %vm1027_vm6, %vm1028_vm4 }
0x17f6   :  { %v1023_v11 = vmul.f32 %v2861_v62, %v1022_v63 }
0x17f8   :  { %v1024_v12 = vmul.f32 0.5, %v1023_v11 }
0x17fa   :  { %v1025_v13 = vsub.f32 1.5, %v1024_v12 }
0x17fc   :  { %v1026_v15 = vmul.f32 %v2861_v62, %v1025_v13 }
0x17fe   :  { %v1030_v17 = vsel %vm1029_vm7, %v2861_v62, %v1026_v15 }
0x17ff   :  { %v1031_v41 = vmul.f32 %v1030_v17, %v1010_v20  ;;  %v2993_v20 = vld [vmem:[%s4074_s4] sm:$0xff] }
0x1800   :  { %v1036_v2 = vpop.permute.xlu1 %1035 }
0x1801   :  { %v1032_v38 = vmul.f32 %v1031_v41, %v3391_v55 }
0x1803   :  { %v1033_v19 = vadd.f32 %v1032_v38, %v3393_v59 }
0x1805   :  { %v3581_v57 = vadd.f32 %v1036_v2, %v1033_v19 }
0x1807   :  { %1195 = vrot.lane.b32.xlu2 %v3581_v57, %s3023_s24 }
0x182f   :  { %v1192_v5 = vpop.permute.xlu0 %1191 }
0x1830   :  { %1194 = vst.msk [vmem:[#allocation3 - $0x6] sm:$0xc0] %vm1118_vm2, %v1192_v5 }
0x1831   :  { %v1343_v36 = vpop.permute.xlu1 %1342 }
0x1832   :  { %2733 = vmatmul.msk.f32.vlgmr.msra.gmra.mxu1 %vm146_vm14, %v1343_v36 }
0x1833   :  { %2069 = vmatpush.msra.mxu1 %v2986_v53 }
0x1835   :  { %2070 = vmatpush.msra.mxu1 %v2987_v18 }
0x1837   :  { %2071 = vmatpush.msra.mxu1 %v2988_v6 }
0x1839   :  { %2072 = vmatpush.msra.mxu1 %v2989_v7 }
0x183b   :  { %2073 = vmatpush.msra.mxu1 %v2990_v1 }
0x183d   :  { %2074 = vmatpush.msra.mxu1 %v2991_v42 }
0x183f   :  { %2075 = vmatpush.msra.mxu1 %v2992_v24 }
0x1841   :  { %2076 = vmatpush.msra.mxu1 %v2993_v20 }
0x1861   :  { %v1196_v9 = vpop.permute.xlu2 %1195 }
0x1862   :  { %1198 = vst.msk [vmem:[#allocation3] sm:$0x3] %vm310_vm15, %v1196_v9 }
0x1869   :  { %v1199_v10 = vld [vmem:[#allocation3] sm:$0x3] }
0x186a   :  { %2731 = vmatmul.msk.f32.vlgmr.msra.gmra.mxu0 %vm119_vm10, %v1199_v10 }
0x186b   :  { %2358 = vmatpush.msra.mxu0 %v2986_v53 }
0x186d   :  { %2359 = vmatpush.msra.mxu0 %v2987_v18 }
0x186f   :  { %2360 = vmatpush.msra.mxu0 %v2988_v6 }
0x1871   :  { %2361 = vmatpush.msra.mxu0 %v2989_v7  ;;  %v1388_v7 = vrot.slane %v3540_v48, 6 }
0x1873   :  { %2362 = vmatpush.msra.mxu0 %v2990_v1 }
0x1875   :  { %2363 = vmatpush.msra.mxu0 %v2991_v42 }
0x1877   :  { %2364 = vmatpush.msra.mxu0 %v2992_v24 }
0x1879   :  { %2365 = vmatpush.msra.mxu0 %v2993_v20 }
0x18af   :  { %v1363_v22 = vpop.f32.mrf.mxu1 }
0x18b0   :  { %v1366_v23 = vadd.f32 %v1363_v22, %v1339_v21 }
0x18b2   :  { %2862 = vtanh.f32 %v1366_v23  ;;  %v2734_v26 = vmul.f32 -1.442695, %v1366_v23 }
0x18b4   :  { %2864 = vpow2.f32 %v2734_v26 }
0x18b8   :  { %v2863_v25 = vpop.eup %2862 }
0x18b9   :  { %1392 = vrot.lane.b32.xlu2 %v2863_v25, %s3023_s24 }
0x18ba   :  { %v2865_v32 = vpop.eup %2864 }
0x18bb   :  { %v1370_v33 = vadd.f32 1.0, %v2865_v32 }
0x18bd   :  { %v1382_v51 = vand.u32 2147483648, %v1370_v33  ;;  %vm1376_vm9 = vweird.f32 %v1370_v33  ;;  %v1380_v52 = vand.u32 2147483647, %v1370_v33 }
0x18bf   :  { %v1383_v3 = vor.u32 1.1754944e-38, %v1382_v51  ;;  %vm1381_vm1 = vcmp.eq.f32.partialorder %v1380_v52, 8.507059e+37 }
0x18e7   :  { %v1220_v28 = vpop.f32.mrf.mxu0 }
0x18e8   :  { %v1221_v31 = vadd.f32 %v3617_v30, %v1220_v28 }
0x18ea   :  { %2866 = vtanh.f32 %v1221_v31  ;;  %v2732_v63 = vmul.f32 -1.442695, %v1221_v31 }
0x18eb   :  { %2868 = vrcp.f32 %v1370_v33 }
0x18ec   :  { %2870 = vpow2.f32 %v2732_v63 }
0x18f0   :  { %v2867_v61 = vpop.eup %2866 }
0x18f1   :  { %1245 = vrot.lane.b32.xlu1 %v2867_v61, %s3023_s24  ;;  %v2869_v34 = vpop.eup %2868 }
0x18f2   :  { %v1372_v35 = vmul.f32 %v2869_v34, %v1370_v33  ;;  %vm1377_vm8 = vweird.f32 %v2869_v34  ;;  %v2871_v11 = vpop.eup %2870 }
0x18f3   :  { %vm1378_vm13 = vmor %vm1376_vm9, %vm1377_vm8  ;;  %v1226_v12 = vadd.f32 1.0, %v2871_v11 }
0x18f4   :  { %v1373_v40 = vsub.f32 1.0, %v1372_v35 }
0x18f5   :  { %2872 = vrcp.f32 %v1226_v12  ;;  %v1238_v19 = vand.u32 2147483648, %v1226_v12  ;;  %vm1232_vm4 = vweird.f32 %v1226_v12  ;;  %v1236_v2 = vand.u32 2147483647, %v1226_v12 }
0x18f6   :  { %v1374_v46 = vmul.f32 %v2869_v34, %v1373_v40 }
0x18f7   :  { %v1239_v36 = vor.u32 1.1754944e-38, %v1238_v19  ;;  %vm1237_vm7 = vcmp.eq.f32.partialorder %v1236_v2, 8.507059e+37 }
0x18f8   :  { %v1375_v27 = vadd.f32 %v2869_v34, %v1374_v46 }
0x18fa   :  { %v1379_v56 = vsel %vm1378_vm13, %v2869_v34, %v1375_v27 }
0x18fb   :  { %v3621_v8 = vsel %vm1381_vm1, %v1383_v3, %v1379_v56  ;;  %v2873_v13 = vpop.eup %2872 }
0x18fc   :  { %v1228_v15 = vmul.f32 %v2873_v13, %v1226_v12  ;;  %vm1233_vm3 = vweird.f32 %v2873_v13  ;;  %v1390_v1 = vmul.f32 %v1388_v7, %v3621_v8 }
0x18fd   :  { %vm1234_vm6 = vmor %vm1232_vm4, %vm1233_vm3 }
0x18fe   :  { %v1229_v17 = vsub.f32 1.0, %v1228_v15 }
0x1900   :  { %v1230_v41 = vmul.f32 %v2873_v13, %v1229_v17 }
0x1902   :  { %v1231_v38 = vadd.f32 %v2873_v13, %v1230_v41 }
0x1904   :  { %v1235_v5 = vsel %vm1234_vm6, %v2873_v13, %v1231_v38 }
0x1905   :  { %v3625_v18 = vsel %vm1237_vm7, %v1239_v36, %v1235_v5 }
0x1906   :  { %v1243_v20 = vmul.f32 %v3625_v18, %v3547_v16 }
0x1913   :  { %v1393_v60 = vpop.permute.xlu2 %1392 }
0x1914   :  { %v1395_v62 = vmul.f32 %v1393_v60, %v3621_v8 }
0x1916   :  { %1397 = vrot.lane.b32.xlu2 %v1395_v62, %s3024_s2 }
0x1963   :  { %v1246_v53 = vpop.permute.xlu1 %1245 }
0x1964   :  { %v1248_v6 = vmul.f32 %v1246_v53, %v3625_v18 }
0x1966   :  { %1250 = vrot.lane.b32.xlu0 %v1248_v6, %s3024_s2 }
0x1970   :  { %v1398_v42 = vpop.permute.xlu2 %1397 }
0x1971   :  { %v1400_v24 = vadd.f32 %v1398_v42, %v1390_v1 }
0x1973   :  { %1402 = vrot.lane.b32.xlu1 %v1400_v24, %s3025_s25 }
0x19d8   :  { %v1251_v9 = vpop.permute.xlu0 %1250 }
0x19d9   :  { %v1253_v10 = vadd.f32 %v1251_v9, %v1243_v20 }
0x19db   :  { %1255 = vrot.lane.b32.xlu2 %v1253_v10, %s3025_s25 }
0x19e5   :  { %v1403_v21 = vpop.permute.xlu1 %1402 }
0x19e6   :  { %v1405_v22 = vsel %vm206_vm5, %v1403_v21, 0.0 }
0x19e7   :  { %1406 = vadd.xlane.f32.xlu0 %v1405_v22 }
0x1a35   :  { %v1256_v23 = vpop.permute.xlu2 %1255 }
0x1a36   :  { %v1258_v48 = vsel %vm206_vm5, %v1256_v23, 0.0 }
0x1a37   :  { %1259 = vadd.xlane.f32.xlu1 %v1258_v48 }
0x1a5a   :  { %v1407_v25 = vpop.xlane.xlu0 %1406 }
0x1a5b   :  { %v1408_v26 = vmul.f32 %v1407_v25, %v3171_v43 }
0x1a5d   :  { %v1409_v28 = vsub.f32 %v1400_v24, %v1408_v26 }
0x1a5f   :  { %v1410_v31 = vmul.f32 %v1409_v28, %v1409_v28 }
0x1a61   :  { %1412 = vrot.lane.b32.xlu2 %v1410_v31, %s3025_s25 }
0x1aaa   :  { %v1260_v16 = vpop.xlane.xlu1 %1259 }
0x1aab   :  { %v1261_v32 = vmul.f32 %v1260_v16, %v3171_v43  ;;  %v3663_v16 = vld [vmem:[#allocation2 + $0x18] sm:$0x3] }
0x1aad   :  { %v1262_v61 = vsub.f32 %v1253_v10, %v1261_v32 }
0x1aaf   :  { %v1263_v33 = vmul.f32 %v1262_v61, %v1262_v61 }
0x1ab1   :  { %1265 = vrot.lane.b32.xlu2 %v1263_v33, %s3025_s25 }
0x1abb   :  { %v1413_v34 = vpop.permute.xlu2 %1412 }
0x1abc   :  { %v1415_v35 = vsel %vm206_vm5, %v1413_v34, 0.0 }
0x1ada   :  { %1416 = vadd.xlane.f32.xlu2 %v1415_v35 }
0x1b0b   :  { %v1266_v40 = vpop.permute.xlu2 %1265 }
0x1b0c   :  { %v1268_v46 = vsel %vm206_vm5, %v1266_v40, 0.0 }
0x1b0d   :  { %1269 = vadd.xlane.f32.xlu0 %v1268_v46 }
0x1b4d   :  { %v1417_v27 = vpop.xlane.xlu2 %1416 }
0x1b4e   :  { %v1418_v51 = vmul.f32 %v1417_v27, %v3171_v43 }
0x1b50   :  { %v1419_v52 = vadd.f32 1e-05, %v1418_v51 }
0x1b52   :  { %2874 = vrsqrt.f32 %v1419_v52  ;;  %vm1426_vm9 = vweird.f32 %v1419_v52 }
0x1b58   :  { %v2875_v56 = vpop.eup %2874 }
0x1b59   :  { %v1421_v3 = vmul.f32 %v2875_v56, %v1419_v52  ;;  %vm1427_vm8 = vweird.f32 %v2875_v56 }
0x1b5a   :  { %vm1428_vm13 = vmor %vm1426_vm9, %vm1427_vm8 }
0x1b5b   :  { %v1422_v60 = vmul.f32 %v2875_v56, %v1421_v3 }
0x1b5d   :  { %v1423_v62 = vmul.f32 0.5, %v1422_v60 }
0x1b5f   :  { %v1424_v63 = vsub.f32 1.5, %v1423_v62 }
0x1b61   :  { %v1425_v11 = vmul.f32 %v2875_v56, %v1424_v63 }
0x1b63   :  { %v1429_v12 = vsel %vm1428_vm13, %v2875_v56, %v1425_v11  ;;  %v1324_v56 = vrot.slane %v3557_v4, 6 }
0x1b64   :  { %v1430_v13 = vmul.f32 %v1429_v12, %v1409_v28 }
0x1b66   :  { %v1431_v15 = vmul.f32 %v1430_v13, %v3185_v58 }
0x1b68   :  { %v3646_v17 = vadd.f32 %v1431_v15, %v3187_v0 }
0x1b6a   :  { %2876 = vtanh.f32 %v3646_v17 }
0x1b70   :  { %v2877_v41 = vpop.eup %2876 }
0x1b71   :  { %1435 = vrot.lane.b32.xlu1 %v2877_v41, %s3023_s24 }
0x1b80   :  { %v1270_v38 = vpop.xlane.xlu0 %1269 }
0x1b81   :  { %v1271_v19 = vmul.f32 %v1270_v38, %v3171_v43 }
0x1b83   :  { %v1272_v2 = vadd.f32 1e-05, %v1271_v19 }
0x1b85   :  { %2878 = vrsqrt.f32 %v1272_v2  ;;  %vm1279_vm3 = vweird.f32 %v1272_v2 }
0x1b8b   :  { %v2879_v5 = vpop.eup %2878 }
0x1b8c   :  { %v1274_v36 = vmul.f32 %v2879_v5, %v1272_v2  ;;  %vm1280_vm1 = vweird.f32 %v2879_v5 }
0x1b8d   :  { %vm1281_vm4 = vmor %vm1279_vm3, %vm1280_vm1 }
0x1b8e   :  { %v1275_v53 = vmul.f32 %v2879_v5, %v1274_v36 }
0x1b90   :  { %v1276_v6 = vmul.f32 0.5, %v1275_v53 }
0x1b92   :  { %v1277_v7 = vsub.f32 1.5, %v1276_v6 }
0x1b94   :  { %v1278_v1 = vmul.f32 %v2879_v5, %v1277_v7 }
0x1b96   :  { %v1282_v42 = vsel %vm1281_vm4, %v2879_v5, %v1278_v1 }
0x1b97   :  { %v1283_v24 = vmul.f32 %v1282_v42, %v1262_v61 }
0x1b99   :  { %v1284_v20 = vmul.f32 %v1283_v24, %v3344_v47 }
0x1b9b   :  { %v3653_v9 = vadd.f32 %v1284_v20, %v3346_v50 }
0x1b9d   :  { %2880 = vtanh.f32 %v3653_v9 }
0x1ba3   :  { %v2881_v10 = vpop.eup %2880 }
0x1ba4   :  { %1288 = vrot.lane.b32.xlu0 %v2881_v10, %s3023_s24 }
0x1be3   :  { %v1436_v21 = vpop.permute.xlu1 %1435 }
0x1be4   :  { %v1438_v22 = vmul.f32 %v1436_v21, %v3621_v8 }
0x1be6   :  { %1440 = vrot.lane.b32.xlu2 %v1438_v22, %s3024_s2 }
0x1c16   :  { %v1289_v23 = vpop.permute.xlu0 %1288 }
0x1c17   :  { %v1291_v48 = vmul.f32 %v1289_v23, %v3625_v18 }
0x1c19   :  { %1293 = vrot.lane.b32.xlu0 %v1291_v48, %s3024_s2 }
0x1c40   :  { %v1441_v25 = vpop.permute.xlu2 %1440 }
0x1c41   :  { %v1443_v26 = vsel %vm206_vm5, %v1441_v25, 0.0 }
0x1c42   :  { %1444 = vadd.xlane.f32.xlu1 %v1443_v26 }
0x1c8b   :  { %v1294_v28 = vpop.permute.xlu0 %1293 }
0x1c8c   :  { %v1296_v31 = vsel %vm206_vm5, %v1294_v28, 0.0 }
0x1c8d   :  { %1297 = vadd.xlane.f32.xlu0 %v1296_v31 }
0x1ca1   :  { %1472 = vrot.lane.b32.xlu0 %v3663_v16, %s3025_s25 }
0x1cb5   :  { %v1445_v8 = vpop.xlane.xlu1 %1444 }
0x1cb6   :  { %v1446_v32 = vmul.f32 %v1445_v8, %v3171_v43 }
0x1cb8   :  { %v1447_v61 = vsub.f32 %v1438_v22, %v1446_v32 }
0x1cba   :  { %v1448_v18 = vmul.f32 %v1447_v61, %v1447_v61 }
0x1cbc   :  { %1450 = vrot.lane.b32.xlu2 %v1448_v18, %s3024_s2 }
0x1d00   :  { %v1298_v33 = vpop.xlane.xlu0 %1297 }
0x1d01   :  { %v1299_v34 = vmul.f32 %v1298_v33, %v3171_v43  ;;  %v1621_v33 = vld [vmem:[#allocation2 + $0x10] sm:$0xc] }
0x1d03   :  { %v1300_v35 = vsub.f32 %v1291_v48, %v1299_v34 }
0x1d05   :  { %v1301_v40 = vmul.f32 %v1300_v35, %v1300_v35 }
0x1d07   :  { %1303 = vrot.lane.b32.xlu2 %v1301_v40, %s3024_s2 }
0x1d13   :  { %v1473_v5 = vpop.permute.xlu0 %1472 }
0x1d16   :  { %v1451_v46 = vpop.permute.xlu2 %1450 }
0x1d17   :  { %v1453_v27 = vsel %vm206_vm5, %v1451_v46, 0.0 }
0x1d30   :  { %1454 = vadd.xlane.f32.xlu2 %v1453_v27 }
0x1d61   :  { %v1304_v51 = vpop.permute.xlu2 %1303 }
0x1d62   :  { %v1306_v52 = vsel %vm206_vm5, %v1304_v51, 0.0 }
0x1d63   :  { %1307 = vadd.xlane.f32.xlu1 %v1306_v52 }
0x1d7c   :  { %1325 = vrot.lane.b32.xlu1 %v1324_v56, %s3023_s24 }
0x1da3   :  { %v1455_v3 = vpop.xlane.xlu2 %1454 }
0x1da4   :  { %v1456_v60 = vmul.f32 %v1455_v3, %v3171_v43 }
0x1da6   :  { %v1457_v62 = vadd.f32 1e-05, %v1456_v60 }
0x1da8   :  { %2882 = vrsqrt.f32 %v1457_v62  ;;  %vm1464_vm7 = vweird.f32 %v1457_v62 }
0x1dae   :  { %v2883_v63 = vpop.eup %2882 }
0x1daf   :  { %v1459_v11 = vmul.f32 %v2883_v63, %v1457_v62  ;;  %vm1465_vm6 = vweird.f32 %v2883_v63 }
0x1db0   :  { %vm1466_vm8 = vmor %vm1464_vm7, %vm1465_vm6 }
0x1db1   :  { %v1460_v12 = vmul.f32 %v2883_v63, %v1459_v11 }
0x1db3   :  { %v1461_v13 = vmul.f32 0.5, %v1460_v12 }
0x1db5   :  { %v1462_v15 = vsub.f32 1.5, %v1461_v13 }
0x1db7   :  { %v1463_v41 = vmul.f32 %v2883_v63, %v1462_v15 }
0x1db9   :  { %v1467_v38 = vsel %vm1466_vm8, %v2883_v63, %v1463_v41 }
0x1dba   :  { %v1468_v19 = vmul.f32 %v1467_v38, %v1447_v61 }
0x1dbc   :  { %v1469_v4 = vmul.f32 %v1468_v19, %v3259_v45 }
0x1dbe   :  { %v1470_v2 = vadd.f32 %v1469_v4, %v3257_v39 }
0x1dc0   :  { %v3678_v36 = vadd.f32 %v1473_v5, %v1470_v2 }
0x1dc2   :  { %1477 = vrot.lane.b32.xlu0 %v3678_v36, %s3024_s2 }
0x1dd6   :  { %v1308_v53 = vpop.xlane.xlu1 %1307 }
0x1dd7   :  { %v1309_v6 = vmul.f32 %v1308_v53, %v3171_v43 }
0x1dd9   :  { %v1310_v7 = vadd.f32 1e-05, %v1309_v6 }
0x1ddb   :  { %2884 = vrsqrt.f32 %v1310_v7  ;;  %vm1317_vm13 = vweird.f32 %v1310_v7 }
0x1de1   :  { %v2885_v1 = vpop.eup %2884 }
0x1de2   :  { %v1312_v42 = vmul.f32 %v2885_v1, %v1310_v7  ;;  %vm1318_vm9 = vweird.f32 %v2885_v1 }
0x1de3   :  { %vm1319_vm1 = vmor %vm1317_vm13, %vm1318_vm9 }
0x1de4   :  { %v1313_v24 = vmul.f32 %v2885_v1, %v1312_v42 }
0x1de6   :  { %v1314_v20 = vmul.f32 0.5, %v1313_v24 }
0x1de8   :  { %v1315_v10 = vsub.f32 1.5, %v1314_v20 }
0x1dea   :  { %v1316_v21 = vmul.f32 %v2885_v1, %v1315_v10 }
0x1dec   :  { %v1320_v22 = vsel %vm1319_vm1, %v2885_v1, %v1316_v21 }
0x1ded   :  { %v1321_v23 = vmul.f32 %v1320_v22, %v1300_v35 }
0x1dee   :  { %v1326_v26 = vpop.permute.xlu1 %1325 }
0x1def   :  { %v1322_v48 = vmul.f32 %v1321_v23, %v3391_v55 }
0x1df1   :  { %v1323_v25 = vadd.f32 %v1322_v48, %v3393_v59 }
0x1df3   :  { %v3685_v28 = vadd.f32 %v1326_v26, %v1323_v25  ;;  %v1670_v26 = vrot.slane %v3646_v17, 6 }
0x1df5   :  { %1481 = vrot.lane.b32.xlu2 %v3685_v28, %s3023_s24 }
0x1e34   :  { %v1478_v31 = vpop.permute.xlu0 %1477 }
0x1e35   :  { %1480 = vst.msk [vmem:[#allocation3] sm:$0x3] %vm206_vm5, %v1478_v31  ;;  %2737 = vmatmul.msk.f32.vlgmr.msrb.gmra.mxu1 %vm146_vm14, %v1478_v31 }
0x1e4f   :  { %v1482_v8 = vpop.permute.xlu2 %1481 }
0x1e50   :  { %1484 = vst.msk [vmem:[#allocation3] sm:$0x3] %vm310_vm15, %v1482_v8 }
0x1e57   :  { %v1485_v32 = vld [vmem:[#allocation3] sm:$0x3] }
0x1e58   :  { %2735 = vmatmul.msk.f32.vlgmr.msra.gmra.mxu3 %vm119_vm10, %v1485_v32 }
0x1eb2   :  { %v1642_v61 = vpop.f32.mrf.mxu1 }
0x1eb3   :  { %v1646_v18 = vrot.slane %v1642_v61, 6 }
0x1eb5   :  { %v1648_v34 = vadd.f32 %v1646_v18, %v1621_v33 }
0x1eb7   :  { %2886 = vtanh.f32 %v1648_v34  ;;  %v2738_v51 = vmul.f32 -1.442695, %v1648_v34 }
0x1ebd   :  { %v2887_v35 = vpop.eup %2886 }
0x1ebe   :  { %1674 = vrot.lane.b32.xlu1 %v2887_v35, %s3023_s24 }
0x1edb   :  { %v1506_v40 = vpop.f32.mrf.mxu3 }
0x1edc   :  { %v1507_v46 = vadd.f32 %v3617_v30, %v1506_v40 }
0x1ede   :  { %2888 = vtanh.f32 %v1507_v46  ;;  %v2736_v12 = vmul.f32 -1.442695, %v1507_v46 }
0x1edf   :  { %2890 = vpow2.f32 %v2738_v51 }
0x1ee4   :  { %v2889_v27 = vpop.eup %2888 }
0x1ee5   :  { %1531 = vrot.lane.b32.xlu0 %v2889_v27, %s3023_s24  ;;  %v2891_v52 = vpop.eup %2890 }
0x1ee6   :  { %v1652_v56 = vadd.f32 1.0, %v2891_v52 }
0x1ee8   :  { %2892 = vrcp.f32 %v1652_v56  ;;  %v1664_v13 = vand.u32 2147483648, %v1652_v56  ;;  %vm1658_vm4 = vweird.f32 %v1652_v56  ;;  %v1662_v15 = vand.u32 2147483647, %v1652_v56 }
0x1ee9   :  { %2894 = vpow2.f32 %v2736_v12 }
0x1eea   :  { %v1665_v38 = vor.u32 1.1754944e-38, %v1664_v13  ;;  %vm1663_vm7 = vcmp.eq.f32.partialorder %v1662_v15, 8.507059e+37 }
0x1eee   :  { %v2893_v3 = vpop.eup %2892 }
0x1eef   :  { %v1654_v60 = vmul.f32 %v2893_v3, %v1652_v56  ;;  %vm1659_vm3 = vweird.f32 %v2893_v3  ;;  %v2895_v5 = vpop.eup %2894 }
0x1ef0   :  { %vm1660_vm6 = vmor %vm1658_vm4, %vm1659_vm3  ;;  %v1512_v53 = vadd.f32 1.0, %v2895_v5 }
0x1ef1   :  { %v1655_v62 = vsub.f32 1.0, %v1654_v60 }
0x1ef2   :  { %2896 = vrcp.f32 %v1512_v53  ;;  %v1524_v20 = vand.u32 2147483648, %v1512_v53  ;;  %vm1518_vm9 = vweird.f32 %v1512_v53  ;;  %v1522_v10 = vand.u32 2147483647, %v1512_v53 }
0x1ef3   :  { %v1656_v63 = vmul.f32 %v2893_v3, %v1655_v62 }
0x1ef4   :  { %v1525_v22 = vor.u32 1.1754944e-38, %v1524_v20  ;;  %vm1523_vm1 = vcmp.eq.f32.partialorder %v1522_v10, 8.507059e+37 }
0x1ef5   :  { %v1657_v11 = vadd.f32 %v2893_v3, %v1656_v63 }
0x1ef7   :  { %v1661_v41 = vsel %vm1660_vm6, %v2893_v3, %v1657_v11 }
0x1ef8   :  { %v3696_v4 = vsel %vm1663_vm7, %v1665_v38, %v1661_v41  ;;  %v2897_v6 = vpop.eup %2896 }
0x1ef9   :  { %v1514_v7 = vmul.f32 %v2897_v6, %v1512_v53  ;;  %vm1519_vm8 = vweird.f32 %v2897_v6  ;;  %v1672_v31 = vmul.f32 %v1670_v26, %v3696_v4 }
0x1efa   :  { %vm1520_vm13 = vmor %vm1518_vm9, %vm1519_vm8 }
0x1efb   :  { %v1515_v1 = vsub.f32 1.0, %v1514_v7 }
0x1efd   :  { %v1516_v42 = vmul.f32 %v2897_v6, %v1515_v1 }
0x1eff   :  { %v1517_v24 = vadd.f32 %v2897_v6, %v1516_v42 }
0x1f01   :  { %v1521_v21 = vsel %vm1520_vm13, %v2897_v6, %v1517_v24 }
0x1f02   :  { %v3700_v48 = vsel %vm1523_vm1, %v1525_v22, %v1521_v21 }
0x1f03   :  { %v1529_v61 = vmul.f32 %v3700_v48, %v3653_v9 }
0x1f30   :  { %v1675_v19 = vpop.permute.xlu1 %1674 }
0x1f31   :  { %v1677_v2 = vmul.f32 %v1675_v19, %v3696_v4 }
0x1f33   :  { %1679 = vrot.lane.b32.xlu1 %v1677_v2, %s3024_s2 }
0x1f57   :  { %v1532_v23 = vpop.permute.xlu0 %1531 }
0x1f58   :  { %v1534_v25 = vmul.f32 %v1532_v23, %v3700_v48 }
0x1f5a   :  { %1536 = vrot.lane.b32.xlu0 %v1534_v25, %s3024_s2 }
0x1fa5   :  { %v1680_v8 = vpop.permute.xlu1 %1679 }
0x1fa6   :  { %v1682_v32 = vadd.f32 %v1680_v8, %v1672_v31 }
0x1fa8   :  { %1684 = vrot.lane.b32.xlu1 %v1682_v32, %s3025_s25 }
0x1fcc   :  { %v1537_v18 = vpop.permute.xlu0 %1536 }
0x1fcd   :  { %v1539_v33 = vadd.f32 %v1537_v18, %v1529_v61 }
0x1fcf   :  { %1541 = vrot.lane.b32.xlu0 %v1539_v33, %s3025_s25 }
0x201a   :  { %v1685_v34 = vpop.permute.xlu1 %1684 }
0x201b   :  { %v1687_v35 = vsel %vm537_vm11, %v1685_v34, 0.0 }
0x201c   :  { %1688 = vadd.xlane.f32.xlu2 %v1687_v35 }
0x2041   :  { %v1542_v40 = vpop.permute.xlu0 %1541 }
0x2042   :  { %v1544_v17 = vsel %vm206_vm5, %v1542_v40, 0.0 }
0x2043   :  { %1545 = vadd.xlane.f32.xlu1 %v1544_v17 }
0x208f   :  { %v1689_v46 = vpop.xlane.xlu2 %1688 }
0x2090   :  { %v1690_v27 = vmul.f32 %v1689_v46, %v3171_v43 }
0x2092   :  { %v1691_v51 = vsub.f32 %v1682_v32, %v1690_v27 }
0x2094   :  { %v1692_v52 = vmul.f32 %v1691_v51, %v1691_v51 }
0x2096   :  { %1694 = vrot.lane.b32.xlu0 %v1692_v52, %s3025_s25 }
0x20b6   :  { %v1546_v9 = vpop.xlane.xlu1 %1545 }
0x20b7   :  { %v1547_v56 = vmul.f32 %v1546_v9, %v3171_v43 }
0x20b9   :  { %v1548_v3 = vsub.f32 %v1539_v33, %v1547_v56 }
0x20bb   :  { %v1549_v60 = vmul.f32 %v1548_v3, %v1548_v3 }
0x20bd   :  { %1551 = vrot.lane.b32.xlu0 %v1549_v60, %s3025_s25 }
0x2108   :  { %v1695_v62 = vpop.permute.xlu0 %1694 }
0x2109   :  { %v1697_v63 = vsel %vm537_vm11, %v1695_v62, 0.0 }
0x210a   :  { %1698 = vadd.xlane.f32.xlu0 %v1697_v63 }
0x212f   :  { %v1552_v11 = vpop.permute.xlu0 %1551 }
0x2130   :  { %v1554_v12 = vsel %vm206_vm5, %v1552_v11, 0.0 }
0x2131   :  { %1555 = vadd.xlane.f32.xlu2 %v1554_v12 }
0x217d   :  { %v1699_v13 = vpop.xlane.xlu0 %1698 }
0x217e   :  { %v1700_v15 = vmul.f32 %v1699_v13, %v3171_v43 }
0x2180   :  { %v1701_v41 = vadd.f32 1e-05, %v1700_v15 }
0x2182   :  { %2898 = vrsqrt.f32 %v1701_v41  ;;  %vm1708_vm4 = vweird.f32 %v1701_v41 }
0x2188   :  { %v2899_v38 = vpop.eup %2898 }
0x2189   :  { %v1703_v19 = vmul.f32 %v2899_v38, %v1701_v41  ;;  %vm1709_vm3 = vweird.f32 %v2899_v38 }
0x218a   :  { %vm1710_vm6 = vmor %vm1708_vm4, %vm1709_vm3 }
0x218b   :  { %v1704_v2 = vmul.f32 %v2899_v38, %v1703_v19 }
0x218d   :  { %v1705_v5 = vmul.f32 0.5, %v1704_v2 }
0x218f   :  { %v1706_v53 = vsub.f32 1.5, %v1705_v5 }
0x2191   :  { %v1707_v6 = vmul.f32 %v2899_v38, %v1706_v53 }
0x2193   :  { %v1711_v7 = vsel %vm1710_vm6, %v2899_v38, %v1707_v6 }
0x2194   :  { %v1712_v1 = vmul.f32 %v1711_v7, %v1691_v51 }
0x2196   :  { %v1713_v42 = vmul.f32 %v1712_v1, %v3185_v58 }
0x2198   :  { %v3721_v24 = vadd.f32 %v1713_v42, %v3187_v0 }
0x219a   :  { %2900 = vtanh.f32 %v3721_v24 }
0x21a0   :  { %v2901_v20 = vpop.eup %2900 }
0x21a1   :  { %1717 = vrot.lane.b32.xlu1 %v2901_v20, %s3023_s24 }
0x21a4   :  { %v1556_v10 = vpop.xlane.xlu2 %1555 }
0x21a5   :  { %v1557_v21 = vmul.f32 %v1556_v10, %v3171_v43 }
0x21a7   :  { %v1558_v22 = vadd.f32 1e-05, %v1557_v21 }
0x21a9   :  { %2902 = vrsqrt.f32 %v1558_v22  ;;  %vm1565_vm8 = vweird.f32 %v1558_v22 }
0x21af   :  { %v2903_v23 = vpop.eup %2902 }
0x21b0   :  { %v1560_v25 = vmul.f32 %v2903_v23, %v1558_v22  ;;  %vm1566_vm7 = vweird.f32 %v2903_v23 }
0x21b1   :  { %vm1567_vm9 = vmor %vm1565_vm8, %vm1566_vm7 }
0x21b2   :  { %v1561_v26 = vmul.f32 %v2903_v23, %v1560_v25 }
0x21b4   :  { %v1562_v31 = vmul.f32 0.5, %v1561_v26 }
0x21b6   :  { %v1563_v8 = vsub.f32 1.5, %v1562_v31 }
0x21b8   :  { %v1564_v32 = vmul.f32 %v2903_v23, %v1563_v8 }
0x21ba   :  { %v1568_v61 = vsel %vm1567_vm9, %v2903_v23, %v1564_v32 }
0x21bb   :  { %v1569_v18 = vmul.f32 %v1568_v61, %v1548_v3  ;;  %v3738_v3 = vld [vmem:[#allocation2 + $0x18] sm:$0xc] }
0x21bd   :  { %v1570_v33 = vmul.f32 %v1569_v18, %v3344_v47 }
0x21bf   :  { %v3728_v34 = vadd.f32 %v1570_v33, %v3346_v50 }
0x21c1   :  { %2904 = vtanh.f32 %v3728_v34 }
0x21c7   :  { %v2905_v35 = vpop.eup %2904 }
0x21c8   :  { %1574 = vrot.lane.b32.xlu2 %v2905_v35, %s3023_s24 }
0x2213   :  { %v1718_v40 = vpop.permute.xlu1 %1717 }
0x2214   :  { %v1720_v17 = vmul.f32 %v1718_v40, %v3696_v4 }
0x2216   :  { %1722 = vrot.lane.b32.xlu0 %v1720_v17, %s3024_s2 }
0x2222   :  { %v1575_v46 = vpop.permute.xlu2 %1574 }
0x2223   :  { %v1577_v27 = vmul.f32 %v1575_v46, %v3700_v48 }
0x2225   :  { %1579 = vrot.lane.b32.xlu1 %v1577_v27, %s3024_s2 }
0x2288   :  { %v1723_v51 = vpop.permute.xlu0 %1722 }
0x2289   :  { %v1725_v52 = vsel %vm537_vm11, %v1723_v51, 0.0 }
0x228a   :  { %1726 = vadd.xlane.f32.xlu2 %v1725_v52 }
0x2297   :  { %v1580_v9 = vpop.permute.xlu1 %1579 }
0x2298   :  { %v1582_v56 = vsel %vm206_vm5, %v1580_v9, 0.0 }
0x2299   :  { %1583 = vadd.xlane.f32.xlu1 %v1582_v56 }
0x22b2   :  { %1754 = vrot.lane.b32.xlu1 %v3738_v3, %s3025_s25 }
0x22fd   :  { %v1727_v4 = vpop.xlane.xlu2 %1726 }
0x22fe   :  { %v1728_v60 = vmul.f32 %v1727_v4, %v3171_v43 }
0x2300   :  { %v1729_v62 = vsub.f32 %v1720_v17, %v1728_v60 }
0x2302   :  { %v1730_v48 = vmul.f32 %v1729_v62, %v1729_v62 }
0x2304   :  { %1732 = vrot.lane.b32.xlu0 %v1730_v48, %s3024_s2 }
0x230c   :  { %v1584_v63 = vpop.xlane.xlu1 %1583 }
0x230d   :  { %v1585_v11 = vmul.f32 %v1584_v63, %v3171_v43 }
0x230f   :  { %v1586_v12 = vsub.f32 %v1577_v27, %v1585_v11 }
0x2311   :  { %v1587_v13 = vmul.f32 %v1586_v12, %v1586_v12 }
0x2313   :  { %1589 = vrot.lane.b32.xlu0 %v1587_v13, %s3024_s2  ;;  %v1908_v13 = vld [vmem:[#allocation2 + $0x10] sm:$0x30] }
0x2324   :  { %v1755_v61 = vpop.permute.xlu1 %1754 }
0x2376   :  { %v1733_v15 = vpop.permute.xlu0 %1732 }
0x2377   :  { %v1735_v41 = vsel %vm537_vm11, %v1733_v15, 0.0 }
0x2378   :  { %1736 = vadd.xlane.f32.xlu0 %v1735_v41 }
0x2385   :  { %v1590_v38 = vpop.permute.xlu0 %1589 }
0x2386   :  { %v1592_v19 = vsel %vm206_vm5, %v1590_v38, 0.0 }
0x2387   :  { %1593 = vadd.xlane.f32.xlu2 %v1592_v19 }
0x239f   :  { %1610 = vrot.lane.b32.xlu2 %v3663_v16, %s3023_s24 }
0x23eb   :  { %v1737_v2 = vpop.xlane.xlu0 %1736 }
0x23ec   :  { %v1738_v5 = vmul.f32 %v1737_v2, %v3171_v43 }
0x23ee   :  { %v1739_v53 = vadd.f32 1e-05, %v1738_v5 }
0x23f0   :  { %2906 = vrsqrt.f32 %v1739_v53  ;;  %vm1746_vm1 = vweird.f32 %v1739_v53 }
0x23f6   :  { %v2907_v6 = vpop.eup %2906 }
0x23f7   :  { %v1741_v7 = vmul.f32 %v2907_v6, %v1739_v53  ;;  %vm1747_vm13 = vweird.f32 %v2907_v6 }
0x23f8   :  { %vm1748_vm3 = vmor %vm1746_vm1, %vm1747_vm13 }
0x23f9   :  { %v1742_v1 = vmul.f32 %v2907_v6, %v1741_v7 }
0x23fa   :  { %v1594_v42 = vpop.xlane.xlu2 %1593 }
0x23fb   :  { %v1743_v20 = vmul.f32 0.5, %v1742_v1  ;;  %v1595_v10 = vmul.f32 %v1594_v42, %v3171_v43 }
0x23fd   :  { %v1744_v21 = vsub.f32 1.5, %v1743_v20  ;;  %v1596_v22 = vadd.f32 1e-05, %v1595_v10 }
0x23ff   :  { %v1745_v23 = vmul.f32 %v2907_v6, %v1744_v21  ;;  %2908 = vrsqrt.f32 %v1596_v22  ;;  %vm1603_vm6 = vweird.f32 %v1596_v22 }
0x2401   :  { %v1749_v16 = vsel %vm1748_vm3, %v2907_v6, %v1745_v23 }
0x2402   :  { %v1750_v25 = vmul.f32 %v1749_v16, %v1729_v62  ;;  %v1611_v56 = vpop.permute.xlu2 %1610 }
0x2404   :  { %v1751_v26 = vmul.f32 %v1750_v25, %v3259_v45 }
0x2405   :  { %v2909_v31 = vpop.eup %2908 }
0x2406   :  { %v1598_v8 = vmul.f32 %v2909_v31, %v1596_v22  ;;  %v1752_v32 = vadd.f32 %v1751_v26, %v3257_v39  ;;  %vm1604_vm4 = vweird.f32 %v2909_v31 }
0x2407   :  { %vm1605_vm7 = vmor %vm1603_vm6, %vm1604_vm4 }
0x2408   :  { %v1599_v18 = vmul.f32 %v2909_v31, %v1598_v8  ;;  %v3754_v33 = vadd.f32 %v1755_v61, %v1752_v32 }
0x240a   :  { %v1600_v35 = vmul.f32 0.5, %v1599_v18  ;;  %1759 = vrot.lane.b32.xlu0 %v3754_v33, %s3024_s2  ;;  %v1910_v40 = vrot.slane %v3754_v33, 2 }
0x240c   :  { %v1601_v17 = vsub.f32 1.5, %v1600_v35  ;;  %1911 = vrot.lane.b32.xlu2 %v1910_v40, %s3024_s2 }
0x240e   :  { %v1602_v46 = vmul.f32 %v2909_v31, %v1601_v17 }
0x2410   :  { %v1606_v27 = vsel %vm1605_vm7, %v2909_v31, %v1602_v46 }
0x2411   :  { %v1607_v51 = vmul.f32 %v1606_v27, %v1586_v12 }
0x2413   :  { %v1608_v52 = vmul.f32 %v1607_v51, %v3391_v55 }
0x2415   :  { %v1609_v9 = vadd.f32 %v1608_v52, %v3393_v59 }
0x2417   :  { %v3762_v4 = vadd.f32 %v1611_v56, %v1609_v9 }
0x2419   :  { %1764 = vrot.lane.b32.xlu1 %v3762_v4, %s3023_s24 }
0x2466   :  { %v1912_v60 = vpop.permute.xlu2 %1911 }
0x2467   :  { %2741 = vmatmul.msk.f32.vlgmr.msrb.gmra.mxu0 %vm146_vm14, %v1912_v60 }
0x247c   :  { %v1760_v62 = vpop.permute.xlu0 %1759 }
0x247d   :  { %1762 = vst.msk [vmem:[#allocation3 - $0x2] sm:$0xc] %vm537_vm11, %v1760_v62  ;;  %v1960_v62 = vrot.slane %v3721_v24, 6 }
0x248b   :  { %v1765_v48 = vpop.permute.xlu1 %1764 }
0x248c   :  { %1767 = vst.msk [vmem:[#allocation3] sm:$0x3] %vm310_vm15, %v1765_v48 }
0x2493   :  { %v1768_v63 = vld [vmem:[#allocation3] sm:$0x3] }
0x2494   :  { %2739 = vmatmul.msk.f32.vlgmr.msrb.gmra.mxu2 %vm119_vm10, %v1768_v63 }
0x24e4   :  { %v1932_v11 = vpop.f32.mrf.mxu0 }
0x24e5   :  { %v1936_v12 = vrot.slane %v1932_v11, 4 }
0x24e7   :  { %v1938_v15 = vadd.f32 %v1936_v12, %v1908_v13 }
0x24e9   :  { %2910 = vtanh.f32 %v1938_v15  ;;  %v2742_v5 = vmul.f32 -1.442695, %v1938_v15 }
0x24ef   :  { %v2911_v41 = vpop.eup %2910 }
0x24f0   :  { %1964 = vrot.lane.b32.xlu1 %v2911_v41, %s3023_s24 }
0x2517   :  { %v1789_v38 = vpop.f32.mrf.mxu2 }
0x2518   :  { %v1790_v19 = vadd.f32 %v3617_v30, %v1789_v38 }
0x251a   :  { %2912 = vtanh.f32 %v1790_v19  ;;  %v2740_v1 = vmul.f32 -1.442695, %v1790_v19 }
0x251b   :  { %2914 = vpow2.f32 %v2742_v5 }
0x2520   :  { %v2913_v2 = vpop.eup %2912 }
0x2521   :  { %1814 = vrot.lane.b32.xlu2 %v2913_v2, %s3023_s24  ;;  %v2915_v53 = vpop.eup %2914 }
0x2522   :  { %v1942_v6 = vadd.f32 1.0, %v2915_v53 }
0x2524   :  { %2916 = vrcp.f32 %v1942_v6  ;;  %v1954_v30 = vand.u32 2147483648, %v1942_v6  ;;  %vm1948_vm9 = vweird.f32 %v1942_v6  ;;  %v1952_v16 = vand.u32 2147483647, %v1942_v6 }
0x2525   :  { %2918 = vpow2.f32 %v2740_v1 }
0x2526   :  { %v1955_v26 = vor.u32 1.1754944e-38, %v1954_v30  ;;  %vm1953_vm1 = vcmp.eq.f32.partialorder %v1952_v16, 8.507059e+37 }
0x252a   :  { %v2917_v7 = vpop.eup %2916 }
0x252b   :  { %v1944_v42 = vmul.f32 %v2917_v7, %v1942_v6  ;;  %v2919_v21 = vpop.eup %2918  ;;  %vm1949_vm8 = vweird.f32 %v2917_v7 }
0x252c   :  { %v1795_v22 = vadd.f32 1.0, %v2919_v21  ;;  %vm1950_vm13 = vmor %vm1948_vm9, %vm1949_vm8 }
0x252d   :  { %v1945_v20 = vsub.f32 1.0, %v1944_v42 }
0x252e   :  { %2920 = vrcp.f32 %v1795_v22  ;;  %v1807_v46 = vand.u32 2147483648, %v1795_v22  ;;  %vm1801_vm4 = vweird.f32 %v1795_v22  ;;  %v1805_v27 = vand.u32 2147483647, %v1795_v22 }
0x252f   :  { %v1946_v10 = vmul.f32 %v2917_v7, %v1945_v20 }
0x2530   :  { %v1808_v52 = vor.u32 1.1754944e-38, %v1807_v46  ;;  %vm1806_vm7 = vcmp.eq.f32.partialorder %v1805_v27, 8.507059e+37 }
0x2531   :  { %v1947_v23 = vadd.f32 %v2917_v7, %v1946_v10 }
0x2533   :  { %v1951_v25 = vsel %vm1950_vm13, %v2917_v7, %v1947_v23 }
0x2534   :  { %v3773_v31 = vsel %vm1953_vm1, %v1955_v26, %v1951_v25  ;;  %v2921_v61 = vpop.eup %2920 }
0x2535   :  { %v1797_v18 = vmul.f32 %v2921_v61, %v1795_v22  ;;  %vm1802_vm3 = vweird.f32 %v2921_v61  ;;  %v1962_v48 = vmul.f32 %v1960_v62, %v3773_v31 }
0x2536   :  { %vm1803_vm6 = vmor %vm1801_vm4, %vm1802_vm3 }
0x2537   :  { %v1798_v35 = vsub.f32 1.0, %v1797_v18 }
0x2539   :  { %v1799_v40 = vmul.f32 %v2921_v61, %v1798_v35 }
0x253b   :  { %v1800_v17 = vadd.f32 %v2921_v61, %v1799_v40 }
0x253d   :  { %v1804_v51 = vsel %vm1803_vm6, %v2921_v61, %v1800_v17 }
0x253e   :  { %v3777_v56 = vsel %vm1806_vm7, %v1808_v52, %v1804_v51 }
0x253f   :  { %v1812_v12 = vmul.f32 %v3777_v56, %v3728_v34 }
0x2562   :  { %v1965_v8 = vpop.permute.xlu1 %1964 }
0x2563   :  { %v1967_v32 = vmul.f32 %v1965_v8, %v3773_v31 }
0x2565   :  { %1969 = vrot.lane.b32.xlu1 %v1967_v32, %s3024_s2 }
0x257b   :  { %v1815_v9 = vpop.permute.xlu2 %1814 }
0x257c   :  { %v1817_v60 = vmul.f32 %v1815_v9, %v3777_v56 }
0x257e   :  { %1819 = vrot.lane.b32.xlu0 %v1817_v60, %s3024_s2 }
0x25d7   :  { %v1970_v63 = vpop.permute.xlu1 %1969 }
0x25d8   :  { %v1972_v11 = vadd.f32 %v1970_v63, %v1962_v48 }
0x25da   :  { %1974 = vrot.lane.b32.xlu2 %v1972_v11, %s3025_s25 }
0x25f0   :  { %v1820_v13 = vpop.permute.xlu0 %1819 }
0x25f1   :  { %v1822_v15 = vadd.f32 %v1820_v13, %v1812_v12 }
0x25f3   :  { %1824 = vrot.lane.b32.xlu1 %v1822_v15, %s3025_s25 }
0x2634   :  { %v1975_v41 = vpop.permute.xlu2 %1974 }
0x2635   :  { %v1977_v38 = vsel %vm828_vm12, %v1975_v41, 0.0 }
0x2636   :  { %1978 = vadd.xlane.f32.xlu0 %v1977_v38 }
0x2665   :  { %v1825_v19 = vpop.permute.xlu1 %1824 }
0x2666   :  { %v1827_v24 = vsel %vm206_vm5, %v1825_v19, 0.0 }
0x2667   :  { %1828 = vadd.xlane.f32.xlu2 %v1827_v24 }
0x26a9   :  { %v1979_v2 = vpop.xlane.xlu0 %1978 }
0x26aa   :  { %v1980_v5 = vmul.f32 %v1979_v2, %v3171_v43 }
0x26ac   :  { %v1981_v53 = vsub.f32 %v1972_v11, %v1980_v5 }
0x26ae   :  { %v1982_v6 = vmul.f32 %v1981_v53, %v1981_v53 }
0x26b0   :  { %1984 = vrot.lane.b32.xlu1 %v1982_v6, %s3025_s25 }
0x26da   :  { %v1829_v34 = vpop.xlane.xlu2 %1828 }
0x26db   :  { %v1830_v7 = vmul.f32 %v1829_v34, %v3171_v43 }
0x26dd   :  { %v1831_v1 = vsub.f32 %v1822_v15, %v1830_v7 }
0x26df   :  { %v1832_v42 = vmul.f32 %v1831_v1, %v1831_v1 }
0x26e1   :  { %1834 = vrot.lane.b32.xlu1 %v1832_v42, %s3025_s25  ;;  %v3815_v42 = vld [vmem:[#allocation2 + $0x18] sm:$0x30] }
0x2722   :  { %v1985_v20 = vpop.permute.xlu1 %1984 }
0x2723   :  { %v1987_v10 = vsel %vm828_vm12, %v1985_v20, 0.0 }
0x2724   :  { %1988 = vadd.xlane.f32.xlu1 %v1987_v10 }
0x2753   :  { %v1835_v21 = vpop.permute.xlu1 %1834 }
0x2754   :  { %v1837_v22 = vsel %vm206_vm5, %v1835_v21, 0.0 }
0x2755   :  { %1838 = vadd.xlane.f32.xlu0 %v1837_v22 }
0x2797   :  { %v1989_v23 = vpop.xlane.xlu1 %1988 }
0x2798   :  { %v1990_v30 = vmul.f32 %v1989_v23, %v3171_v43 }
0x279a   :  { %v1991_v16 = vadd.f32 1e-05, %v1990_v30 }
0x279c   :  { %2922 = vrsqrt.f32 %v1991_v16  ;;  %vm1998_vm9 = vweird.f32 %v1991_v16 }
0x27a2   :  { %v2923_v25 = vpop.eup %2922 }
0x27a3   :  { %v1993_v26 = vmul.f32 %v2923_v25, %v1991_v16  ;;  %vm1999_vm8 = vweird.f32 %v2923_v25 }
0x27a4   :  { %vm2000_vm13 = vmor %vm1998_vm9, %vm1999_vm8 }
0x27a5   :  { %v1994_v8 = vmul.f32 %v2923_v25, %v1993_v26 }
0x27a7   :  { %v1995_v32 = vmul.f32 0.5, %v1994_v8 }
0x27a9   :  { %v1996_v61 = vsub.f32 1.5, %v1995_v32  ;;  %v1893_v32 = vrot.slane %v3738_v3, 2 }
0x27ab   :  { %v1997_v18 = vmul.f32 %v2923_v25, %v1996_v61 }
0x27ad   :  { %v2001_v35 = vsel %vm2000_vm13, %v2923_v25, %v1997_v18 }
0x27ae   :  { %v2002_v40 = vmul.f32 %v2001_v35, %v1981_v53 }
0x27b0   :  { %v2003_v17 = vmul.f32 %v2002_v40, %v3185_v58 }
0x27b2   :  { %v3798_v46 = vadd.f32 %v2003_v17, %v3187_v0 }
0x27b4   :  { %2924 = vtanh.f32 %v3798_v46 }
0x27ba   :  { %v2925_v27 = vpop.eup %2924 }
0x27bb   :  { %2007 = vrot.lane.b32.xlu2 %v2925_v27, %s3023_s24 }
0x27c8   :  { %v1839_v51 = vpop.xlane.xlu0 %1838 }
0x27c9   :  { %v1840_v52 = vmul.f32 %v1839_v51, %v3171_v43 }
0x27cb   :  { %v1841_v9 = vadd.f32 1e-05, %v1840_v52 }
0x27cd   :  { %2926 = vrsqrt.f32 %v1841_v9  ;;  %vm1848_vm3 = vweird.f32 %v1841_v9 }
0x27d3   :  { %v2927_v60 = vpop.eup %2926 }
0x27d4   :  { %v1843_v62 = vmul.f32 %v2927_v60, %v1841_v9  ;;  %vm1849_vm1 = vweird.f32 %v2927_v60 }
0x27d5   :  { %vm1850_vm4 = vmor %vm1848_vm3, %vm1849_vm1 }
0x27d6   :  { %v1844_v48 = vmul.f32 %v2927_v60, %v1843_v62 }
0x27d8   :  { %v1845_v63 = vmul.f32 0.5, %v1844_v48 }
0x27da   :  { %v1846_v11 = vsub.f32 1.5, %v1845_v63 }
0x27dc   :  { %v1847_v12 = vmul.f32 %v2927_v60, %v1846_v11 }
0x27de   :  { %v1851_v13 = vsel %vm1850_vm4, %v2927_v60, %v1847_v12 }
0x27df   :  { %v1852_v15 = vmul.f32 %v1851_v13, %v1831_v1 }
0x27e1   :  { %v1853_v41 = vmul.f32 %v1852_v15, %v3344_v47 }
0x27e3   :  { %v3805_v38 = vadd.f32 %v1853_v41, %v3346_v50 }
0x27e5   :  { %2928 = vtanh.f32 %v3805_v38 }
0x27eb   :  { %v2929_v19 = vpop.eup %2928 }
0x27ec   :  { %1857 = vrot.lane.b32.xlu0 %v2929_v19, %s3023_s24 }
0x2815   :  { %v2008_v24 = vpop.permute.xlu2 %2007 }
0x2816   :  { %v2010_v2 = vmul.f32 %v2008_v24, %v3773_v31 }
0x2818   :  { %2012 = vrot.lane.b32.xlu1 %v2010_v2, %s3024_s2 }
0x285e   :  { %v1858_v5 = vpop.permute.xlu0 %1857 }
0x285f   :  { %v1860_v53 = vmul.f32 %v1858_v5, %v3777_v56 }
0x2861   :  { %1862 = vrot.lane.b32.xlu2 %v1860_v53, %s3024_s2 }
0x288a   :  { %v2013_v6 = vpop.permute.xlu1 %2012 }
0x288b   :  { %v2015_v34 = vsel %vm828_vm12, %v2013_v6, 0.0 }
0x288c   :  { %2016 = vadd.xlane.f32.xlu0 %v2015_v34 }
0x28bb   :  { %v1863_v7 = vpop.permute.xlu2 %1862 }
0x28bc   :  { %v1865_v1 = vsel %vm206_vm5, %v1863_v7, 0.0 }
0x28bd   :  { %1866 = vadd.xlane.f32.xlu2 %v1865_v1 }
0x28d5   :  { %2044 = vrot.lane.b32.xlu2 %v3815_v42, %s3025_s25 }
0x28ff   :  { %v2017_v31 = vpop.xlane.xlu0 %2016 }
0x2900   :  { %v2018_v20 = vmul.f32 %v2017_v31, %v3171_v43 }
0x2902   :  { %v2019_v10 = vsub.f32 %v2010_v2, %v2018_v20 }
0x2904   :  { %v2020_v56 = vmul.f32 %v2019_v10, %v2019_v10 }
0x2906   :  { %2022 = vrot.lane.b32.xlu1 %v2020_v56, %s3024_s2 }
0x2930   :  { %v1867_v21 = vpop.xlane.xlu2 %1866 }
0x2931   :  { %v1868_v22 = vmul.f32 %v1867_v21, %v3171_v43 }
0x2933   :  { %v1869_v23 = vsub.f32 %v1860_v53, %v1868_v22 }
0x2935   :  { %v1870_v30 = vmul.f32 %v1869_v23, %v1869_v23 }
0x2937   :  { %1872 = vrot.lane.b32.xlu1 %v1870_v30, %s3024_s2 }
0x2938   :  { %v2045_v63 = vpop.permute.xlu2 %2044 }
0x2978   :  { %v2023_v16 = vpop.permute.xlu1 %2022 }
0x2979   :  { %v2025_v25 = vsel %vm828_vm12, %v2023_v16, 0.0 }
0x297a   :  { %2026 = vadd.xlane.f32.xlu1 %v2025_v25  ;;  %v2197_v25 = vld [vmem:[#allocation2 + $0x10] sm:$0xc0] }
0x29a9   :  { %v1873_v26 = vpop.permute.xlu1 %1872 }
0x29aa   :  { %v1875_v8 = vsel %vm206_vm5, %v1873_v26, 0.0 }
0x29ab   :  { %1876 = vadd.xlane.f32.xlu0 %v1875_v8 }
0x29bf   :  { %1894 = vrot.lane.b32.xlu0 %v1893_v32, %s3023_s24 }
0x29ed   :  { %v2027_v61 = vpop.xlane.xlu1 %2026 }
0x29ee   :  { %v2028_v18 = vmul.f32 %v2027_v61, %v3171_v43  ;;  %v3851_v61 = vld [vmem:[%s4075_s5] ss:$0 sm:$0xff] }
0x29f0   :  { %v2029_v35 = vadd.f32 1e-05, %v2028_v18 }
0x29f2   :  { %2930 = vrsqrt.f32 %v2029_v35  ;;  %vm2036_vm7 = vweird.f32 %v2029_v35 }
0x29f8   :  { %v2931_v40 = vpop.eup %2930 }
0x29f9   :  { %v2031_v17 = vmul.f32 %v2931_v40, %v2029_v35  ;;  %vm2037_vm6 = vweird.f32 %v2931_v40 }
0x29fa   :  { %vm2038_vm8 = vmor %vm2036_vm7, %vm2037_vm6 }
0x29fb   :  { %v2032_v27 = vmul.f32 %v2931_v40, %v2031_v17 }
0x29fd   :  { %v2033_v51 = vmul.f32 0.5, %v2032_v27 }
0x29ff   :  { %v2034_v52 = vsub.f32 1.5, %v2033_v51 }
0x2a01   :  { %v2035_v9 = vmul.f32 %v2931_v40, %v2034_v52 }
0x2a03   :  { %v2039_v60 = vsel %vm2038_vm8, %v2931_v40, %v2035_v9 }
0x2a04   :  { %v2040_v62 = vmul.f32 %v2039_v60, %v2019_v10 }
0x2a06   :  { %v2041_v3 = vmul.f32 %v2040_v62, %v3259_v45 }
0x2a08   :  { %v2042_v48 = vadd.f32 %v2041_v3, %v3257_v39 }
0x2a0a   :  { %v3830_v11 = vadd.f32 %v2045_v63, %v2042_v48 }
0x2a0c   :  { %2049 = vrot.lane.b32.xlu2 %v3830_v11, %s3024_s2  ;;  %v2199_v12 = vrot.slane %v3830_v11, 4 }
0x2a0e   :  { %2200 = vrot.lane.b32.xlu0 %v2199_v12, %s3024_s2 }
0x2a1e   :  { %v1877_v13 = vpop.xlane.xlu0 %1876 }
0x2a1f   :  { %v1878_v15 = vmul.f32 %v1877_v13, %v3171_v43 }
0x2a21   :  { %v1879_v41 = vadd.f32 1e-05, %v1878_v15 }
0x2a23   :  { %2932 = vrsqrt.f32 %v1879_v41  ;;  %vm1886_vm13 = vweird.f32 %v1879_v41 }
0x2a29   :  { %v2933_v19 = vpop.eup %2932 }
0x2a2a   :  { %v1881_v24 = vmul.f32 %v2933_v19, %v1879_v41  ;;  %vm1887_vm9 = vweird.f32 %v2933_v19 }
0x2a2b   :  { %vm1888_vm1 = vmor %vm1886_vm13, %vm1887_vm9 }
0x2a2c   :  { %v1882_v2 = vmul.f32 %v2933_v19, %v1881_v24 }
0x2a2e   :  { %v1883_v5 = vmul.f32 0.5, %v1882_v2 }
0x2a30   :  { %v1884_v53 = vsub.f32 1.5, %v1883_v5 }
0x2a31   :  { %v1895_v20 = vpop.permute.xlu0 %1894 }
0x2a32   :  { %v1885_v6 = vmul.f32 %v2933_v19, %v1884_v53 }
0x2a34   :  { %v1889_v34 = vsel %vm1888_vm1, %v2933_v19, %v1885_v6 }
0x2a35   :  { %v1890_v7 = vmul.f32 %v1889_v34, %v1869_v23 }
0x2a37   :  { %v1891_v1 = vmul.f32 %v1890_v7, %v3391_v55 }
0x2a39   :  { %v1892_v31 = vadd.f32 %v1891_v1, %v3393_v59 }
0x2a3b   :  { %v3839_v10 = vadd.f32 %v1895_v20, %v1892_v31 }
0x2a3d   :  { %2053 = vrot.lane.b32.xlu2 %v3839_v10, %s3023_s24 }
0x2a66   :  { %v2050_v56 = vpop.permute.xlu2 %2049 }
0x2a67   :  { %2052 = vst.msk [vmem:[#allocation3 - $0x4] sm:$0x30] %vm828_vm12, %v2050_v56 }
0x2a80   :  { %v2201_v21 = vpop.permute.xlu0 %2200 }
0x2a81   :  { %2745 = vmatmul.msk.f32.vlgmr.msrb.gmra.mxu3 %vm146_vm14, %v2201_v21 }
0x2a97   :  { %v2054_v22 = vpop.permute.xlu2 %2053 }
0x2a98   :  { %2056 = vst.msk [vmem:[#allocation3] sm:$0x3] %vm310_vm15, %v2054_v22 }
0x2a9f   :  { %v2057_v23 = vld [vmem:[#allocation3] sm:$0x3] }
0x2aa0   :  { %2743 = vmatmul.msk.f32.vlgmr.msra.gmra.mxu1 %vm119_vm10, %v2057_v23 }
0x2b04   :  { %v2221_v30 = vpop.f32.mrf.mxu3 }
0x2b05   :  { %v2225_v16 = vrot.slane %v2221_v30, 2  ;;  %v2249_v30 = vrot.slane %v3798_v46, 6 }
0x2b07   :  { %v2227_v26 = vadd.f32 %v2225_v16, %v2197_v25 }
0x2b09   :  { %2934 = vtanh.f32 %v2227_v26  ;;  %v2746_v40 = vmul.f32 -1.442695, %v2227_v26 }
0x2b0f   :  { %v2935_v8 = vpop.eup %2934 }
0x2b10   :  { %2253 = vrot.lane.b32.xlu0 %v2935_v8, %s3023_s24 }
0x2b1d   :  { %v2078_v32 = vpop.f32.mrf.mxu1 }
0x2b1e   :  { %v2079_v18 = vadd.f32 %v3851_v61, %v2078_v32 }
0x2b20   :  { %2936 = vtanh.f32 %v2079_v18  ;;  %v2744_v52 = vmul.f32 -1.442695, %v2079_v18 }
0x2b21   :  { %2938 = vpow2.f32 %v2746_v40 }
0x2b26   :  { %v2937_v35 = vpop.eup %2936 }
0x2b27   :  { %2103 = vrot.lane.b32.xlu1 %v2937_v35, %s3023_s24  ;;  %v2939_v17 = vpop.eup %2938 }
0x2b28   :  { %v2231_v27 = vadd.f32 1.0, %v2939_v17 }
0x2b2a   :  { %2940 = vrcp.f32 %v2231_v27  ;;  %v2243_v12 = vand.u32 2147483648, %v2231_v27  ;;  %vm2237_vm4 = vweird.f32 %v2231_v27  ;;  %v2241_v13 = vand.u32 2147483647, %v2231_v27 }
0x2b2b   :  { %2942 = vpow2.f32 %v2744_v52 }
0x2b2c   :  { %v2244_v41 = vor.u32 1.1754944e-38, %v2243_v12  ;;  %vm2242_vm7 = vcmp.eq.f32.partialorder %v2241_v13, 8.507059e+37 }
0x2b30   :  { %v2941_v51 = vpop.eup %2940 }
0x2b31   :  { %v2233_v9 = vmul.f32 %v2941_v51, %v2231_v27  ;;  %v2943_v62 = vpop.eup %2942  ;;  %vm2238_vm3 = vweird.f32 %v2941_v51 }
0x2b32   :  { %v2084_v48 = vadd.f32 1.0, %v2943_v62  ;;  %vm2239_vm6 = vmor %vm2237_vm4, %vm2238_vm3 }
0x2b33   :  { %v2234_v60 = vsub.f32 1.0, %v2233_v9 }
0x2b34   :  { %2944 = vrcp.f32 %v2084_v48  ;;  %v2096_v1 = vand.u32 2147483648, %v2084_v48  ;;  %vm2090_vm9 = vweird.f32 %v2084_v48  ;;  %v2094_v31 = vand.u32 2147483647, %v2084_v48 }
0x2b35   :  { %v2235_v3 = vmul.f32 %v2941_v51, %v2234_v60 }
0x2b36   :  { %v2097_v56 = vor.u32 1.1754944e-38, %v2096_v1  ;;  %vm2095_vm1 = vcmp.eq.f32.partialorder %v2094_v31, 8.507059e+37 }
0x2b37   :  { %v2236_v63 = vadd.f32 %v2941_v51, %v2235_v3 }
0x2b39   :  { %v2240_v15 = vsel %vm2239_vm6, %v2941_v51, %v2236_v63 }
0x2b3a   :  { %v3855_v24 = vsel %vm2242_vm7, %v2244_v41, %v2240_v15  ;;  %v2945_v2 = vpop.eup %2944 }
0x2b3b   :  { %v2086_v53 = vmul.f32 %v2945_v2, %v2084_v48  ;;  %vm2091_vm8 = vweird.f32 %v2945_v2  ;;  %v2251_v16 = vmul.f32 %v2249_v30, %v3855_v24 }
0x2b3c   :  { %vm2092_vm13 = vmor %vm2090_vm9, %vm2091_vm8 }
0x2b3d   :  { %v2087_v6 = vsub.f32 1.0, %v2086_v53 }
0x2b3f   :  { %v2088_v34 = vmul.f32 %v2945_v2, %v2087_v6 }
0x2b41   :  { %v2089_v7 = vadd.f32 %v2945_v2, %v2088_v34 }
0x2b43   :  { %v2093_v20 = vsel %vm2092_vm13, %v2945_v2, %v2089_v7 }
0x2b44   :  { %v3859_v22 = vsel %vm2095_vm1, %v2097_v56, %v2093_v20 }
0x2b45   :  { %v2101_v8 = vmul.f32 %v3859_v22, %v3805_v38 }
0x2b82   :  { %v2254_v19 = vpop.permute.xlu0 %2253 }
0x2b83   :  { %v2256_v5 = vmul.f32 %v2254_v19, %v3855_v24 }
0x2b85   :  { %2258 = vrot.lane.b32.xlu2 %v2256_v5, %s3024_s2 }
0x2b99   :  { %v2104_v21 = vpop.permute.xlu1 %2103 }
0x2b9a   :  { %v2106_v23 = vmul.f32 %v2104_v21, %v3859_v22 }
0x2b9c   :  { %2108 = vrot.lane.b32.xlu0 %v2106_v23, %s3024_s2 }
0x2bdf   :  { %v2259_v25 = vpop.permute.xlu2 %2258 }
0x2be0   :  { %v2261_v26 = vadd.f32 %v2259_v25, %v2251_v16 }
0x2be2   :  { %2263 = vrot.lane.b32.xlu2 %v2261_v26, %s3025_s25 }
0x2c0e   :  { %v2109_v32 = vpop.permute.xlu0 %2108 }
0x2c0f   :  { %v2111_v18 = vadd.f32 %v2109_v32, %v2101_v8 }
0x2c11   :  { %2113 = vrot.lane.b32.xlu0 %v2111_v18, %s3025_s25 }
0x2c3c   :  { %v2264_v35 = vpop.permute.xlu2 %2263 }
0x2c3d   :  { %v2266_v40 = vsel %vm1118_vm2, %v2264_v35, 0.0 }
0x2c3e   :  { %2267 = vadd.xlane.f32.xlu2 %v2266_v40 }
0x2c83   :  { %v2114_v17 = vpop.permute.xlu0 %2113 }
0x2c84   :  { %v2116_v46 = vsel %vm206_vm5, %v2114_v17, 0.0 }
0x2c85   :  { %2117 = vadd.xlane.f32.xlu0 %v2116_v46 }
0x2cb1   :  { %v2268_v27 = vpop.xlane.xlu2 %2267 }
0x2cb2   :  { %v2269_v51 = vmul.f32 %v2268_v27, %v3171_v43 }
0x2cb4   :  { %v2270_v52 = vsub.f32 %v2261_v26, %v2269_v51 }
0x2cb6   :  { %v2271_v9 = vmul.f32 %v2270_v52, %v2270_v52 }
0x2cb8   :  { %2273 = vrot.lane.b32.xlu1 %v2271_v9, %s3025_s25 }
0x2cf8   :  { %v2118_v38 = vpop.xlane.xlu0 %2117 }
0x2cf9   :  { %v2119_v60 = vmul.f32 %v2118_v38, %v3171_v43 }
0x2cfb   :  { %v2120_v62 = vsub.f32 %v2111_v18, %v2119_v60 }
0x2cfd   :  { %v2121_v3 = vmul.f32 %v2120_v62, %v2120_v62 }
0x2cff   :  { %2123 = vrot.lane.b32.xlu1 %v2121_v3, %s3025_s25 }
0x2d2a   :  { %v2274_v48 = vpop.permute.xlu1 %2273 }
0x2d2b   :  { %v2276_v63 = vsel %vm1118_vm2, %v2274_v48, 0.0  ;;  %v3894_v48 = vld [vmem:[#allocation2 + $0x18] sm:$0xc0] }
0x2d2c   :  { %2277 = vadd.xlane.f32.xlu1 %v2276_v63 }
0x2d71   :  { %v2124_v12 = vpop.permute.xlu1 %2123 }
0x2d72   :  { %v2126_v13 = vsel %vm206_vm5, %v2124_v12, 0.0 }
0x2d73   :  { %2127 = vadd.xlane.f32.xlu2 %v2126_v13 }
0x2d9f   :  { %v2278_v15 = vpop.xlane.xlu1 %2277 }
0x2da0   :  { %v2279_v41 = vmul.f32 %v2278_v15, %v3171_v43 }
0x2da2   :  { %v2280_v19 = vadd.f32 1e-05, %v2279_v41 }
0x2da4   :  { %2946 = vrsqrt.f32 %v2280_v19  ;;  %vm2287_vm4 = vweird.f32 %v2280_v19 }
0x2daa   :  { %v2947_v2 = vpop.eup %2946 }
0x2dab   :  { %v2282_v5 = vmul.f32 %v2947_v2, %v2280_v19  ;;  %vm2288_vm3 = vweird.f32 %v2947_v2 }
0x2dac   :  { %vm2289_vm6 = vmor %vm2287_vm4, %vm2288_vm3 }
0x2dad   :  { %v2283_v53 = vmul.f32 %v2947_v2, %v2282_v5 }
0x2daf   :  { %v2284_v6 = vmul.f32 0.5, %v2283_v53 }
0x2db1   :  { %v2285_v34 = vsub.f32 1.5, %v2284_v6 }
0x2db3   :  { %v2286_v7 = vmul.f32 %v2947_v2, %v2285_v34  ;;  %v2182_v34 = vrot.slane %v3815_v42, 4 }
0x2db5   :  { %v2290_v1 = vsel %vm2289_vm6, %v2947_v2, %v2286_v7 }
0x2db6   :  { %v2291_v31 = vmul.f32 %v2290_v1, %v2270_v52 }
0x2db8   :  { %v2292_v20 = vmul.f32 %v2291_v31, %v3185_v58 }
0x2dba   :  { %v2293_v56 = vadd.f32 %v2292_v20, %v3187_v0 }
0x2dbc   :  { %2948 = vtanh.f32 %v2293_v56 }
0x2dc2   :  { %v2949_v21 = vpop.eup %2948 }
0x2dc3   :  { %2296 = vrot.lane.b32.xlu0 %v2949_v21, %s3023_s24 }
0x2de6   :  { %v2128_v23 = vpop.xlane.xlu2 %2127 }
0x2de7   :  { %v2129_v30 = vmul.f32 %v2128_v23, %v3171_v43 }
0x2de9   :  { %v2130_v16 = vadd.f32 1e-05, %v2129_v30 }
0x2deb   :  { %2950 = vrsqrt.f32 %v2130_v16  ;;  %vm2137_vm8 = vweird.f32 %v2130_v16 }
0x2df1   :  { %v2951_v25 = vpop.eup %2950 }
0x2df2   :  { %v2132_v26 = vmul.f32 %v2951_v25, %v2130_v16  ;;  %vm2138_vm7 = vweird.f32 %v2951_v25 }
0x2df3   :  { %vm2139_vm9 = vmor %vm2137_vm8, %vm2138_vm7 }
0x2df4   :  { %v2133_v8 = vmul.f32 %v2951_v25, %v2132_v26 }
0x2df6   :  { %v2134_v32 = vmul.f32 0.5, %v2133_v8 }
0x2df8   :  { %v2135_v18 = vsub.f32 1.5, %v2134_v32 }
0x2dfa   :  { %v2136_v35 = vmul.f32 %v2951_v25, %v2135_v18 }
0x2dfc   :  { %v2140_v58 = vsel %vm2139_vm9, %v2951_v25, %v2136_v35 }
0x2dfd   :  { %v2141_v0 = vmul.f32 %v2140_v58, %v2120_v62 }
0x2dff   :  { %v2142_v40 = vmul.f32 %v2141_v0, %v3344_v47 }
0x2e01   :  { %v3884_v17 = vadd.f32 %v2142_v40, %v3346_v50 }
0x2e03   :  { %2952 = vtanh.f32 %v3884_v17 }
0x2e09   :  { %v2953_v46 = vpop.eup %2952 }
0x2e0a   :  { %2146 = vrot.lane.b32.xlu2 %v2953_v46, %s3023_s24 }
0x2e35   :  { %v2297_v27 = vpop.permute.xlu0 %2296 }
0x2e36   :  { %v2299_v51 = vmul.f32 %v2297_v27, %v3855_v24 }
0x2e38   :  { %2301 = vrot.lane.b32.xlu1 %v2299_v51, %s3024_s2 }
0x2e64   :  { %v2147_v52 = vpop.permute.xlu2 %2146 }
0x2e65   :  { %v2149_v9 = vmul.f32 %v2147_v52, %v3859_v22 }
0x2e67   :  { %2151 = vrot.lane.b32.xlu0 %v2149_v9, %s3024_s2 }
0x2eaa   :  { %v2302_v38 = vpop.permute.xlu1 %2301 }
0x2eab   :  { %v2304_v60 = vsel %vm1118_vm2, %v2302_v38, 0.0 }
0x2eac   :  { %2305 = vadd.xlane.f32.xlu0 %v2304_v60 }
0x2ed9   :  { %v2152_v62 = vpop.permute.xlu0 %2151 }
0x2eda   :  { %v2154_v3 = vsel %vm206_vm5, %v2152_v62, 0.0 }
0x2edb   :  { %2155 = vadd.xlane.f32.xlu2 %v2154_v3 }
0x2ef3   :  { %2333 = vrot.lane.b32.xlu2 %v3894_v48, %s3025_s25 }
0x2f1f   :  { %v2306_v24 = vpop.xlane.xlu0 %2305 }
0x2f20   :  { %v2307_v63 = vmul.f32 %v2306_v24, %v3171_v43 }
0x2f22   :  { %v2308_v12 = vsub.f32 %v2299_v51, %v2307_v63 }
0x2f24   :  { %v2309_v22 = vmul.f32 %v2308_v12, %v2308_v12 }
0x2f26   :  { %2311 = vrot.lane.b32.xlu1 %v2309_v22, %s3024_s2 }
0x2f4e   :  { %v2156_v13 = vpop.xlane.xlu2 %2155 }
0x2f4f   :  { %v2157_v15 = vmul.f32 %v2156_v13, %v3171_v43 }
0x2f51   :  { %v2158_v41 = vsub.f32 %v2149_v9, %v2157_v15 }
0x2f53   :  { %v2159_v19 = vmul.f32 %v2158_v41, %v2158_v41 }
0x2f55   :  { %2161 = vrot.lane.b32.xlu1 %v2159_v19, %s3024_s2 }
0x2f56   :  { %v2334_v32 = vpop.permute.xlu2 %2333 }
0x2f98   :  { %v2312_v2 = vpop.permute.xlu1 %2311 }
0x2f99   :  { %v2314_v5 = vsel %vm1118_vm2, %v2312_v2, 0.0 }
0x2f9a   :  { %2315 = vadd.xlane.f32.xlu1 %v2314_v5 }
0x2fc7   :  { %v2162_v53 = vpop.permute.xlu1 %2161 }
0x2fc8   :  { %v2164_v6 = vsel %vm206_vm5, %v2162_v53, 0.0 }
0x2fc9   :  { %2165 = vadd.xlane.f32.xlu0 %v2164_v6 }
0x2fdd   :  { %2183 = vrot.lane.b32.xlu0 %v2182_v34, %s3023_s24 }
0x300d   :  { %v2316_v7 = vpop.xlane.xlu1 %2315 }
0x300e   :  { %v2317_v1 = vmul.f32 %v2316_v7, %v3171_v43 }
0x3010   :  { %v2318_v31 = vadd.f32 1e-05, %v2317_v1 }
0x3012   :  { %2954 = vrsqrt.f32 %v2318_v31  ;;  %vm2325_vm1 = vweird.f32 %v2318_v31 }
0x3018   :  { %v2955_v20 = vpop.eup %2954 }
0x3019   :  { %v2320_v56 = vmul.f32 %v2955_v20, %v2318_v31  ;;  %vm2326_vm13 = vweird.f32 %v2955_v20 }
0x301a   :  { %vm2327_vm3 = vmor %vm2325_vm1, %vm2326_vm13 }
0x301b   :  { %v2321_v21 = vmul.f32 %v2955_v20, %v2320_v56 }
0x301d   :  { %v2322_v23 = vmul.f32 0.5, %v2321_v21 }
0x301f   :  { %v2323_v30 = vsub.f32 1.5, %v2322_v23 }
0x3021   :  { %v2324_v16 = vmul.f32 %v2955_v20, %v2323_v30 }
0x3023   :  { %v2328_v25 = vsel %vm2327_vm3, %v2955_v20, %v2324_v16 }
0x3024   :  { %v2329_v26 = vmul.f32 %v2328_v25, %v2308_v12 }
0x3026   :  { %v2330_v42 = vmul.f32 %v2329_v26, %v3259_v45 }
0x3028   :  { %v2331_v8 = vadd.f32 %v2330_v42, %v3257_v39 }
0x302a   :  { %v3909_v18 = vadd.f32 %v2334_v32, %v2331_v8 }
0x302c   :  { %2338 = vrot.lane.b32.xlu2 %v3909_v18, %s3024_s2 }
0x303c   :  { %v2166_v35 = vpop.xlane.xlu0 %2165 }
0x303d   :  { %v2167_v58 = vmul.f32 %v2166_v35, %v3171_v43 }
0x303f   :  { %v2168_v0 = vadd.f32 1e-05, %v2167_v58 }
0x3041   :  { %2956 = vrsqrt.f32 %v2168_v0  ;;  %vm2175_vm6 = vweird.f32 %v2168_v0 }
0x3047   :  { %v2957_v40 = vpop.eup %2956 }
0x3048   :  { %v2170_v46 = vmul.f32 %v2957_v40, %v2168_v0  ;;  %vm2176_vm4 = vweird.f32 %v2957_v40 }
0x3049   :  { %vm2177_vm7 = vmor %vm2175_vm6, %vm2176_vm4 }
0x304a   :  { %v2171_v27 = vmul.f32 %v2957_v40, %v2170_v46 }
0x304c   :  { %v2172_v51 = vmul.f32 0.5, %v2171_v27 }
0x304e   :  { %v2173_v52 = vsub.f32 1.5, %v2172_v51 }
0x304f   :  { %v2184_v62 = vpop.permute.xlu0 %2183 }
0x3050   :  { %v2174_v45 = vmul.f32 %v2957_v40, %v2173_v52 }
0x3052   :  { %v2178_v39 = vsel %vm2177_vm7, %v2957_v40, %v2174_v45 }
0x3053   :  { %v2179_v9 = vmul.f32 %v2178_v39, %v2158_v41 }
0x3055   :  { %v2180_v38 = vmul.f32 %v2179_v9, %v3391_v55 }
0x3057   :  { %v2181_v60 = vadd.f32 %v2180_v38, %v3393_v59 }
0x3059   :  { %v3916_v3 = vadd.f32 %v2184_v62, %v2181_v60 }
0x305b   :  { %2342 = vrot.lane.b32.xlu0 %v3916_v3, %s3023_s24 }
0x3086   :  { %v2339_v24 = vpop.permute.xlu2 %2338 }
0x3087   :  { %2341 = vst.msk [vmem:[#allocation3 - $0x6] sm:$0xc0] %vm1118_vm2, %v2339_v24 }
0x30cd   :  { %v2343_v63 = vpop.permute.xlu0 %2342 }
0x30ce   :  { %2345 = vst.msk [vmem:[#allocation3] sm:$0x3] %vm310_vm15, %v2343_v63 }
0x30d5   :  { %v2346_v12 = vld [vmem:[#allocation3] sm:$0x3] }
0x30d6   :  { %2747 = vmatmul.msk.f32.vlgmr.msra.gmra.mxu0 %vm119_vm10, %v2346_v12 }
0x3153   :  { %v2367_v22 = vpop.f32.mrf.mxu0 }
0x3154   :  { %v2368_v13 = vadd.f32 %v3851_v61, %v2367_v22 }
0x3156   :  { %2958 = vtanh.f32 %v2368_v13  ;;  %v2748_v41 = vmul.f32 -1.442695, %v2368_v13 }
0x3158   :  { %2960 = vpow2.f32 %v2748_v41 }
0x315c   :  { %v2959_v15 = vpop.eup %2958 }
0x315d   :  { %2392 = vrot.lane.b32.xlu1 %v2959_v15, %s3023_s24 }
0x315e   :  { %v2961_v19 = vpop.eup %2960 }
0x315f   :  { %v2373_v2 = vadd.f32 1.0, %v2961_v19  ;;  %v750_v19 = vrot.slane %v3492_v14, 6  ;;  %v1040_v14 = vrot.slane %v3581_v57, 4 }
0x3161   :  { %2962 = vrcp.f32 %v2373_v2  ;;  %v2385_v1 = vand.u32 2147483648, %v2373_v2  ;;  %vm2379_vm10 = vweird.f32 %v2373_v2  ;;  %v2383_v31 = vand.u32 2147483647, %v2373_v2 }
0x3163   :  { %v2386_v20 = vor.u32 1.1754944e-38, %v2385_v1  ;;  %vm2384_vm9 = vcmp.eq.f32.partialorder %v2383_v31, 8.507059e+37 }
0x3167   :  { %v2963_v5 = vpop.eup %2962 }
0x3168   :  { %v2375_v53 = vmul.f32 %v2963_v5, %v2373_v2  ;;  %vm2380_vm15 = vweird.f32 %v2963_v5  ;;  %v752_v2 = vadd.f32 %v750_v19, %v3384_v37  ;;  %v1042_v37 = vadd.f32 %v1040_v14, %v3483_v44 }
0x3169   :  { %vm2381_vm8 = vmor %vm2379_vm10, %vm2380_vm15 }
0x316a   :  { %v2376_v6 = vsub.f32 1.0, %v2375_v53  ;;  %v1043_v1 = vmul.f32 0.5, %v1042_v37 }
0x316c   :  { %v2377_v34 = vmul.f32 %v2963_v5, %v2376_v6 }
0x316e   :  { %v2378_v7 = vadd.f32 %v2963_v5, %v2377_v34  ;;  %v464_v34 = vadd.f32 %v3397_v29, %v3263_v49  ;;  %v2188_v29 = vrot.slane %v3916_v3, 4  ;;  %v2471_v3 = vrot.slane %v3894_v48, 6  ;;  %v2491_v48 = vld [vmem:[%s4078_s8 + $0x18] sm:$0xff] }
0x316f   :  { %2514 = vmatpush.msra.mxu2 %v2491_v48 }
0x3170   :  { %v2382_v61 = vsel %vm2381_vm8, %v2963_v5, %v2378_v7  ;;  %v753_v5 = vmul.f32 0.5, %v752_v2  ;;  %v465_v7 = vmul.f32 0.5, %v464_v34  ;;  %v2190_v57 = vadd.f32 %v2188_v29, %v3830_v11 }
0x3171   :  { %v2387_v21 = vsel %vm2384_vm9, %v2386_v20, %v2382_v61  ;;  %v1614_v61 = vadd.f32 %v3762_v4, %v3678_v36  ;;  %v1330_v11 = vrot.slane %v3685_v28, 2 }
0x3172   :  { %v2390_v30 = vmul.f32 %v2387_v21, %v3884_v17  ;;  %v2191_v44 = vmul.f32 0.5, %v2190_v57 }
0x3173   :  { %v1615_v49 = vmul.f32 0.5, %v1614_v61 }
0x31cf   :  { %v2393_v56 = vpop.permute.xlu1 %2392 }
0x31d0   :  { %v2395_v23 = vmul.f32 %v2393_v56, %v2387_v21 }
0x31d2   :  { %2397 = vrot.lane.b32.xlu2 %v2395_v23, %s3024_s2 }
0x322c   :  { %v2398_v16 = vpop.permute.xlu2 %2397 }
0x322d   :  { %v2400_v25 = vadd.f32 %v2398_v16, %v2390_v30  ;;  %v1899_v16 = vrot.slane %v3839_v10, 6  ;;  %v2490_v10 = vld [vmem:[%s4078_s8 + $0x10] sm:$0xff] }
0x322e   :  { %2515 = vmatpush.msra.mxu2 %v2490_v10 }
0x322f   :  { %2402 = vrot.lane.b32.xlu0 %v2400_v25, %s3025_s25 }
0x32a1   :  { %v2403_v26 = vpop.permute.xlu0 %2402 }
0x32a2   :  { %v2405_v42 = vsel %vm206_vm5, %v2403_v26, 0.0 }
0x32a3   :  { %2406 = vadd.xlane.f32.xlu2 %v2405_v42  ;;  %v2489_v42 = vld [vmem:[%s4078_s8 + $0x8] sm:$0xff] }
0x32a4   :  { %2516 = vmatpush.msra.mxu2 %v2489_v42 }
0x3316   :  { %v2407_v8 = vpop.xlane.xlu2 %2406 }
0x3317   :  { %v2408_v32 = vmul.f32 %v2407_v8, %v3171_v43 }
0x3319   :  { %v2409_v35 = vsub.f32 %v2400_v25, %v2408_v32  ;;  %v1901_v25 = vadd.f32 %v1899_v16, %v3754_v33  ;;  %v2488_v32 = vld [vmem:[%s4078_s8] sm:$0xff] }
0x331a   :  { %2517 = vmatpush.msra.mxu2 %v2488_v32  ;;  %v2585_v16 = vld [vmem:[%s4083_s13] sm:$0xff] }
0x331b   :  { %v2410_v58 = vmul.f32 %v2409_v35, %v2409_v35 }
0x331d   :  { %2412 = vrot.lane.b32.xlu0 %v2410_v58, %s3025_s25 }
0x338f   :  { %v2413_v0 = vpop.permute.xlu0 %2412 }
0x3390   :  { %v2415_v40 = vsel %vm206_vm5, %v2413_v0, 0.0 }
0x3391   :  { %2416 = vadd.xlane.f32.xlu0 %v2415_v40 }
0x3404   :  { %v2417_v17 = vpop.xlane.xlu0 %2416 }
0x3405   :  { %v2418_v46 = vmul.f32 %v2417_v17, %v3171_v43 }
0x3407   :  { %v2419_v27 = vadd.f32 1e-05, %v2418_v46 }
0x3409   :  { %2964 = vrsqrt.f32 %v2419_v27  ;;  %vm2426_vm1 = vweird.f32 %v2419_v27 }
0x340f   :  { %v2965_v51 = vpop.eup %2964 }
0x3410   :  { %v2421_v52 = vmul.f32 %v2965_v51, %v2419_v27  ;;  %vm2427_vm13 = vweird.f32 %v2965_v51 }
0x3411   :  { %vm2428_vm3 = vmor %vm2426_vm1, %vm2427_vm13 }
0x3412   :  { %v2422_v45 = vmul.f32 %v2965_v51, %v2421_v52 }
0x3414   :  { %v2423_v39 = vmul.f32 0.5, %v2422_v45 }
0x3416   :  { %v2424_v9 = vsub.f32 1.5, %v2423_v39 }
0x3418   :  { %v2425_v38 = vmul.f32 %v2965_v51, %v2424_v9 }
0x341a   :  { %v2429_v60 = vsel %vm2428_vm3, %v2965_v51, %v2425_v38 }
0x341b   :  { %v2430_v62 = vmul.f32 %v2429_v60, %v2409_v35 }
0x341d   :  { %v2431_v24 = vmul.f32 %v2430_v62, %v3344_v47 }
0x341f   :  { %v2432_v63 = vadd.f32 %v2431_v24, %v3346_v50 }
0x3421   :  { %2966 = vtanh.f32 %v2432_v63 }
0x3427   :  { %v2967_v12 = vpop.eup %2966 }
0x3428   :  { %2435 = vrot.lane.b32.xlu1 %v2967_v12, %s3023_s24 }
0x349a   :  { %v2436_v22 = vpop.permute.xlu1 %2435 }
0x349b   :  { %v2438_v13 = vmul.f32 %v2436_v22, %v2387_v21  ;;  %v1332_v21 = vadd.f32 %v1330_v11, %v3572_v54  ;;  %v1902_v54 = vmul.f32 0.5, %v1901_v25 }
0x349d   :  { %2440 = vrot.lane.b32.xlu1 %v2438_v13, %s3024_s2  ;;  %v1333_v30 = vmul.f32 0.5, %v1332_v21 }
0x350f   :  { %v2441_v15 = vpop.permute.xlu1 %2440 }
0x3510   :  { %v2443_v41 = vsel %vm206_vm5, %v2441_v15, 0.0 }
0x3511   :  { %2444 = vadd.xlane.f32.xlu1 %v2443_v41 }
0x352a   :  { %755 = vrot.lane.b32.xlu1 %v753_v5, %s3024_s2 }
0x3584   :  { %v2445_v47 = vpop.xlane.xlu1 %2444 }
0x3585   :  { %v2446_v50 = vmul.f32 %v2445_v47, %v3171_v43 }
0x3587   :  { %v3942_v53 = vsub.f32 %v2438_v13, %v2446_v50  ;;  %v2774_v13 = vld [vmem:[%s4080_s10] ss:$0 sm:$0xff] }
0x3589   :  { %v2448_v6 = vmul.f32 %v3942_v53, %v3942_v53 }
0x358b   :  { %2450 = vrot.lane.b32.xlu2 %v2448_v6, %s3024_s2  ;;  %v2775_v6 = vld [vmem:[#allocation4] ss:$0 sm:$0xff] }
0x3593   :  { %467 = vrot.lane.b32.xlu2 %v465_v7, %s3024_s2 }
0x359b   :  { %1045 = vrot.lane.b32.xlu2 %v1043_v1, %s3024_s2 }
0x359c   :  { %v756_v31 = vpop.permute.xlu1 %755 }
0x359d   :  { %758 = vst.msk [vmem:[%s4084_s14] sm:$0xc] %vm537_vm11, %v756_v31 }
0x35a3   :  { %1617 = vrot.lane.b32.xlu2 %v1615_v49, %s3024_s2 }
0x35ab   :  { %2193 = vrot.lane.b32.xlu2 %v2191_v44, %s3024_s2 }
0x35e5   :  { %v2451_v20 = vpop.permute.xlu2 %2450 }
0x35e6   :  { %v2453_v56 = vsel %vm206_vm5, %v2451_v20, 0.0 }
0x35e7   :  { %2454 = vadd.xlane.f32.xlu0 %v2453_v56 }
0x35ed   :  { %v468_v36 = vpop.permute.xlu2 %467 }
0x35ee   :  { %470 = vst.msk [vmem:[%s4084_s14] sm:$0x3] %vm206_vm5, %v468_v36 }
0x35f5   :  { %v1046_v4 = vpop.permute.xlu2 %1045 }
0x35f6   :  { %1048 = vst.msk [vmem:[%s4084_s14] sm:$0x30] %vm828_vm12, %v1046_v4 }
0x35fb   :  { %2472 = vrot.lane.b32.xlu0 %v2471_v3, %s3023_s24 }
0x35fd   :  { %v1618_v23 = vpop.permute.xlu2 %1617 }
0x35fe   :  { %1620 = vst.msk [vmem:[%s4084_s14 + $0x8] sm:$0x3] %vm206_vm5, %v1618_v23  ;;  %v2561_v23 = vld [vmem:[%s4082_s12] sm:$0x3] }
0x3603   :  { %1335 = vrot.lane.b32.xlu0 %v1333_v30, %s3024_s2 }
0x3605   :  { %v2194_v28 = vpop.permute.xlu2 %2193 }
0x3606   :  { %2196 = vst.msk [vmem:[%s4084_s14 + $0x8] sm:$0x30] %vm828_vm12, %v2194_v28  ;;  %v2586_v28 = vld [vmem:[%s4083_s13 + $0x8] sm:$0xff] }
0x360b   :  { %1904 = vrot.lane.b32.xlu0 %v1902_v54, %s3024_s2  ;;  %v3027_v54 = vmov 0  }
0x360c   :  { %2763 = vset.pattern.permute.xlu0 %v3027_v54 }
0x365a   :  { %v2455_v26 = vpop.xlane.xlu0 %2454 }
0x365b   :  { %v2456_v33 = vmul.f32 %v2455_v26, %v3171_v43 }
0x365d   :  { %v2457_v8 = vadd.f32 1e-05, %v2456_v33 }
0x365f   :  { %2968 = vrsqrt.f32 %v2457_v8  ;;  %vm2464_vm4 = vweird.f32 %v2457_v8 }
0x3665   :  { %v2969_v35 = vpop.eup %2968 }
0x3666   :  { %v2459_v58 = vmul.f32 %v2969_v35, %v2457_v8  ;;  %vm2465_vm12 = vweird.f32 %v2969_v35 }
0x3667   :  { %vm2466_vm6 = vmor %vm2464_vm4, %vm2465_vm12 }
0x3668   :  { %v2460_v0 = vmul.f32 %v2969_v35, %v2459_v58 }
0x366a   :  { %v2461_v40 = vmul.f32 0.5, %v2460_v0 }
0x366c   :  { %v2462_v17 = vsub.f32 1.5, %v2461_v40 }
0x366d   :  { %v2473_v46 = vpop.permute.xlu0 %2472 }
0x366e   :  { %v2463_v43 = vmul.f32 %v2969_v35, %v2462_v17 }
0x3670   :  { %v2467_v27 = vsel %vm2466_vm6, %v2969_v35, %v2463_v43 }
0x3671   :  { %v2468_v51 = vmul.f32 %v2467_v27, %v3942_v53 }
0x3673   :  { %v2469_v52 = vmul.f32 %v2468_v51, %v3391_v55 }
0x3675   :  { %v2470_v45 = vadd.f32 %v2469_v52, %v3393_v59  ;;  %v1336_v39 = vpop.permute.xlu0 %1335 }
0x3676   :  { %1338 = vst.msk [vmem:[%s4084_s14] sm:$0xc0] %vm1118_vm2, %v1336_v39 }
0x3677   :  { %v2475_v9 = vadd.f32 %v2473_v46, %v2470_v45 }
0x3679   :  { %v2477_v38 = vrot.slane %v2475_v9, 2 }
0x367b   :  { %v2479_v60 = vadd.f32 %v2477_v38, %v3909_v18  ;;  %v2773_v18 = vld [vmem:[%s4079_s9] ss:$0 sm:$0xff] }
0x367d   :  { %v2480_v62 = vmul.f32 0.5, %v2479_v60  ;;  %v1905_v24 = vpop.permute.xlu0 %1904  ;;  %v4012_v63 = vld [vmem:[%s4084_s14] sm:$0xff] }
0x367e   :  { %1907 = vst.msk [vmem:[%s4084_s14 + $0x8] sm:$0xc] %vm537_vm11, %v1905_v24  ;;  %2749 = vmatmul.msk.f32.vlgmr.msra.gmra.mxu2 %vm146_vm14, %v4012_v63  ;;  %vm2545_vm11 = vcmask 7168  }
0x367f   :  { %2482 = vrot.lane.b32.xlu0 %v2480_v62, %s3024_s2 }
0x36f1   :  { %v2483_v55 = vpop.permute.xlu0 %2482 }
0x36f2   :  { %2485 = vst.msk [vmem:[%s4084_s14 + $0x8] sm:$0xc0] %vm1118_vm2, %v2483_v55  ;;  %vm2587_vm2 = vcmask 15360  }
0x36f9   :  { %v4028_v59 = vld [vmem:[%s4084_s14 + $0x8] sm:$0xff] }
0x36fa   :  { %2750 = vmatmul.msk.f32.gmra.mxu2 %vm146_vm14, %v4028_v59 }
0x3701   :  { %v2519_v12 = vpop.f32.mrf.mxu2 }
0x3702   :  { %v2520_v22 = vadd.f32 %v2773_v18, %v2519_v12 }
0x3704   :  { %2970 = vtanh.f32 %v2520_v22 }
0x370a   :  { %v2971_v15 = vpop.eup %2970 }
0x370b   :  { %v2531_v41 = vmul.f32 %v2971_v15, %v2774_v13 }
0x370d   :  { %v2533_v19 = vsel %vm146_vm14, %v2531_v41, 0.0 }
0x370e   :  { %2534 = vadd.xlane.f32.xlu1 %v2533_v19 }
0x377d   :  { %v2522_v2 = vpop.f32.mrf.mxu2 }
0x377e   :  { %v2523_v5 = vadd.f32 %v2773_v18, %v2522_v2 }
0x3780   :  { %2972 = vtanh.f32 %v2523_v5 }
0x3781   :  { %v2535_v34 = vpop.xlane.xlu1 %2534 }
0x3782   :  { %v2543_v7 = vadd.f32 %v2775_v6, %v2535_v34 }
0x3784   :  { %v2546_v1 = vsel %vm2545_vm11, %v2543_v7, -inf }
0x3786   :  { %v2973_v47 = vpop.eup %2972 }
0x3787   :  { %v2532_v50 = vmul.f32 %v2973_v47, %v2774_v13  ;;  %v2653_v13 = vld [vmem:[%s4082_s12] sm:$0x3] }
0x3789   :  { %v2536_v53 = vsel %vm146_vm14, %v2532_v50, 0.0  ;;  %vm2594_vm14 = vcmask 1041408  }
0x378a   :  { %2537 = vadd.xlane.f32.xlu2 %v2536_v53 }
0x37fd   :  { %v2538_v14 = vpop.xlane.xlu2 %2537 }
0x37fe   :  { %v2544_v37 = vadd.f32 %v2775_v6, %v2538_v14 }
0x3800   :  { %v2547_v31 = vsel %vm2545_vm11, %v2544_v37, -inf }
0x3801   :  { %v2548_v61 = vmax.f32 %v2546_v1, %v2547_v31 }
0x3803   :  { %v2549_v49 = vrot.slane %v2548_v61, 4 }
0x3805   :  { %v2550_v29 = vmax.f32 %v2548_v61, %v2549_v49 }
0x3807   :  { %v2551_v57 = vrot.slane %v2550_v29, 2 }
0x3809   :  { %v2552_v44 = vmax.f32 %v2550_v29, %v2551_v57 }
0x380b   :  { %v2553_v20 = vrot.slane %v2552_v44, 1 }
0x380d   :  { %v2554_v56 = vmax.f32 %v2552_v44, %v2553_v20 }
0x380f   :  { %v2555_v36 = vsub.f32 %v2543_v7, %v2554_v56  ;;  %v2556_v4 = vsub.f32 %v2544_v37, %v2554_v56 }
0x3811   :  { %v2559_v11 = vmul.f32 1.442695, %v2556_v4  ;;  %v2557_v3 = vmul.f32 1.442695, %v2555_v36 }
0x3813   :  { %2974 = vpow2.f32 %v2559_v11 }
0x3814   :  { %2976 = vpow2.f32 %v2557_v3 }
0x3819   :  { %v2975_v21 = vpop.eup %2974 }
0x381a   :  { %2579 = vmatpush.msra.mxu3 %v2975_v21  ;;  %v2977_v30 = vpop.eup %2976 }
0x381c   :  { %2580 = vmatpush.msra.mxu3 %v2977_v30 }
0x381d   :  { %2751 = vmatmul.msk.f32.vlgmr.msra.gmra.mxu3 %vm65_vm0, %v2561_v23 }
0x38a0   :  { %v2582_v25 = vpop.f32.mrf.mxu3 }
0x38a1   :  { %2752 = vmatpush.msk.msrb.mxu1 %vm2594_vm14, %v2582_v25 }
0x38a2   :  { %2753 = vmatmul.msk.f32.vlgmr.msrb.gmra.mxu1 %vm2587_vm2, %v2585_v16 }
0x38aa   :  { %2754 = vmatmul.msk.f32.gmra.mxu1 %vm2587_vm2, %v2586_v28 }
0x391f   :  { %v2615_v48 = vpop.f32.mrf.mxu1 }
0x3920   :  { %2978 = vrcp.f32 %v2615_v48  ;;  %v2632_v8 = vand.u32 2147483648, %v2615_v48  ;;  %v2630_v35 = vand.u32 2147483647, %v2615_v48  ;;  %vm2626_vm15 = vweird.f32 %v2615_v48 }
0x3922   :  { %v2633_v40 = vor.u32 1.1754944e-38, %v2632_v8  ;;  %vm2631_vm8 = vcmp.eq.f32.partialorder %v2630_v35, 8.507059e+37 }
0x3926   :  { %v2979_v10 = vpop.eup %2978 }
0x3927   :  { %v2622_v26 = vmul.f32 %v2979_v10, %v2615_v48  ;;  %v2618_v33 = vpop.f32.mrf.mxu1  ;;  %vm2627_vm7 = vweird.f32 %v2979_v10 }
0x3928   :  { %2980 = vrcp.f32 %v2618_v33  ;;  %vm2628_vm10 = vmor %vm2626_vm15, %vm2627_vm7  ;;  %v2647_v52 = vand.u32 2147483648, %v2618_v33  ;;  %v2645_v39 = vand.u32 2147483647, %v2618_v33  ;;  %vm2641_vm13 = vweird.f32 %v2618_v33 }
0x3929   :  { %v2623_v42 = vsub.f32 1.0, %v2622_v26 }
0x392a   :  { %v2648_v38 = vor.u32 1.1754944e-38, %v2647_v52  ;;  %vm2646_vm3 = vcmp.eq.f32.partialorder %v2645_v39, 8.507059e+37 }
0x392b   :  { %v2624_v32 = vmul.f32 %v2979_v10, %v2623_v42 }
0x392d   :  { %v2625_v58 = vadd.f32 %v2979_v10, %v2624_v32 }
0x392e   :  { %v2981_v0 = vpop.eup %2980 }
0x392f   :  { %v2637_v17 = vmul.f32 %v2981_v0, %v2618_v33  ;;  %v2629_v46 = vsel %vm2628_vm10, %v2979_v10, %v2625_v58  ;;  %vm2642_vm9 = vweird.f32 %v2981_v0 }
0x3930   :  { %v2634_v43 = vsel %vm2631_vm8, %v2633_v40, %v2629_v46  ;;  %vm2643_vm1 = vmor %vm2641_vm13, %vm2642_vm9 }
0x3931   :  { %v2638_v27 = vsub.f32 1.0, %v2637_v17  ;;  %v2635_v51 = vmul.f32 %v2977_v30, %v2634_v43 }
0x3933   :  { %v2639_v45 = vmul.f32 %v2981_v0, %v2638_v27  ;;  %2656 = vperm.xlu0 %2763, %v2635_v51   ;;  %2651 = vst.msk [vmem:[%s4086_s16] sm:$0xff] %vm2545_vm11, %v2635_v51 }
0x3935   :  { %v2640_v9 = vadd.f32 %v2981_v0, %v2639_v45 }
0x3937   :  { %v2644_v60 = vsel %vm2643_vm1, %v2981_v0, %v2640_v9 }
0x3938   :  { %v2649_v62 = vsel %vm2646_vm3, %v2648_v38, %v2644_v60 }
0x3939   :  { %v2650_v24 = vmul.f32 %v2975_v21, %v2649_v62 }
0x393b   :  { %2661 = vperm.xlu0 %2763, %v2650_v24   ;;  %2652 = vst.msk [vmem:[%s4086_s16 + $0x8] sm:$0xff] %vm2545_vm11, %v2650_v24  ;;  %s2699_s16 = sshll.u32 %s4085_s15, 4  ;;  %s2700_s16 = int_to_ptr.hbm [resolvable:$true] %s2699_s16 }
0x39a5   :  { %v2657_v55 = vpop.permute.xlu0 %2656 }
0x39a6   :  { %v2664_v22 = vmul.f32 %v2657_v55, %v4012_v63 }
0x39ad   :  { %v2662_v18 = vpop.permute.xlu0 %2661 }
0x39ae   :  { %v2665_v12 = vmul.f32 %v2662_v18, %v4028_v59 }
0x39b0   :  { %2683 = vmatpush.msrb.mxu3 %v2665_v12 }
0x39b2   :  { %2684 = vmatpush.msrb.mxu3 %v2664_v22 }
0x39b3   :  { %2755 = vmatmul.msk.f32.vlgmr.msrb.gmra.mxu3 %vm65_vm0, %v2653_v13 }
0x3a36   :  { %v2686_v15 = vpop.f32.mrf.mxu3 }
0x3a37   :  { %2689 = vst.msk [vmem:[#allocation5] sm:$0x3] %vm206_vm5, %v2686_v15 }
0x3a38   :  { %2702 = dma.vmem_to_hbm [thread:$0]  %s2698_s23, 32, %s2700_s16, [#allocation6]  }
0x3a39   :  { %3020 = dma.done.wait [#allocation6], 32  }
0x3a3a   :  { %3021 = vsyncadd [#allocation6], 4294967264 }
0x3a3b   :  { %2713 = vsyncpa [#allocation6], 1 }

</bundles_post_ra>
